<compile_context>
chip_gen: v7x
topology: tpu7x:2x2x1
jax: 0.10.0
libtpu: 0.0.40
codegen_flags: <defaults>
</compile_context>

<pallas_src>
import functools
import re

import jax
import jax.numpy as jnp
from jax import lax
from jax.experimental import pallas as pl
from jax.experimental.pallas import tpu as pltpu


def _decoder_score_kernel(tgt_ref, mem_ref, w_ref, out_ref, maxs_ref, sums_ref,
                          *, cs, reduce_dtype):
    """One (q-tile, k-tile, layer) grid step.

    tgt_ref  : [tq, hw, d]       bf16 query features, layer l (t on sublanes, d on lanes)
    mem_ref  : [hw, d, tk]       bf16 memory features, layer l (s major, d sublanes, k lanes)
    w_ref    : [hw//cs, hw, cs]  f32 sigmoid(score_embed_l) blocked: [s-block, t, s-in-block]
    out_ref  : [tq, tk]          f32 score tile; resident across the layer axis (accumulator)
    maxs_ref : [tq, hw, tk]      scratch: running max over s      (term  sum_t max_s)
    sums_ref : [tq, tk]          f32 scratch: running sum over s of max_t
    """
    l = pl.program_id(2)

    @pl.when(l == 0)
    def _():
        out_ref[...] = jnp.zeros_like(out_ref)

    tq, hw, d = tgt_ref.shape
    tk = mem_ref.shape[2]
    n_sblk = w_ref.shape[0]

    # scratch persists across grid steps -> reset at every (i, j, l) step
    maxs_ref[...] = jnp.full(maxs_ref.shape, -jnp.inf, reduce_dtype)
    sums_ref[...] = jnp.zeros(sums_ref.shape, jnp.float32)

    # lhs [(q,t) rows, d]: merge of leading dims only (layout-preserving for hw % 16 == 0),
    # hoisted out of the s loop.
    a = tgt_ref[...].reshape(tq * hw, d)

    # Loop over memory positions s.  Each iteration: one small MXU matmul whose result
    # is already (t on sublanes, k on lanes); weighted by the per-s column of
    # sigmoid(score_embed); folded into the two running reductions held in scratch refs.
    @pl.loop(0, n_sblk)
    def _(sb):
        wblk = w_ref[sb]                                          # [hw_t, cs]
        for j in range(cs):                                       # short static unroll
            s = sb * cs + j
            b = mem_ref[s]                                        # [d, tk]
            sim = jnp.dot(a, b, preferred_element_type=jnp.float32)   # [tq*hw, tk], f32 acc
            sim = sim.reshape(tq, hw, tk).astype(reduce_dtype)        # leading-dim split only
            wcol = wblk[:, j:j + 1].astype(reduce_dtype)              # [hw_t, 1] static slice
            wgt = sim * wcol[None, :, :]                              # lane broadcast over k
            # TODO(synk): if a bundle dump shows vld saturating before VALU, fuse the
            # w-multiply into each reduction consumer instead of materializing wgt.
            maxs_ref[...] = jnp.maximum(maxs_ref[...], wgt)           # running max over s
            sums_ref[...] += wgt.max(axis=1).astype(jnp.float32)      # + max over t, f32 acc

    # finalize this layer: sum_t max_s + sum_s max_t, accumulated into the resident tile
    out_ref[...] += sums_ref[...] + maxs_ref[...].astype(jnp.float32).sum(axis=1)


def _pick_s_block(hw, max_cs=16):
    """Largest divisor of hw <= max_cs.

    Bounds the static inner unroll of the s loop while keeping the lane padding of the
    blocked sigmoid(score_embed) operand modest.
    """
    best = 1
    for c in range(1, min(hw, max_cs) + 1):
        if hw % c == 0:
            best = c
    return best


def _tpu_generation_and_vmem():
    """Returns (tpu_generation or None, per-core VMEM bytes), with safe fallbacks."""
    gen = None
    try:
        kind = jax.devices()[0].device_kind.lower()
        m = re.search(r"v(\d+)", kind)
        if m:
            gen = int(m.group(1))
    except Exception:
        pass
    vmem_cap = None
    try:
        vmem_cap = int(pltpu.get_tpu_info().vmem_capacity_bytes)
    except Exception:
        pass
    if vmem_cap is None or vmem_cap <= 0:
        # v5e/v6e: 128 MiB per TensorCore; v7x (and unknown): assume the smaller 64 MiB.
        vmem_cap = 128 * 1024 * 1024 if gen in (5, 6) else 64 * 1024 * 1024
    return gen, vmem_cap


def transformer_decoder_forward(tgt, memory, score_embed, norm_params=None,
                                tile_q=None, tile_k=None, s_block=None,
                                reduce_dtype=None, vmem_limit_bytes=None):
    """Pallas implementation of TransformerDecoder.forward.

    tgt         : [Q, H, W, D], D = n_layers * d
    memory      : [K, H, W, D]
    score_embed : [n_layers, H*W, H*W]   per-layer decoder parameter (indexed [s, t])
    norm_params : optional (gamma, beta, running_mean, running_var, eps) of the
                  BatchNorm1d(1) `norm`, applied (eval mode) iff n_layers > 1.
    returns     : score [Q, K] float32
    """
    n_layers, hw, hw2 = score_embed.shape
    assert hw == hw2
    Q, H, W, D = tgt.shape
    K = memory.shape[0]
    assert H * W == hw and D % n_layers == 0
    d = D // n_layers

    gen, vmem_cap = _tpu_generation_and_vmem()
    big_vmem = vmem_cap >= 96 * 1024 * 1024

    if reduce_dtype is None:
        # bf16 VALU exists on v6e/v7x (not v5e): run the weighted-max stage in bf16 there.
        reduce_dtype = jnp.bfloat16 if (gen is not None and gen >= 6) else jnp.float32
    if vmem_limit_bytes is None:
        # ~3/4 of physical per-core VMEM, never the whole part:
        # v7x -> 48 MiB of 64; v5e/v6e -> 96 MiB of 128.
        vmem_limit_bytes = max(32 << 20, min((vmem_cap * 3) // 4, vmem_cap - (8 << 20)))
        if gen is not None and gen >= 7:
            vmem_limit_bytes = min(vmem_limit_bytes, 48 << 20)
    if tile_q is None:
        tile_q = min(Q, 64 if big_vmem else 32)
    if tile_k is None:
        # 128-lane-dense output tiles; realistic gallery sizes (K >= 256) then give
        # >= 2 parallel (i, j) tiles so both v7x TensorCores get work.
        tile_k = min(K, 128)
    tq, tk = tile_q, tile_k

    cs = _pick_s_block(hw) if s_block is None else s_block
    assert hw % cs == 0, "s_block must divide H*W"

    # per-layer split + re-layout, with the bf16 downcast fused into the relayout:
    #   tgt_l : [n, Q,  hw, d]   (t on sublanes, d on lanes)
    #   mem_l : [n, hw, d,  K]   (d on sublanes, k on lanes -> no rhs transpose, no lane pad)
    # TODO(synk): tgt_l could be read straight from [Q,H,W,D] via the BlockSpec index_map
    # (block (tq,H,W,d) at (i,0,0,l)); memory needs the k-minor transpose, so keep its pre-pass.
    tgt_l = tgt.reshape(Q, hw, n_layers, d).transpose(2, 0, 1, 3).astype(jnp.bfloat16)
    mem_l = memory.reshape(K, hw, n_layers, d).transpose(2, 1, 3, 0).astype(jnp.bfloat16)
    # sigmoid hoisted out of the kernel; blocked as [n, hw/cs, hw_t, cs] so the per-s column
    # over t is a dynamic index on a major dim plus a static lane slice (t already on sublanes).
    w_blk = (jax.nn.sigmoid(score_embed.astype(jnp.float32))
             .reshape(n_layers, hw // cs, cs, hw)
             .transpose(0, 1, 3, 2))

    grid = (pl.cdiv(Q, tq), pl.cdiv(K, tk), n_layers)
    kernel = functools.partial(_decoder_score_kernel, cs=cs, reduce_dtype=reduce_dtype)

    score = pl.pallas_call(
        kernel,
        out_shape=jax.ShapeDtypeStruct((Q, K), jnp.float32),
        grid_spec=pltpu.PrefetchScalarGridSpec(
            num_scalar_prefetch=0,
            grid=grid,
            in_specs=[
                pl.BlockSpec((None, tq, hw, d), lambda i, j, l: (l, i, 0, 0)),
                pl.BlockSpec((None, hw, d, tk), lambda i, j, l: (l, 0, 0, j)),
                pl.BlockSpec((None, hw // cs, hw, cs), lambda i, j, l: (l, 0, 0, 0)),
            ],
            out_specs=pl.BlockSpec((tq, tk), lambda i, j, l: (i, j)),
            scratch_shapes=[
                pltpu.VMEM((tq, hw, tk), reduce_dtype),   # running max over s
                pltpu.VMEM((tq, tk), jnp.float32),        # running sum over s of max_t
            ],
        ),
        compiler_params=pltpu.CompilerParams(
            dimension_semantics=("parallel", "parallel", "arbitrary"),
            vmem_limit_bytes=int(vmem_limit_bytes)),
    )(tgt_l, mem_l, w_blk)

    # self.norm (BatchNorm1d(1)) on score.view(-1, 1), eval mode, then view(Q, K).
    # Cheap O(Q*K) elementwise glue, kept outside the kernel.
    if norm_params is not None and n_layers > 1:
        gamma, beta, mean, var, eps = norm_params
        score = (score - mean) * lax.rsqrt(var + eps) * gamma + beta
    return score


def _reference(tgt, memory, score_embed, norm_params):
    """Pure-JAX f32 reference mirroring the PyTorch semantics."""
    n_layers, hw, _ = score_embed.shape
    Q, K = tgt.shape[0], memory.shape[0]
    d = tgt.shape[-1] // n_layers
    t = tgt.reshape(Q, hw, n_layers, d)
    m = memory.reshape(K, hw, n_layers, d)
    score = jnp.zeros((Q, K), jnp.float32)
    for l in range(n_layers):
        sim = jnp.einsum('qtd,ksd->qkst', t[:, :, l], m[:, :, l],
                         preferred_element_type=jnp.float32)
        w = jax.nn.sigmoid(score_embed[l])                      # [s, t]
        weighted = sim * w[None, None]
        score = score + weighted.max(axis=2).sum(axis=-1) \
                      + weighted.max(axis=3).sum(axis=-1)
    if norm_params is not None and n_layers > 1:
        gamma, beta, mean, var, eps = norm_params
        score = (score - mean) * lax.rsqrt(var + eps) * gamma + beta
    return score


if __name__ == "__main__":
    key = jax.random.PRNGKey(0)
    Q, K, H, W = 8, 8, 4, 4          # query len, memory len, feature map size
    n_layers, d = 2, 16              # split_layers = [16, 16]
    D = n_layers * d

    k1, k2, k3 = jax.random.split(key, 3)
    tgt = jax.random.normal(k1, (Q, H, W, D), jnp.float32)
    memory = jax.random.normal(k2, (K, H, W, D), jnp.float32)
    score_embed = jax.random.normal(k3, (n_layers, H * W, H * W), jnp.float32)

    # BatchNorm1d(1) eval-mode params (mildly non-trivial to exercise the norm path).
    norm_params = (jnp.float32(1.5), jnp.float32(0.1),
                   jnp.float32(0.2), jnp.float32(2.0), 1e-5)

    ref = _reference(tgt, memory, score_embed, norm_params)

    # f32 reduction stage: tight check against the f32 reference (inputs still bf16).
    out32 = transformer_decoder_forward(tgt, memory, score_embed, norm_params,
                                        reduce_dtype=jnp.float32)
    out32 = jax.block_until_ready(out32)
    assert out32.shape == (Q, K)
    assert jnp.allclose(out32, ref, rtol=1e-2, atol=1e-2), (out32, ref)

    # default path: generation-gated (bf16 weighted-max stage on v6e/v7x), looser tolerance.
    out = transformer_decoder_forward(tgt, memory, score_embed, norm_params)
    out = jax.block_until_ready(out)
    assert jnp.allclose(out, ref, rtol=5e-2, atol=5e-1), (out, ref)

    # exercise explicit tiling / s_block path.
    out_t = transformer_decoder_forward(tgt, memory, score_embed, norm_params,
                                        tile_q=8, tile_k=8, s_block=8,
                                        reduce_dtype=jnp.float32)
    out_t = jax.block_until_ready(out_t)
    assert jnp.allclose(out_t, ref, rtol=1e-2, atol=1e-2), (out_t, ref)

    print("KERNEL_OK")
</pallas_src>

<mosaic_0001>
module attributes {stable_mosaic.version = 11 : i64} {
  func.func @_decoder_score_kernel(%arg0: i32, %arg1: i32, %arg2: i32, %arg3: memref<1x8x16x16xbf16, #tpu.memory_space<vmem>>, %arg4: memref<1x16x16x8xbf16, #tpu.memory_space<vmem>>, %arg5: memref<1x1x16x16xf32, #tpu.memory_space<vmem>>, %arg6: memref<8x8xf32, #tpu.memory_space<vmem>>, %arg7: memref<8x16x8xf32, #tpu.memory_space<vmem>>, %arg8: memref<8x8xf32, #tpu.memory_space<vmem>>) attributes {dimension_semantics = [#tpu.dimension_semantics<parallel>, #tpu.dimension_semantics<parallel>, #tpu.dimension_semantics<arbitrary>], iteration_bounds = array<i64: 1, 1, 2>, scalar_prefetch = 0 : i64, scratch_operands = 2 : i64, tpu.core_type = #tpu.core_type<tc>, window_params = [{transform_indices = @transform_0, window_bounds = array<i64: 1, 8, 16, 16>}, {transform_indices = @transform_1, window_bounds = array<i64: 1, 16, 16, 8>}, {transform_indices = @transform_2, window_bounds = array<i64: 1, 1, 16, 16>}, {transform_indices = @transform_3, window_bounds = array<i64: 8, 8>}]} {
    %c0_i32 = arith.constant 0 : i32
    %0 = arith.cmpi eq, %arg2, %c0_i32 : i32
    %1 = arith.extui %0 : i1 to i32
    %c0_i32_0 = arith.constant 0 : i32
    %2 = arith.cmpi ne, %1, %c0_i32_0 : i32
    scf.if %2 {
      %cst_283 = arith.constant 0.000000e+00 : f32
      %310 = vector.broadcast %cst_283 : f32 to vector<8x8xf32>
      %c0_284 = arith.constant 0 : index
      %c0_285 = arith.constant 0 : index
      %311 = vector.load %arg6[%c0_284, %c0_285] : memref<8x8xf32, #tpu.memory_space<vmem>>, vector<8x8xf32>
      tpu.vector_store %arg6[%c0_284, %c0_285], %310 {strides = array<i32>} : memref<8x8xf32, #tpu.memory_space<vmem>>, vector<8x8xf32>,
    } else {
    }
    %cst = arith.constant 0xFF800000 : f32
    %3 = vector.broadcast %cst : f32 to vector<8x16x8xf32>
    %c0 = arith.constant 0 : index
    %c0_1 = arith.constant 0 : index
    %c0_2 = arith.constant 0 : index
    %4 = vector.load %arg7[%c0, %c0_1, %c0_2] : memref<8x16x8xf32, #tpu.memory_space<vmem>>, vector<8x16x8xf32>
    tpu.vector_store %arg7[%c0, %c0_1, %c0_2], %3 {strides = array<i32>} : memref<8x16x8xf32, #tpu.memory_space<vmem>>, vector<8x16x8xf32>,
    %cst_3 = arith.constant 0.000000e+00 : f32
    %5 = vector.broadcast %cst_3 : f32 to vector<8x8xf32>
    %c0_4 = arith.constant 0 : index
    %c0_5 = arith.constant 0 : index
    %6 = vector.load %arg8[%c0_4, %c0_5] : memref<8x8xf32, #tpu.memory_space<vmem>>, vector<8x8xf32>
    tpu.vector_store %arg8[%c0_4, %c0_5], %5 {strides = array<i32>} : memref<8x8xf32, #tpu.memory_space<vmem>>, vector<8x8xf32>,
    %c0_6 = arith.constant 0 : index
    %c0_7 = arith.constant 0 : index
    %c0_8 = arith.constant 0 : index
    %c0_9 = arith.constant 0 : index
    %7 = vector.load %arg3[%c0_6, %c0_7, %c0_8, %c0_9] : memref<1x8x16x16xbf16, #tpu.memory_space<vmem>>, vector<1x8x16x16xbf16>
    %8 = vector.shape_cast %7 : vector<1x8x16x16xbf16> to vector<8x16x16xbf16>
    %9 = vector.shape_cast %8 : vector<8x16x16xbf16> to vector<128x16xbf16>
    %c0_i32_10 = arith.constant 0 : i32
    %c1_i32 = arith.constant 1 : i32
    %10 = arith.muli %c0_i32_10, %c1_i32 : i32
    %c0_i32_11 = arith.constant 0 : i32
    %11 = arith.addi %c0_i32_11, %10 : i32
    %c0_12 = arith.constant 0 : index
    %12 = arith.index_cast %11 : i32 to index
    %c0_13 = arith.constant 0 : index
    %c0_14 = arith.constant 0 : index
    %13 = vector.load %arg5[%c0_12, %12, %c0_13, %c0_14] : memref<1x1x16x16xf32, #tpu.memory_space<vmem>>, vector<1x1x16x16xf32>
    %14 = vector.shape_cast %13 : vector<1x1x16x16xf32> to vector<16x16xf32>
    %c16_i32 = arith.constant 16 : i32
    %15 = arith.muli %11, %c16_i32 : i32
    %c0_i32_15 = arith.constant 0 : i32
    %16 = arith.addi %15, %c0_i32_15 : i32
    %c0_16 = arith.constant 0 : index
    %17 = arith.index_cast %16 : i32 to index
    %c0_17 = arith.constant 0 : index
    %c0_18 = arith.constant 0 : index
    %18 = vector.load %arg4[%c0_16, %17, %c0_17, %c0_18] : memref<1x16x16x8xbf16, #tpu.memory_space<vmem>>, vector<1x1x16x8xbf16>
    %19 = vector.shape_cast %18 : vector<1x1x16x8xbf16> to vector<16x8xbf16>
    %cst_19 = arith.constant dense<0.000000e+00> : vector<128x8xf32>
    %20 = tpu.matmul %9, %19, %cst_19 {dimension_numbers = #tpu.dot_dimension_numbers<[1], [0], [0], [1], [0, 0, 1, 1], [], []>} : vector<128x16xbf16>, vector<16x8xbf16>, vector<128x8xf32> -> vector<128x8xf32>
    %21 = vector.shape_cast %20 : vector<128x8xf32> to vector<8x16x8xf32>
    %22 = vector.extract_strided_slice %14 {offsets = [0, 0], sizes = [16, 1], strides = [1, 1]} : vector<16x16xf32> to vector<16x1xf32>
    %23 = vector.shape_cast %22 : vector<16x1xf32> to vector<1x16x1xf32>
    %24 = vector.broadcast %23 : vector<1x16x1xf32> to vector<8x16x8xf32>
    %25 = arith.mulf %21, %24 : vector<8x16x8xf32>
    %c0_20 = arith.constant 0 : index
    %c0_21 = arith.constant 0 : index
    %c0_22 = arith.constant 0 : index
    %26 = vector.load %arg7[%c0_20, %c0_21, %c0_22] : memref<8x16x8xf32, #tpu.memory_space<vmem>>, vector<8x16x8xf32>
    %27 = arith.maximumf %26, %25 : vector<8x16x8xf32>
    %c0_23 = arith.constant 0 : index
    %c0_24 = arith.constant 0 : index
    %c0_25 = arith.constant 0 : index
    %28 = vector.load %arg7[%c0_23, %c0_24, %c0_25] : memref<8x16x8xf32, #tpu.memory_space<vmem>>, vector<8x16x8xf32>
    tpu.vector_store %arg7[%c0_23, %c0_24, %c0_25], %27 {strides = array<i32>} : memref<8x16x8xf32, #tpu.memory_space<vmem>>, vector<8x16x8xf32>,
    %c0_26 = arith.constant 0 : index
    %c0_27 = arith.constant 0 : index
    %29 = vector.load %arg8[%c0_26, %c0_27] : memref<8x8xf32, #tpu.memory_space<vmem>>, vector<8x8xf32>
    %cst_28 = arith.constant dense<0xFF800000> : vector<8x8xf32>
    %30 = vector.multi_reduction <maximumf>, %25, %cst_28 [1] : vector<8x16x8xf32> to vector<8x8xf32>
    %31 = arith.addf %29, %30 : vector<8x8xf32>
    %c0_29 = arith.constant 0 : index
    %c0_30 = arith.constant 0 : index
    %32 = vector.load %arg8[%c0_29, %c0_30] : memref<8x8xf32, #tpu.memory_space<vmem>>, vector<8x8xf32>
    tpu.vector_store %arg8[%c0_29, %c0_30], %31 {strides = array<i32>} : memref<8x8xf32, #tpu.memory_space<vmem>>, vector<8x8xf32>,
    %c16_i32_31 = arith.constant 16 : i32
    %33 = arith.muli %11, %c16_i32_31 : i32
    %c1_i32_32 = arith.constant 1 : i32
    %34 = arith.addi %33, %c1_i32_32 : i32
    %c0_33 = arith.constant 0 : index
    %35 = arith.index_cast %34 : i32 to index
    %c0_34 = arith.constant 0 : index
    %c0_35 = arith.constant 0 : index
    %36 = vector.load %arg4[%c0_33, %35, %c0_34, %c0_35] : memref<1x16x16x8xbf16, #tpu.memory_space<vmem>>, vector<1x1x16x8xbf16>
    %37 = vector.shape_cast %36 : vector<1x1x16x8xbf16> to vector<16x8xbf16>
    %cst_36 = arith.constant dense<0.000000e+00> : vector<128x8xf32>
    %38 = tpu.matmul %9, %37, %cst_36 {dimension_numbers = #tpu.dot_dimension_numbers<[1], [0], [0], [1], [0, 0, 1, 1], [], []>} : vector<128x16xbf16>, vector<16x8xbf16>, vector<128x8xf32> -> vector<128x8xf32>
    %39 = vector.shape_cast %38 : vector<128x8xf32> to vector<8x16x8xf32>
    %40 = vector.extract_strided_slice %14 {offsets = [0, 1], sizes = [16, 1], strides = [1, 1]} : vector<16x16xf32> to vector<16x1xf32>
    %41 = vector.shape_cast %40 : vector<16x1xf32> to vector<1x16x1xf32>
    %42 = vector.broadcast %41 : vector<1x16x1xf32> to vector<8x16x8xf32>
    %43 = arith.mulf %39, %42 : vector<8x16x8xf32>
    %c0_37 = arith.constant 0 : index
    %c0_38 = arith.constant 0 : index
    %c0_39 = arith.constant 0 : index
    %44 = vector.load %arg7[%c0_37, %c0_38, %c0_39] : memref<8x16x8xf32, #tpu.memory_space<vmem>>, vector<8x16x8xf32>
    %45 = arith.maximumf %44, %43 : vector<8x16x8xf32>
    %c0_40 = arith.constant 0 : index
    %c0_41 = arith.constant 0 : index
    %c0_42 = arith.constant 0 : index
    %46 = vector.load %arg7[%c0_40, %c0_41, %c0_42] : memref<8x16x8xf32, #tpu.memory_space<vmem>>, vector<8x16x8xf32>
    tpu.vector_store %arg7[%c0_40, %c0_41, %c0_42], %45 {strides = array<i32>} : memref<8x16x8xf32, #tpu.memory_space<vmem>>, vector<8x16x8xf32>,
    %c0_43 = arith.constant 0 : index
    %c0_44 = arith.constant 0 : index
    %47 = vector.load %arg8[%c0_43, %c0_44] : memref<8x8xf32, #tpu.memory_space<vmem>>, vector<8x8xf32>
    %cst_45 = arith.constant dense<0xFF800000> : vector<8x8xf32>
    %48 = vector.multi_reduction <maximumf>, %43, %cst_45 [1] : vector<8x16x8xf32> to vector<8x8xf32>
    %49 = arith.addf %47, %48 : vector<8x8xf32>
    %c0_46 = arith.constant 0 : index
    %c0_47 = arith.constant 0 : index
    %50 = vector.load %arg8[%c0_46, %c0_47] : memref<8x8xf32, #tpu.memory_space<vmem>>, vector<8x8xf32>
    tpu.vector_store %arg8[%c0_46, %c0_47], %49 {strides = array<i32>} : memref<8x8xf32, #tpu.memory_space<vmem>>, vector<8x8xf32>,
    %c16_i32_48 = arith.constant 16 : i32
    %51 = arith.muli %11, %c16_i32_48 : i32
    %c2_i32 = arith.constant 2 : i32
    %52 = arith.addi %51, %c2_i32 : i32
    %c0_49 = arith.constant 0 : index
    %53 = arith.index_cast %52 : i32 to index
    %c0_50 = arith.constant 0 : index
    %c0_51 = arith.constant 0 : index
    %54 = vector.load %arg4[%c0_49, %53, %c0_50, %c0_51] : memref<1x16x16x8xbf16, #tpu.memory_space<vmem>>, vector<1x1x16x8xbf16>
    %55 = vector.shape_cast %54 : vector<1x1x16x8xbf16> to vector<16x8xbf16>
    %cst_52 = arith.constant dense<0.000000e+00> : vector<128x8xf32>
    %56 = tpu.matmul %9, %55, %cst_52 {dimension_numbers = #tpu.dot_dimension_numbers<[1], [0], [0], [1], [0, 0, 1, 1], [], []>} : vector<128x16xbf16>, vector<16x8xbf16>, vector<128x8xf32> -> vector<128x8xf32>
    %57 = vector.shape_cast %56 : vector<128x8xf32> to vector<8x16x8xf32>
    %58 = vector.extract_strided_slice %14 {offsets = [0, 2], sizes = [16, 1], strides = [1, 1]} : vector<16x16xf32> to vector<16x1xf32>
    %59 = vector.shape_cast %58 : vector<16x1xf32> to vector<1x16x1xf32>
    %60 = vector.broadcast %59 : vector<1x16x1xf32> to vector<8x16x8xf32>
    %61 = arith.mulf %57, %60 : vector<8x16x8xf32>
    %c0_53 = arith.constant 0 : index
    %c0_54 = arith.constant 0 : index
    %c0_55 = arith.constant 0 : index
    %62 = vector.load %arg7[%c0_53, %c0_54, %c0_55] : memref<8x16x8xf32, #tpu.memory_space<vmem>>, vector<8x16x8xf32>
    %63 = arith.maximumf %62, %61 : vector<8x16x8xf32>
    %c0_56 = arith.constant 0 : index
    %c0_57 = arith.constant 0 : index
    %c0_58 = arith.constant 0 : index
    %64 = vector.load %arg7[%c0_56, %c0_57, %c0_58] : memref<8x16x8xf32, #tpu.memory_space<vmem>>, vector<8x16x8xf32>
    tpu.vector_store %arg7[%c0_56, %c0_57, %c0_58], %63 {strides = array<i32>} : memref<8x16x8xf32, #tpu.memory_space<vmem>>, vector<8x16x8xf32>,
    %c0_59 = arith.constant 0 : index
    %c0_60 = arith.constant 0 : index
    %65 = vector.load %arg8[%c0_59, %c0_60] : memref<8x8xf32, #tpu.memory_space<vmem>>, vector<8x8xf32>
    %cst_61 = arith.constant dense<0xFF800000> : vector<8x8xf32>
    %66 = vector.multi_reduction <maximumf>, %61, %cst_61 [1] : vector<8x16x8xf32> to vector<8x8xf32>
    %67 = arith.addf %65, %66 : vector<8x8xf32>
    %c0_62 = arith.constant 0 : index
    %c0_63 = arith.constant 0 : index
    %68 = vector.load %arg8[%c0_62, %c0_63] : memref<8x8xf32, #tpu.memory_space<vmem>>, vector<8x8xf32>
    tpu.vector_store %arg8[%c0_62, %c0_63], %67 {strides = array<i32>} : memref<8x8xf32, #tpu.memory_space<vmem>>, vector<8x8xf32>,
    %c16_i32_64 = arith.constant 16 : i32
    %69 = arith.muli %11, %c16_i32_64 : i32
    %c3_i32 = arith.constant 3 : i32
    %70 = arith.addi %69, %c3_i32 : i32
    %c0_65 = arith.constant 0 : index
    %71 = arith.index_cast %70 : i32 to index
    %c0_66 = arith.constant 0 : index
    %c0_67 = arith.constant 0 : index
    %72 = vector.load %arg4[%c0_65, %71, %c0_66, %c0_67] : memref<1x16x16x8xbf16, #tpu.memory_space<vmem>>, vector<1x1x16x8xbf16>
    %73 = vector.shape_cast %72 : vector<1x1x16x8xbf16> to vector<16x8xbf16>
    %cst_68 = arith.constant dense<0.000000e+00> : vector<128x8xf32>
    %74 = tpu.matmul %9, %73, %cst_68 {dimension_numbers = #tpu.dot_dimension_numbers<[1], [0], [0], [1], [0, 0, 1, 1], [], []>} : vector<128x16xbf16>, vector<16x8xbf16>, vector<128x8xf32> -> vector<128x8xf32>
    %75 = vector.shape_cast %74 : vector<128x8xf32> to vector<8x16x8xf32>
    %76 = vector.extract_strided_slice %14 {offsets = [0, 3], sizes = [16, 1], strides = [1, 1]} : vector<16x16xf32> to vector<16x1xf32>
    %77 = vector.shape_cast %76 : vector<16x1xf32> to vector<1x16x1xf32>
    %78 = vector.broadcast %77 : vector<1x16x1xf32> to vector<8x16x8xf32>
    %79 = arith.mulf %75, %78 : vector<8x16x8xf32>
    %c0_69 = arith.constant 0 : index
    %c0_70 = arith.constant 0 : index
    %c0_71 = arith.constant 0 : index
    %80 = vector.load %arg7[%c0_69, %c0_70, %c0_71] : memref<8x16x8xf32, #tpu.memory_space<vmem>>, vector<8x16x8xf32>
    %81 = arith.maximumf %80, %79 : vector<8x16x8xf32>
    %c0_72 = arith.constant 0 : index
    %c0_73 = arith.constant 0 : index
    %c0_74 = arith.constant 0 : index
    %82 = vector.load %arg7[%c0_72, %c0_73, %c0_74] : memref<8x16x8xf32, #tpu.memory_space<vmem>>, vector<8x16x8xf32>
    tpu.vector_store %arg7[%c0_72, %c0_73, %c0_74], %81 {strides = array<i32>} : memref<8x16x8xf32, #tpu.memory_space<vmem>>, vector<8x16x8xf32>,
    %c0_75 = arith.constant 0 : index
    %c0_76 = arith.constant 0 : index
    %83 = vector.load %arg8[%c0_75, %c0_76] : memref<8x8xf32, #tpu.memory_space<vmem>>, vector<8x8xf32>
    %cst_77 = arith.constant dense<0xFF800000> : vector<8x8xf32>
    %84 = vector.multi_reduction <maximumf>, %79, %cst_77 [1] : vector<8x16x8xf32> to vector<8x8xf32>
    %85 = arith.addf %83, %84 : vector<8x8xf32>
    %c0_78 = arith.constant 0 : index
    %c0_79 = arith.constant 0 : index
    %86 = vector.load %arg8[%c0_78, %c0_79] : memref<8x8xf32, #tpu.memory_space<vmem>>, vector<8x8xf32>
    tpu.vector_store %arg8[%c0_78, %c0_79], %85 {strides = array<i32>} : memref<8x8xf32, #tpu.memory_space<vmem>>, vector<8x8xf32>,
    %c16_i32_80 = arith.constant 16 : i32
    %87 = arith.muli %11, %c16_i32_80 : i32
    %c4_i32 = arith.constant 4 : i32
    %88 = arith.addi %87, %c4_i32 : i32
    %c0_81 = arith.constant 0 : index
    %89 = arith.index_cast %88 : i32 to index
    %c0_82 = arith.constant 0 : index
    %c0_83 = arith.constant 0 : index
    %90 = vector.load %arg4[%c0_81, %89, %c0_82, %c0_83] : memref<1x16x16x8xbf16, #tpu.memory_space<vmem>>, vector<1x1x16x8xbf16>
    %91 = vector.shape_cast %90 : vector<1x1x16x8xbf16> to vector<16x8xbf16>
    %cst_84 = arith.constant dense<0.000000e+00> : vector<128x8xf32>
    %92 = tpu.matmul %9, %91, %cst_84 {dimension_numbers = #tpu.dot_dimension_numbers<[1], [0], [0], [1], [0, 0, 1, 1], [], []>} : vector<128x16xbf16>, vector<16x8xbf16>, vector<128x8xf32> -> vector<128x8xf32>
    %93 = vector.shape_cast %92 : vector<128x8xf32> to vector<8x16x8xf32>
    %94 = vector.extract_strided_slice %14 {offsets = [0, 4], sizes = [16, 1], strides = [1, 1]} : vector<16x16xf32> to vector<16x1xf32>
    %95 = vector.shape_cast %94 : vector<16x1xf32> to vector<1x16x1xf32>
    %96 = vector.broadcast %95 : vector<1x16x1xf32> to vector<8x16x8xf32>
    %97 = arith.mulf %93, %96 : vector<8x16x8xf32>
    %c0_85 = arith.constant 0 : index
    %c0_86 = arith.constant 0 : index
    %c0_87 = arith.constant 0 : index
    %98 = vector.load %arg7[%c0_85, %c0_86, %c0_87] : memref<8x16x8xf32, #tpu.memory_space<vmem>>, vector<8x16x8xf32>
    %99 = arith.maximumf %98, %97 : vector<8x16x8xf32>
    %c0_88 = arith.constant 0 : index
    %c0_89 = arith.constant 0 : index
    %c0_90 = arith.constant 0 : index
    %100 = vector.load %arg7[%c0_88, %c0_89, %c0_90] : memref<8x16x8xf32, #tpu.memory_space<vmem>>, vector<8x16x8xf32>
    tpu.vector_store %arg7[%c0_88, %c0_89, %c0_90], %99 {strides = array<i32>} : memref<8x16x8xf32, #tpu.memory_space<vmem>>, vector<8x16x8xf32>,
    %c0_91 = arith.constant 0 : index
    %c0_92 = arith.constant 0 : index
    %101 = vector.load %arg8[%c0_91, %c0_92] : memref<8x8xf32, #tpu.memory_space<vmem>>, vector<8x8xf32>
    %cst_93 = arith.constant dense<0xFF800000> : vector<8x8xf32>
    %102 = vector.multi_reduction <maximumf>, %97, %cst_93 [1] : vector<8x16x8xf32> to vector<8x8xf32>
    %103 = arith.addf %101, %102 : vector<8x8xf32>
    %c0_94 = arith.constant 0 : index
    %c0_95 = arith.constant 0 : index
    %104 = vector.load %arg8[%c0_94, %c0_95] : memref<8x8xf32, #tpu.memory_space<vmem>>, vector<8x8xf32>
    tpu.vector_store %arg8[%c0_94, %c0_95], %103 {strides = array<i32>} : memref<8x8xf32, #tpu.memory_space<vmem>>, vector<8x8xf32>,
    %c16_i32_96 = arith.constant 16 : i32
    %105 = arith.muli %11, %c16_i32_96 : i32
    %c5_i32 = arith.constant 5 : i32
    %106 = arith.addi %105, %c5_i32 : i32
    %c0_97 = arith.constant 0 : index
    %107 = arith.index_cast %106 : i32 to index
    %c0_98 = arith.constant 0 : index
    %c0_99 = arith.constant 0 : index
    %108 = vector.load %arg4[%c0_97, %107, %c0_98, %c0_99] : memref<1x16x16x8xbf16, #tpu.memory_space<vmem>>, vector<1x1x16x8xbf16>
    %109 = vector.shape_cast %108 : vector<1x1x16x8xbf16> to vector<16x8xbf16>
    %cst_100 = arith.constant dense<0.000000e+00> : vector<128x8xf32>
    %110 = tpu.matmul %9, %109, %cst_100 {dimension_numbers = #tpu.dot_dimension_numbers<[1], [0], [0], [1], [0, 0, 1, 1], [], []>} : vector<128x16xbf16>, vector<16x8xbf16>, vector<128x8xf32> -> vector<128x8xf32>
    %111 = vector.shape_cast %110 : vector<128x8xf32> to vector<8x16x8xf32>
    %112 = vector.extract_strided_slice %14 {offsets = [0, 5], sizes = [16, 1], strides = [1, 1]} : vector<16x16xf32> to vector<16x1xf32>
    %113 = vector.shape_cast %112 : vector<16x1xf32> to vector<1x16x1xf32>
    %114 = vector.broadcast %113 : vector<1x16x1xf32> to vector<8x16x8xf32>
    %115 = arith.mulf %111, %114 : vector<8x16x8xf32>
    %c0_101 = arith.constant 0 : index
    %c0_102 = arith.constant 0 : index
    %c0_103 = arith.constant 0 : index
    %116 = vector.load %arg7[%c0_101, %c0_102, %c0_103] : memref<8x16x8xf32, #tpu.memory_space<vmem>>, vector<8x16x8xf32>
    %117 = arith.maximumf %116, %115 : vector<8x16x8xf32>
    %c0_104 = arith.constant 0 : index
    %c0_105 = arith.constant 0 : index
    %c0_106 = arith.constant 0 : index
    %118 = vector.load %arg7[%c0_104, %c0_105, %c0_106] : memref<8x16x8xf32, #tpu.memory_space<vmem>>, vector<8x16x8xf32>
    tpu.vector_store %arg7[%c0_104, %c0_105, %c0_106], %117 {strides = array<i32>} : memref<8x16x8xf32, #tpu.memory_space<vmem>>, vector<8x16x8xf32>,
    %c0_107 = arith.constant 0 : index
    %c0_108 = arith.constant 0 : index
    %119 = vector.load %arg8[%c0_107, %c0_108] : memref<8x8xf32, #tpu.memory_space<vmem>>, vector<8x8xf32>
    %cst_109 = arith.constant dense<0xFF800000> : vector<8x8xf32>
    %120 = vector.multi_reduction <maximumf>, %115, %cst_109 [1] : vector<8x16x8xf32> to vector<8x8xf32>
    %121 = arith.addf %119, %120 : vector<8x8xf32>
    %c0_110 = arith.constant 0 : index
    %c0_111 = arith.constant 0 : index
    %122 = vector.load %arg8[%c0_110, %c0_111] : memref<8x8xf32, #tpu.memory_space<vmem>>, vector<8x8xf32>
    tpu.vector_store %arg8[%c0_110, %c0_111], %121 {strides = array<i32>} : memref<8x8xf32, #tpu.memory_space<vmem>>, vector<8x8xf32>,
    %c16_i32_112 = arith.constant 16 : i32
    %123 = arith.muli %11, %c16_i32_112 : i32
    %c6_i32 = arith.constant 6 : i32
    %124 = arith.addi %123, %c6_i32 : i32
    %c0_113 = arith.constant 0 : index
    %125 = arith.index_cast %124 : i32 to index
    %c0_114 = arith.constant 0 : index
    %c0_115 = arith.constant 0 : index
    %126 = vector.load %arg4[%c0_113, %125, %c0_114, %c0_115] : memref<1x16x16x8xbf16, #tpu.memory_space<vmem>>, vector<1x1x16x8xbf16>
    %127 = vector.shape_cast %126 : vector<1x1x16x8xbf16> to vector<16x8xbf16>
    %cst_116 = arith.constant dense<0.000000e+00> : vector<128x8xf32>
    %128 = tpu.matmul %9, %127, %cst_116 {dimension_numbers = #tpu.dot_dimension_numbers<[1], [0], [0], [1], [0, 0, 1, 1], [], []>} : vector<128x16xbf16>, vector<16x8xbf16>, vector<128x8xf32> -> vector<128x8xf32>
    %129 = vector.shape_cast %128 : vector<128x8xf32> to vector<8x16x8xf32>
    %130 = vector.extract_strided_slice %14 {offsets = [0, 6], sizes = [16, 1], strides = [1, 1]} : vector<16x16xf32> to vector<16x1xf32>
    %131 = vector.shape_cast %130 : vector<16x1xf32> to vector<1x16x1xf32>
    %132 = vector.broadcast %131 : vector<1x16x1xf32> to vector<8x16x8xf32>
    %133 = arith.mulf %129, %132 : vector<8x16x8xf32>
    %c0_117 = arith.constant 0 : index
    %c0_118 = arith.constant 0 : index
    %c0_119 = arith.constant 0 : index
    %134 = vector.load %arg7[%c0_117, %c0_118, %c0_119] : memref<8x16x8xf32, #tpu.memory_space<vmem>>, vector<8x16x8xf32>
    %135 = arith.maximumf %134, %133 : vector<8x16x8xf32>
    %c0_120 = arith.constant 0 : index
    %c0_121 = arith.constant 0 : index
    %c0_122 = arith.constant 0 : index
    %136 = vector.load %arg7[%c0_120, %c0_121, %c0_122] : memref<8x16x8xf32, #tpu.memory_space<vmem>>, vector<8x16x8xf32>
    tpu.vector_store %arg7[%c0_120, %c0_121, %c0_122], %135 {strides = array<i32>} : memref<8x16x8xf32, #tpu.memory_space<vmem>>, vector<8x16x8xf32>,
    %c0_123 = arith.constant 0 : index
    %c0_124 = arith.constant 0 : index
    %137 = vector.load %arg8[%c0_123, %c0_124] : memref<8x8xf32, #tpu.memory_space<vmem>>, vector<8x8xf32>
    %cst_125 = arith.constant dense<0xFF800000> : vector<8x8xf32>
    %138 = vector.multi_reduction <maximumf>, %133, %cst_125 [1] : vector<8x16x8xf32> to vector<8x8xf32>
    %139 = arith.addf %137, %138 : vector<8x8xf32>
    %c0_126 = arith.constant 0 : index
    %c0_127 = arith.constant 0 : index
    %140 = vector.load %arg8[%c0_126, %c0_127] : memref<8x8xf32, #tpu.memory_space<vmem>>, vector<8x8xf32>
    tpu.vector_store %arg8[%c0_126, %c0_127], %139 {strides = array<i32>} : memref<8x8xf32, #tpu.memory_space<vmem>>, vector<8x8xf32>,
    %c16_i32_128 = arith.constant 16 : i32
    %141 = arith.muli %11, %c16_i32_128 : i32
    %c7_i32 = arith.constant 7 : i32
    %142 = arith.addi %141, %c7_i32 : i32
    %c0_129 = arith.constant 0 : index
    %143 = arith.index_cast %142 : i32 to index
    %c0_130 = arith.constant 0 : index
    %c0_131 = arith.constant 0 : index
    %144 = vector.load %arg4[%c0_129, %143, %c0_130, %c0_131] : memref<1x16x16x8xbf16, #tpu.memory_space<vmem>>, vector<1x1x16x8xbf16>
    %145 = vector.shape_cast %144 : vector<1x1x16x8xbf16> to vector<16x8xbf16>
    %cst_132 = arith.constant dense<0.000000e+00> : vector<128x8xf32>
    %146 = tpu.matmul %9, %145, %cst_132 {dimension_numbers = #tpu.dot_dimension_numbers<[1], [0], [0], [1], [0, 0, 1, 1], [], []>} : vector<128x16xbf16>, vector<16x8xbf16>, vector<128x8xf32> -> vector<128x8xf32>
    %147 = vector.shape_cast %146 : vector<128x8xf32> to vector<8x16x8xf32>
    %148 = vector.extract_strided_slice %14 {offsets = [0, 7], sizes = [16, 1], strides = [1, 1]} : vector<16x16xf32> to vector<16x1xf32>
    %149 = vector.shape_cast %148 : vector<16x1xf32> to vector<1x16x1xf32>
    %150 = vector.broadcast %149 : vector<1x16x1xf32> to vector<8x16x8xf32>
    %151 = arith.mulf %147, %150 : vector<8x16x8xf32>
    %c0_133 = arith.constant 0 : index
    %c0_134 = arith.constant 0 : index
    %c0_135 = arith.constant 0 : index
    %152 = vector.load %arg7[%c0_133, %c0_134, %c0_135] : memref<8x16x8xf32, #tpu.memory_space<vmem>>, vector<8x16x8xf32>
    %153 = arith.maximumf %152, %151 : vector<8x16x8xf32>
    %c0_136 = arith.constant 0 : index
    %c0_137 = arith.constant 0 : index
    %c0_138 = arith.constant 0 : index
    %154 = vector.load %arg7[%c0_136, %c0_137, %c0_138] : memref<8x16x8xf32, #tpu.memory_space<vmem>>, vector<8x16x8xf32>
    tpu.vector_store %arg7[%c0_136, %c0_137, %c0_138], %153 {strides = array<i32>} : memref<8x16x8xf32, #tpu.memory_space<vmem>>, vector<8x16x8xf32>,
    %c0_139 = arith.constant 0 : index
    %c0_140 = arith.constant 0 : index
    %155 = vector.load %arg8[%c0_139, %c0_140] : memref<8x8xf32, #tpu.memory_space<vmem>>, vector<8x8xf32>
    %cst_141 = arith.constant dense<0xFF800000> : vector<8x8xf32>
    %156 = vector.multi_reduction <maximumf>, %151, %cst_141 [1] : vector<8x16x8xf32> to vector<8x8xf32>
    %157 = arith.addf %155, %156 : vector<8x8xf32>
    %c0_142 = arith.constant 0 : index
    %c0_143 = arith.constant 0 : index
    %158 = vector.load %arg8[%c0_142, %c0_143] : memref<8x8xf32, #tpu.memory_space<vmem>>, vector<8x8xf32>
    tpu.vector_store %arg8[%c0_142, %c0_143], %157 {strides = array<i32>} : memref<8x8xf32, #tpu.memory_space<vmem>>, vector<8x8xf32>,
    %c16_i32_144 = arith.constant 16 : i32
    %159 = arith.muli %11, %c16_i32_144 : i32
    %c8_i32 = arith.constant 8 : i32
    %160 = arith.addi %159, %c8_i32 : i32
    %c0_145 = arith.constant 0 : index
    %161 = arith.index_cast %160 : i32 to index
    %c0_146 = arith.constant 0 : index
    %c0_147 = arith.constant 0 : index
    %162 = vector.load %arg4[%c0_145, %161, %c0_146, %c0_147] : memref<1x16x16x8xbf16, #tpu.memory_space<vmem>>, vector<1x1x16x8xbf16>
    %163 = vector.shape_cast %162 : vector<1x1x16x8xbf16> to vector<16x8xbf16>
    %cst_148 = arith.constant dense<0.000000e+00> : vector<128x8xf32>
    %164 = tpu.matmul %9, %163, %cst_148 {dimension_numbers = #tpu.dot_dimension_numbers<[1], [0], [0], [1], [0, 0, 1, 1], [], []>} : vector<128x16xbf16>, vector<16x8xbf16>, vector<128x8xf32> -> vector<128x8xf32>
    %165 = vector.shape_cast %164 : vector<128x8xf32> to vector<8x16x8xf32>
    %166 = vector.extract_strided_slice %14 {offsets = [0, 8], sizes = [16, 1], strides = [1, 1]} : vector<16x16xf32> to vector<16x1xf32>
    %167 = vector.shape_cast %166 : vector<16x1xf32> to vector<1x16x1xf32>
    %168 = vector.broadcast %167 : vector<1x16x1xf32> to vector<8x16x8xf32>
    %169 = arith.mulf %165, %168 : vector<8x16x8xf32>
    %c0_149 = arith.constant 0 : index
    %c0_150 = arith.constant 0 : index
    %c0_151 = arith.constant 0 : index
    %170 = vector.load %arg7[%c0_149, %c0_150, %c0_151] : memref<8x16x8xf32, #tpu.memory_space<vmem>>, vector<8x16x8xf32>
    %171 = arith.maximumf %170, %169 : vector<8x16x8xf32>
    %c0_152 = arith.constant 0 : index
    %c0_153 = arith.constant 0 : index
    %c0_154 = arith.constant 0 : index
    %172 = vector.load %arg7[%c0_152, %c0_153, %c0_154] : memref<8x16x8xf32, #tpu.memory_space<vmem>>, vector<8x16x8xf32>
    tpu.vector_store %arg7[%c0_152, %c0_153, %c0_154], %171 {strides = array<i32>} : memref<8x16x8xf32, #tpu.memory_space<vmem>>, vector<8x16x8xf32>,
    %c0_155 = arith.constant 0 : index
    %c0_156 = arith.constant 0 : index
    %173 = vector.load %arg8[%c0_155, %c0_156] : memref<8x8xf32, #tpu.memory_space<vmem>>, vector<8x8xf32>
    %cst_157 = arith.constant dense<0xFF800000> : vector<8x8xf32>
    %174 = vector.multi_reduction <maximumf>, %169, %cst_157 [1] : vector<8x16x8xf32> to vector<8x8xf32>
    %175 = arith.addf %173, %174 : vector<8x8xf32>
    %c0_158 = arith.constant 0 : index
    %c0_159 = arith.constant 0 : index
    %176 = vector.load %arg8[%c0_158, %c0_159] : memref<8x8xf32, #tpu.memory_space<vmem>>, vector<8x8xf32>
    tpu.vector_store %arg8[%c0_158, %c0_159], %175 {strides = array<i32>} : memref<8x8xf32, #tpu.memory_space<vmem>>, vector<8x8xf32>,
    %c16_i32_160 = arith.constant 16 : i32
    %177 = arith.muli %11, %c16_i32_160 : i32
    %c9_i32 = arith.constant 9 : i32
    %178 = arith.addi %177, %c9_i32 : i32
    %c0_161 = arith.constant 0 : index
    %179 = arith.index_cast %178 : i32 to index
    %c0_162 = arith.constant 0 : index
    %c0_163 = arith.constant 0 : index
    %180 = vector.load %arg4[%c0_161, %179, %c0_162, %c0_163] : memref<1x16x16x8xbf16, #tpu.memory_space<vmem>>, vector<1x1x16x8xbf16>
    %181 = vector.shape_cast %180 : vector<1x1x16x8xbf16> to vector<16x8xbf16>
    %cst_164 = arith.constant dense<0.000000e+00> : vector<128x8xf32>
    %182 = tpu.matmul %9, %181, %cst_164 {dimension_numbers = #tpu.dot_dimension_numbers<[1], [0], [0], [1], [0, 0, 1, 1], [], []>} : vector<128x16xbf16>, vector<16x8xbf16>, vector<128x8xf32> -> vector<128x8xf32>
    %183 = vector.shape_cast %182 : vector<128x8xf32> to vector<8x16x8xf32>
    %184 = vector.extract_strided_slice %14 {offsets = [0, 9], sizes = [16, 1], strides = [1, 1]} : vector<16x16xf32> to vector<16x1xf32>
    %185 = vector.shape_cast %184 : vector<16x1xf32> to vector<1x16x1xf32>
    %186 = vector.broadcast %185 : vector<1x16x1xf32> to vector<8x16x8xf32>
    %187 = arith.mulf %183, %186 : vector<8x16x8xf32>
    %c0_165 = arith.constant 0 : index
    %c0_166 = arith.constant 0 : index
    %c0_167 = arith.constant 0 : index
    %188 = vector.load %arg7[%c0_165, %c0_166, %c0_167] : memref<8x16x8xf32, #tpu.memory_space<vmem>>, vector<8x16x8xf32>
    %189 = arith.maximumf %188, %187 : vector<8x16x8xf32>
    %c0_168 = arith.constant 0 : index
    %c0_169 = arith.constant 0 : index
    %c0_170 = arith.constant 0 : index
    %190 = vector.load %arg7[%c0_168, %c0_169, %c0_170] : memref<8x16x8xf32, #tpu.memory_space<vmem>>, vector<8x16x8xf32>
    tpu.vector_store %arg7[%c0_168, %c0_169, %c0_170], %189 {strides = array<i32>} : memref<8x16x8xf32, #tpu.memory_space<vmem>>, vector<8x16x8xf32>,
    %c0_171 = arith.constant 0 : index
    %c0_172 = arith.constant 0 : index
    %191 = vector.load %arg8[%c0_171, %c0_172] : memref<8x8xf32, #tpu.memory_space<vmem>>, vector<8x8xf32>
    %cst_173 = arith.constant dense<0xFF800000> : vector<8x8xf32>
    %192 = vector.multi_reduction <maximumf>, %187, %cst_173 [1] : vector<8x16x8xf32> to vector<8x8xf32>
    %193 = arith.addf %191, %192 : vector<8x8xf32>
    %c0_174 = arith.constant 0 : index
    %c0_175 = arith.constant 0 : index
    %194 = vector.load %arg8[%c0_174, %c0_175] : memref<8x8xf32, #tpu.memory_space<vmem>>, vector<8x8xf32>
    tpu.vector_store %arg8[%c0_174, %c0_175], %193 {strides = array<i32>} : memref<8x8xf32, #tpu.memory_space<vmem>>, vector<8x8xf32>,
    %c16_i32_176 = arith.constant 16 : i32
    %195 = arith.muli %11, %c16_i32_176 : i32
    %c10_i32 = arith.constant 10 : i32
    %196 = arith.addi %195, %c10_i32 : i32
    %c0_177 = arith.constant 0 : index
    %197 = arith.index_cast %196 : i32 to index
    %c0_178 = arith.constant 0 : index
    %c0_179 = arith.constant 0 : index
    %198 = vector.load %arg4[%c0_177, %197, %c0_178, %c0_179] : memref<1x16x16x8xbf16, #tpu.memory_space<vmem>>, vector<1x1x16x8xbf16>
    %199 = vector.shape_cast %198 : vector<1x1x16x8xbf16> to vector<16x8xbf16>
    %cst_180 = arith.constant dense<0.000000e+00> : vector<128x8xf32>
    %200 = tpu.matmul %9, %199, %cst_180 {dimension_numbers = #tpu.dot_dimension_numbers<[1], [0], [0], [1], [0, 0, 1, 1], [], []>} : vector<128x16xbf16>, vector<16x8xbf16>, vector<128x8xf32> -> vector<128x8xf32>
    %201 = vector.shape_cast %200 : vector<128x8xf32> to vector<8x16x8xf32>
    %202 = vector.extract_strided_slice %14 {offsets = [0, 10], sizes = [16, 1], strides = [1, 1]} : vector<16x16xf32> to vector<16x1xf32>
    %203 = vector.shape_cast %202 : vector<16x1xf32> to vector<1x16x1xf32>
    %204 = vector.broadcast %203 : vector<1x16x1xf32> to vector<8x16x8xf32>
    %205 = arith.mulf %201, %204 : vector<8x16x8xf32>
    %c0_181 = arith.constant 0 : index
    %c0_182 = arith.constant 0 : index
    %c0_183 = arith.constant 0 : index
    %206 = vector.load %arg7[%c0_181, %c0_182, %c0_183] : memref<8x16x8xf32, #tpu.memory_space<vmem>>, vector<8x16x8xf32>
    %207 = arith.maximumf %206, %205 : vector<8x16x8xf32>
    %c0_184 = arith.constant 0 : index
    %c0_185 = arith.constant 0 : index
    %c0_186 = arith.constant 0 : index
    %208 = vector.load %arg7[%c0_184, %c0_185, %c0_186] : memref<8x16x8xf32, #tpu.memory_space<vmem>>, vector<8x16x8xf32>
    tpu.vector_store %arg7[%c0_184, %c0_185, %c0_186], %207 {strides = array<i32>} : memref<8x16x8xf32, #tpu.memory_space<vmem>>, vector<8x16x8xf32>,
    %c0_187 = arith.constant 0 : index
    %c0_188 = arith.constant 0 : index
    %209 = vector.load %arg8[%c0_187, %c0_188] : memref<8x8xf32, #tpu.memory_space<vmem>>, vector<8x8xf32>
    %cst_189 = arith.constant dense<0xFF800000> : vector<8x8xf32>
    %210 = vector.multi_reduction <maximumf>, %205, %cst_189 [1] : vector<8x16x8xf32> to vector<8x8xf32>
    %211 = arith.addf %209, %210 : vector<8x8xf32>
    %c0_190 = arith.constant 0 : index
    %c0_191 = arith.constant 0 : index
    %212 = vector.load %arg8[%c0_190, %c0_191] : memref<8x8xf32, #tpu.memory_space<vmem>>, vector<8x8xf32>
    tpu.vector_store %arg8[%c0_190, %c0_191], %211 {strides = array<i32>} : memref<8x8xf32, #tpu.memory_space<vmem>>, vector<8x8xf32>,
    %c16_i32_192 = arith.constant 16 : i32
    %213 = arith.muli %11, %c16_i32_192 : i32
    %c11_i32 = arith.constant 11 : i32
    %214 = arith.addi %213, %c11_i32 : i32
    %c0_193 = arith.constant 0 : index
    %215 = arith.index_cast %214 : i32 to index
    %c0_194 = arith.constant 0 : index
    %c0_195 = arith.constant 0 : index
    %216 = vector.load %arg4[%c0_193, %215, %c0_194, %c0_195] : memref<1x16x16x8xbf16, #tpu.memory_space<vmem>>, vector<1x1x16x8xbf16>
    %217 = vector.shape_cast %216 : vector<1x1x16x8xbf16> to vector<16x8xbf16>
    %cst_196 = arith.constant dense<0.000000e+00> : vector<128x8xf32>
    %218 = tpu.matmul %9, %217, %cst_196 {dimension_numbers = #tpu.dot_dimension_numbers<[1], [0], [0], [1], [0, 0, 1, 1], [], []>} : vector<128x16xbf16>, vector<16x8xbf16>, vector<128x8xf32> -> vector<128x8xf32>
    %219 = vector.shape_cast %218 : vector<128x8xf32> to vector<8x16x8xf32>
    %220 = vector.extract_strided_slice %14 {offsets = [0, 11], sizes = [16, 1], strides = [1, 1]} : vector<16x16xf32> to vector<16x1xf32>
    %221 = vector.shape_cast %220 : vector<16x1xf32> to vector<1x16x1xf32>
    %222 = vector.broadcast %221 : vector<1x16x1xf32> to vector<8x16x8xf32>
    %223 = arith.mulf %219, %222 : vector<8x16x8xf32>
    %c0_197 = arith.constant 0 : index
    %c0_198 = arith.constant 0 : index
    %c0_199 = arith.constant 0 : index
    %224 = vector.load %arg7[%c0_197, %c0_198, %c0_199] : memref<8x16x8xf32, #tpu.memory_space<vmem>>, vector<8x16x8xf32>
    %225 = arith.maximumf %224, %223 : vector<8x16x8xf32>
    %c0_200 = arith.constant 0 : index
    %c0_201 = arith.constant 0 : index
    %c0_202 = arith.constant 0 : index
    %226 = vector.load %arg7[%c0_200, %c0_201, %c0_202] : memref<8x16x8xf32, #tpu.memory_space<vmem>>, vector<8x16x8xf32>
    tpu.vector_store %arg7[%c0_200, %c0_201, %c0_202], %225 {strides = array<i32>} : memref<8x16x8xf32, #tpu.memory_space<vmem>>, vector<8x16x8xf32>,
    %c0_203 = arith.constant 0 : index
    %c0_204 = arith.constant 0 : index
    %227 = vector.load %arg8[%c0_203, %c0_204] : memref<8x8xf32, #tpu.memory_space<vmem>>, vector<8x8xf32>
    %cst_205 = arith.constant dense<0xFF800000> : vector<8x8xf32>
    %228 = vector.multi_reduction <maximumf>, %223, %cst_205 [1] : vector<8x16x8xf32> to vector<8x8xf32>
    %229 = arith.addf %227, %228 : vector<8x8xf32>
    %c0_206 = arith.constant 0 : index
    %c0_207 = arith.constant 0 : index
    %230 = vector.load %arg8[%c0_206, %c0_207] : memref<8x8xf32, #tpu.memory_space<vmem>>, vector<8x8xf32>
    tpu.vector_store %arg8[%c0_206, %c0_207], %229 {strides = array<i32>} : memref<8x8xf32, #tpu.memory_space<vmem>>, vector<8x8xf32>,
    %c16_i32_208 = arith.constant 16 : i32
    %231 = arith.muli %11, %c16_i32_208 : i32
    %c12_i32 = arith.constant 12 : i32
    %232 = arith.addi %231, %c12_i32 : i32
    %c0_209 = arith.constant 0 : index
    %233 = arith.index_cast %232 : i32 to index
    %c0_210 = arith.constant 0 : index
    %c0_211 = arith.constant 0 : index
    %234 = vector.load %arg4[%c0_209, %233, %c0_210, %c0_211] : memref<1x16x16x8xbf16, #tpu.memory_space<vmem>>, vector<1x1x16x8xbf16>
    %235 = vector.shape_cast %234 : vector<1x1x16x8xbf16> to vector<16x8xbf16>
    %cst_212 = arith.constant dense<0.000000e+00> : vector<128x8xf32>
    %236 = tpu.matmul %9, %235, %cst_212 {dimension_numbers = #tpu.dot_dimension_numbers<[1], [0], [0], [1], [0, 0, 1, 1], [], []>} : vector<128x16xbf16>, vector<16x8xbf16>, vector<128x8xf32> -> vector<128x8xf32>
    %237 = vector.shape_cast %236 : vector<128x8xf32> to vector<8x16x8xf32>
    %238 = vector.extract_strided_slice %14 {offsets = [0, 12], sizes = [16, 1], strides = [1, 1]} : vector<16x16xf32> to vector<16x1xf32>
    %239 = vector.shape_cast %238 : vector<16x1xf32> to vector<1x16x1xf32>
    %240 = vector.broadcast %239 : vector<1x16x1xf32> to vector<8x16x8xf32>
    %241 = arith.mulf %237, %240 : vector<8x16x8xf32>
    %c0_213 = arith.constant 0 : index
    %c0_214 = arith.constant 0 : index
    %c0_215 = arith.constant 0 : index
    %242 = vector.load %arg7[%c0_213, %c0_214, %c0_215] : memref<8x16x8xf32, #tpu.memory_space<vmem>>, vector<8x16x8xf32>
    %243 = arith.maximumf %242, %241 : vector<8x16x8xf32>
    %c0_216 = arith.constant 0 : index
    %c0_217 = arith.constant 0 : index
    %c0_218 = arith.constant 0 : index
    %244 = vector.load %arg7[%c0_216, %c0_217, %c0_218] : memref<8x16x8xf32, #tpu.memory_space<vmem>>, vector<8x16x8xf32>
    tpu.vector_store %arg7[%c0_216, %c0_217, %c0_218], %243 {strides = array<i32>} : memref<8x16x8xf32, #tpu.memory_space<vmem>>, vector<8x16x8xf32>,
    %c0_219 = arith.constant 0 : index
    %c0_220 = arith.constant 0 : index
    %245 = vector.load %arg8[%c0_219, %c0_220] : memref<8x8xf32, #tpu.memory_space<vmem>>, vector<8x8xf32>
    %cst_221 = arith.constant dense<0xFF800000> : vector<8x8xf32>
    %246 = vector.multi_reduction <maximumf>, %241, %cst_221 [1] : vector<8x16x8xf32> to vector<8x8xf32>
    %247 = arith.addf %245, %246 : vector<8x8xf32>
    %c0_222 = arith.constant 0 : index
    %c0_223 = arith.constant 0 : index
    %248 = vector.load %arg8[%c0_222, %c0_223] : memref<8x8xf32, #tpu.memory_space<vmem>>, vector<8x8xf32>
    tpu.vector_store %arg8[%c0_222, %c0_223], %247 {strides = array<i32>} : memref<8x8xf32, #tpu.memory_space<vmem>>, vector<8x8xf32>,
    %c16_i32_224 = arith.constant 16 : i32
    %249 = arith.muli %11, %c16_i32_224 : i32
    %c13_i32 = arith.constant 13 : i32
    %250 = arith.addi %249, %c13_i32 : i32
    %c0_225 = arith.constant 0 : index
    %251 = arith.index_cast %250 : i32 to index
    %c0_226 = arith.constant 0 : index
    %c0_227 = arith.constant 0 : index
    %252 = vector.load %arg4[%c0_225, %251, %c0_226, %c0_227] : memref<1x16x16x8xbf16, #tpu.memory_space<vmem>>, vector<1x1x16x8xbf16>
    %253 = vector.shape_cast %252 : vector<1x1x16x8xbf16> to vector<16x8xbf16>
    %cst_228 = arith.constant dense<0.000000e+00> : vector<128x8xf32>
    %254 = tpu.matmul %9, %253, %cst_228 {dimension_numbers = #tpu.dot_dimension_numbers<[1], [0], [0], [1], [0, 0, 1, 1], [], []>} : vector<128x16xbf16>, vector<16x8xbf16>, vector<128x8xf32> -> vector<128x8xf32>
    %255 = vector.shape_cast %254 : vector<128x8xf32> to vector<8x16x8xf32>
    %256 = vector.extract_strided_slice %14 {offsets = [0, 13], sizes = [16, 1], strides = [1, 1]} : vector<16x16xf32> to vector<16x1xf32>
    %257 = vector.shape_cast %256 : vector<16x1xf32> to vector<1x16x1xf32>
    %258 = vector.broadcast %257 : vector<1x16x1xf32> to vector<8x16x8xf32>
    %259 = arith.mulf %255, %258 : vector<8x16x8xf32>
    %c0_229 = arith.constant 0 : index
    %c0_230 = arith.constant 0 : index
    %c0_231 = arith.constant 0 : index
    %260 = vector.load %arg7[%c0_229, %c0_230, %c0_231] : memref<8x16x8xf32, #tpu.memory_space<vmem>>, vector<8x16x8xf32>
    %261 = arith.maximumf %260, %259 : vector<8x16x8xf32>
    %c0_232 = arith.constant 0 : index
    %c0_233 = arith.constant 0 : index
    %c0_234 = arith.constant 0 : index
    %262 = vector.load %arg7[%c0_232, %c0_233, %c0_234] : memref<8x16x8xf32, #tpu.memory_space<vmem>>, vector<8x16x8xf32>
    tpu.vector_store %arg7[%c0_232, %c0_233, %c0_234], %261 {strides = array<i32>} : memref<8x16x8xf32, #tpu.memory_space<vmem>>, vector<8x16x8xf32>,
    %c0_235 = arith.constant 0 : index
    %c0_236 = arith.constant 0 : index
    %263 = vector.load %arg8[%c0_235, %c0_236] : memref<8x8xf32, #tpu.memory_space<vmem>>, vector<8x8xf32>
    %cst_237 = arith.constant dense<0xFF800000> : vector<8x8xf32>
    %264 = vector.multi_reduction <maximumf>, %259, %cst_237 [1] : vector<8x16x8xf32> to vector<8x8xf32>
    %265 = arith.addf %263, %264 : vector<8x8xf32>
    %c0_238 = arith.constant 0 : index
    %c0_239 = arith.constant 0 : index
    %266 = vector.load %arg8[%c0_238, %c0_239] : memref<8x8xf32, #tpu.memory_space<vmem>>, vector<8x8xf32>
    tpu.vector_store %arg8[%c0_238, %c0_239], %265 {strides = array<i32>} : memref<8x8xf32, #tpu.memory_space<vmem>>, vector<8x8xf32>,
    %c16_i32_240 = arith.constant 16 : i32
    %267 = arith.muli %11, %c16_i32_240 : i32
    %c14_i32 = arith.constant 14 : i32
    %268 = arith.addi %267, %c14_i32 : i32
    %c0_241 = arith.constant 0 : index
    %269 = arith.index_cast %268 : i32 to index
    %c0_242 = arith.constant 0 : index
    %c0_243 = arith.constant 0 : index
    %270 = vector.load %arg4[%c0_241, %269, %c0_242, %c0_243] : memref<1x16x16x8xbf16, #tpu.memory_space<vmem>>, vector<1x1x16x8xbf16>
    %271 = vector.shape_cast %270 : vector<1x1x16x8xbf16> to vector<16x8xbf16>
    %cst_244 = arith.constant dense<0.000000e+00> : vector<128x8xf32>
    %272 = tpu.matmul %9, %271, %cst_244 {dimension_numbers = #tpu.dot_dimension_numbers<[1], [0], [0], [1], [0, 0, 1, 1], [], []>} : vector<128x16xbf16>, vector<16x8xbf16>, vector<128x8xf32> -> vector<128x8xf32>
    %273 = vector.shape_cast %272 : vector<128x8xf32> to vector<8x16x8xf32>
    %274 = vector.extract_strided_slice %14 {offsets = [0, 14], sizes = [16, 1], strides = [1, 1]} : vector<16x16xf32> to vector<16x1xf32>
    %275 = vector.shape_cast %274 : vector<16x1xf32> to vector<1x16x1xf32>
    %276 = vector.broadcast %275 : vector<1x16x1xf32> to vector<8x16x8xf32>
    %277 = arith.mulf %273, %276 : vector<8x16x8xf32>
    %c0_245 = arith.constant 0 : index
    %c0_246 = arith.constant 0 : index
    %c0_247 = arith.constant 0 : index
    %278 = vector.load %arg7[%c0_245, %c0_246, %c0_247] : memref<8x16x8xf32, #tpu.memory_space<vmem>>, vector<8x16x8xf32>
    %279 = arith.maximumf %278, %277 : vector<8x16x8xf32>
    %c0_248 = arith.constant 0 : index
    %c0_249 = arith.constant 0 : index
    %c0_250 = arith.constant 0 : index
    %280 = vector.load %arg7[%c0_248, %c0_249, %c0_250] : memref<8x16x8xf32, #tpu.memory_space<vmem>>, vector<8x16x8xf32>
    tpu.vector_store %arg7[%c0_248, %c0_249, %c0_250], %279 {strides = array<i32>} : memref<8x16x8xf32, #tpu.memory_space<vmem>>, vector<8x16x8xf32>,
    %c0_251 = arith.constant 0 : index
    %c0_252 = arith.constant 0 : index
    %281 = vector.load %arg8[%c0_251, %c0_252] : memref<8x8xf32, #tpu.memory_space<vmem>>, vector<8x8xf32>
    %cst_253 = arith.constant dense<0xFF800000> : vector<8x8xf32>
    %282 = vector.multi_reduction <maximumf>, %277, %cst_253 [1] : vector<8x16x8xf32> to vector<8x8xf32>
    %283 = arith.addf %281, %282 : vector<8x8xf32>
    %c0_254 = arith.constant 0 : index
    %c0_255 = arith.constant 0 : index
    %284 = vector.load %arg8[%c0_254, %c0_255] : memref<8x8xf32, #tpu.memory_space<vmem>>, vector<8x8xf32>
    tpu.vector_store %arg8[%c0_254, %c0_255], %283 {strides = array<i32>} : memref<8x8xf32, #tpu.memory_space<vmem>>, vector<8x8xf32>,
    %c16_i32_256 = arith.constant 16 : i32
    %285 = arith.muli %11, %c16_i32_256 : i32
    %c15_i32 = arith.constant 15 : i32
    %286 = arith.addi %285, %c15_i32 : i32
    %c0_257 = arith.constant 0 : index
    %287 = arith.index_cast %286 : i32 to index
    %c0_258 = arith.constant 0 : index
    %c0_259 = arith.constant 0 : index
    %288 = vector.load %arg4[%c0_257, %287, %c0_258, %c0_259] : memref<1x16x16x8xbf16, #tpu.memory_space<vmem>>, vector<1x1x16x8xbf16>
    %289 = vector.shape_cast %288 : vector<1x1x16x8xbf16> to vector<16x8xbf16>
    %cst_260 = arith.constant dense<0.000000e+00> : vector<128x8xf32>
    %290 = tpu.matmul %9, %289, %cst_260 {dimension_numbers = #tpu.dot_dimension_numbers<[1], [0], [0], [1], [0, 0, 1, 1], [], []>} : vector<128x16xbf16>, vector<16x8xbf16>, vector<128x8xf32> -> vector<128x8xf32>
    %291 = vector.shape_cast %290 : vector<128x8xf32> to vector<8x16x8xf32>
    %292 = vector.extract_strided_slice %14 {offsets = [0, 15], sizes = [16, 1], strides = [1, 1]} : vector<16x16xf32> to vector<16x1xf32>
    %293 = vector.shape_cast %292 : vector<16x1xf32> to vector<1x16x1xf32>
    %294 = vector.broadcast %293 : vector<1x16x1xf32> to vector<8x16x8xf32>
    %295 = arith.mulf %291, %294 : vector<8x16x8xf32>
    %c0_261 = arith.constant 0 : index
    %c0_262 = arith.constant 0 : index
    %c0_263 = arith.constant 0 : index
    %296 = vector.load %arg7[%c0_261, %c0_262, %c0_263] : memref<8x16x8xf32, #tpu.memory_space<vmem>>, vector<8x16x8xf32>
    %297 = arith.maximumf %296, %295 : vector<8x16x8xf32>
    %c0_264 = arith.constant 0 : index
    %c0_265 = arith.constant 0 : index
    %c0_266 = arith.constant 0 : index
    %298 = vector.load %arg7[%c0_264, %c0_265, %c0_266] : memref<8x16x8xf32, #tpu.memory_space<vmem>>, vector<8x16x8xf32>
    tpu.vector_store %arg7[%c0_264, %c0_265, %c0_266], %297 {strides = array<i32>} : memref<8x16x8xf32, #tpu.memory_space<vmem>>, vector<8x16x8xf32>,
    %c0_267 = arith.constant 0 : index
    %c0_268 = arith.constant 0 : index
    %299 = vector.load %arg8[%c0_267, %c0_268] : memref<8x8xf32, #tpu.memory_space<vmem>>, vector<8x8xf32>
    %cst_269 = arith.constant dense<0xFF800000> : vector<8x8xf32>
    %300 = vector.multi_reduction <maximumf>, %295, %cst_269 [1] : vector<8x16x8xf32> to vector<8x8xf32>
    %301 = arith.addf %299, %300 : vector<8x8xf32>
    %c0_270 = arith.constant 0 : index
    %c0_271 = arith.constant 0 : index
    %302 = vector.load %arg8[%c0_270, %c0_271] : memref<8x8xf32, #tpu.memory_space<vmem>>, vector<8x8xf32>
    tpu.vector_store %arg8[%c0_270, %c0_271], %301 {strides = array<i32>} : memref<8x8xf32, #tpu.memory_space<vmem>>, vector<8x8xf32>,
    %c1_i32_272 = arith.constant 1 : i32
    %c0_273 = arith.constant 0 : index
    %c0_274 = arith.constant 0 : index
    %303 = vector.load %arg6[%c0_273, %c0_274] : memref<8x8xf32, #tpu.memory_space<vmem>>, vector<8x8xf32>
    %c0_275 = arith.constant 0 : index
    %c0_276 = arith.constant 0 : index
    %304 = vector.load %arg8[%c0_275, %c0_276] : memref<8x8xf32, #tpu.memory_space<vmem>>, vector<8x8xf32>
    %c0_277 = arith.constant 0 : index
    %c0_278 = arith.constant 0 : index
    %c0_279 = arith.constant 0 : index
    %305 = vector.load %arg7[%c0_277, %c0_278, %c0_279] : memref<8x16x8xf32, #tpu.memory_space<vmem>>, vector<8x16x8xf32>
    %cst_280 = arith.constant dense<0.000000e+00> : vector<8x8xf32>
    %306 = vector.multi_reduction <add>, %305, %cst_280 [1] : vector<8x16x8xf32> to vector<8x8xf32>
    %307 = arith.addf %304, %306 : vector<8x8xf32>
    %308 = arith.addf %303, %307 : vector<8x8xf32>
    %c0_281 = arith.constant 0 : index
    %c0_282 = arith.constant 0 : index
    %309 = vector.load %arg6[%c0_281, %c0_282] : memref<8x8xf32, #tpu.memory_space<vmem>>, vector<8x8xf32>
    tpu.vector_store %arg6[%c0_281, %c0_282], %308 {strides = array<i32>} : memref<8x8xf32, #tpu.memory_space<vmem>>, vector<8x8xf32>,
    return
  }
  func.func @transform_0(%arg0: i32, %arg1: i32, %arg2: i32) -> (i32, i32, i32, i32) {
    %c0_i32 = arith.constant 0 : i32
    %c0_i32_0 = arith.constant 0 : i32
    %c0_i32_1 = arith.constant 0 : i32
    return %arg2, %arg0, %c0_i32, %c0_i32_0 : i32, i32, i32, i32
  }
  func.func @transform_1(%arg0: i32, %arg1: i32, %arg2: i32) -> (i32, i32, i32, i32) {
    %c0_i32 = arith.constant 0 : i32
    %c0_i32_0 = arith.constant 0 : i32
    %c0_i32_1 = arith.constant 0 : i32
    return %arg2, %c0_i32, %c0_i32_0, %arg1 : i32, i32, i32, i32
  }
  func.func @transform_2(%arg0: i32, %arg1: i32, %arg2: i32) -> (i32, i32, i32, i32) {
    %c0_i32 = arith.constant 0 : i32
    %c0_i32_0 = arith.constant 0 : i32
    %c0_i32_1 = arith.constant 0 : i32
    %c0_i32_2 = arith.constant 0 : i32
    return %arg2, %c0_i32, %c0_i32_0, %c0_i32_1 : i32, i32, i32, i32
  }
  func.func @transform_3(%arg0: i32, %arg1: i32, %arg2: i32) -> (i32, i32) {
    %c0_i32 = arith.constant 0 : i32
    return %arg0, %arg1 : i32, i32
  }
}

</mosaic_0001>

<bundles_post_ra>
// kernel: tpu_custom_call.1
= control target key start
LH: loop header
LB: loop body
LE: loop exit
PB: predicated region body
PF: predicated region fallthrough
CT: control target
= control target key end

     0   :  { %8 = vsyncpa [#allocation5], 0  ;;  %s5713_s12 = smov 0   ;;  %s5715_s13 = smov 0   ;;  %s8374_s0 = inlined_call_operand.vmem [shape: bf16[2,8,16,16], index: 0, kind: input, shape index: {}]   ;;  %s8375_s1 = inlined_call_operand.vmem [shape: bf16[2,16,16,8], index: 1, kind: input, shape index: {}]   ;;  %s8376_s2 = inlined_call_operand.vmem [shape: f32[2,1,16,16], index: 2, kind: input, shape index: {}]   ;;  %s8377_s3 = inlined_call_operand.hbm [shape: f32[8,8], index: 3, kind: output, shape index: {}]  }
   0x1   :  { %s5717_s14 = smov 0  }
   0x2 LB: > { %s4885_s15 = sadd.s32 4294967295, %s5671_s14   ;;  %s26_s16 = sadd.s32 1, %s5667_s13  ;;  %s5671_s14 = sphi %s5717_s14, %s14_s14   ;;  %s5667_s13 = sphi %s5715_s13, %s8586_s13   ;;  %s5663_s12 = sphi %s5713_s12, %s8585_s12  }
   0x3   : > { %p27_p0 = scmp.ge.s32.totalorder %s26_s16, 2  ;;  %p4888_p1 = scmp.ge.s32.totalorder %s5671_s14, 1 }
   0x4   : > { %p192_p2 = scmp.lt.s32.totalorder %s5671_s14, 3 }
   0x5   : > { %s8588_s16 = smov (%p27_p0, %s26_s16), 0 }
   0x6   : > { %p193_p3 = pnand %p4888_p1, %p192_p2 }
   0x8   : > { %196 = sbr.rel (%p193_p3) target bundleno = 742 (0x2e6), region = 32 }
   0xf   : > { %p230_p4 = scmp.lt.s32.totalorder %s5663_s12, 1  ;;  %p4895_p5 = scmp.ne.s32.totalorder %s5663_s12, 0 }
  0x10   : > { %vm258_vm0 = vcmask (!%p4895_p5), 64512   ;;  %v5673_v0 = vmov (!%p4895_p5), 0.0  }
  0x11   : > { %s231_s17 = scalar_select %p230_p4, %s5663_s12, 1 }
  0x12   : > { %257 = sbr.rel (%p4895_p5) target bundleno = 25 (0x19), region = 36  ;;  %259 = vst.msk [vmem:[#allocation4] sm:$0xff] (!%p4895_p5), %vm258_vm0, %v5673_v0 }
  0x13   : > { %s5082_s18 = sshll.u32 %s231_s17, 6  ;;  %s5083_s19 = sshll.u32 %s231_s17, 7 }
  0x14   : > { %s5735_s22 = scalar_lea.vmem %s8374_s0, %s5082_s18  ;;  %s5740_s25 = scalar_lea.vmem %s8375_s1, %s5083_s19 }
  0x15   : > { %s5084_s26 = sshll.u32 %s231_s17, 4 }
  0x16   : > { %s5745_s29 = scalar_lea.vmem %s8376_s2, %s5084_s26 }
  0x19 PF: > { %v5593_v1 = vld [vmem:[%s5740_s25] sm:$0xff]   ;;  %vm344_vm1 = vcmask 130048   ;;  %v5594_v2 = vld [vmem:[%s5740_s25 + $0x8] sm:$0xff]   ;;  %v5674_v4 = vmov 0   ;;  %v5597_v6 = vld [vmem:[%s5740_s25 + $0x10] sm:$0xff]   ;;  %v5675_v8 = vmov 1  }
  0x1a   : > { %5229 = vmatprep.subr.bf16.mxu0 %v5593_v1  ;;  %v5750_v3 = vld [vmem:[%s5735_s22] sm:$0xff]   ;;  %5567 = vset.pattern.permute.xlu0 %v5674_v4  ;;  %v5753_v5 = vld [vmem:[%s5735_s22 + $0x8] sm:$0xff]   ;;  %v5761_v7 = vld [vmem:[%s5735_s22 + $0x10] sm:$0xff]   ;;  %v5676_v18 = vmov 2   ;;  %v5677_v20 = vmov 3   ;;  %v5678_v22 = vmov 4  }
  0x1b   : > { %5247 = vmatprep.subr.bf16.mxu1 %v5594_v2  ;;  %5230 = vmatpush3.bf16.msra.mxu0 %v5593_v1  ;;  %v5600_v9 = vld [vmem:[%s5740_s25 + $0x18] sm:$0xff]   ;;  %v5776_v11 = vld [vmem:[%s5735_s22 + $0x20] sm:$0xff]   ;;  %v5606_v13 = vld [vmem:[%s5740_s25 + $0x28] sm:$0xff]   ;;  %v5679_v23 = vmov 5   ;;  %v5680_v25 = vmov 6   ;;  %v5681_v26 = vmov 7  }
  0x1c   : > { %5248 = vmatpush3.bf16.msra.mxu1 %v5594_v2  ;;  %5231 = vmatprep.mubr.msk.bf16.mxu0 %vm344_vm1, %v5750_v3  ;;  %v5773_v10 = vld [vmem:[%s5735_s22 + $0x18] sm:$0xff]   ;;  %v5605_v12 = vld [vmem:[%s5740_s25 + $0x20] sm:$0xff]   ;;  %v5792_v15 = vld [vmem:[%s5735_s22 + $0x28] sm:$0xff]   ;;  %vm260_vm2 = vcmask 64512   ;;  %v5682_v29 = vmov -inf   ;;  %v5683_v30 = vmov 8  }
  0x1d   : > { %5249 = vmatprep.mubr.msk.bf16.mxu1 %vm344_vm1, %v5750_v3  ;;  %5568 = vset.pattern.permute.xlu1 %v5675_v8  ;;  %v5789_v14 = vld [vmem:[%s5745_s29] sm:$0xff]  ;;  %v5797_v16 = vld [vmem:[%s5745_s29 + $0x8] sm:$0xff]  ;;  %v5800_v17 = vld [vmem:[%s5735_s22 + $0x30] sm:$0xff]   ;;  %263 = vst.msk [vmem:[#allocation2 + $0x10] sm:$0xff] %vm260_vm2, %v5682_v29  ;;  %v5684_v31 = vmov 9   ;;  %v5685_v36 = vmov 10  }
  0x1e   : > { %5232 = vmatmul.mubr.msk.bf16.vlgmr.msra.gmra.mrb[0].mxu0 %vm344_vm1, %v5753_v5  ;;  %5265 = vmatprep.subr.bf16.mxu0 %v5597_v6  ;;  %v5813_v19 = vld [vmem:[%s5735_s22 + $0x38] sm:$0xff]   ;;  %v5607_v21 = vld [vmem:[%s5740_s25 + $0x30] sm:$0xff]   ;;  %v5609_v27 = vld [vmem:[%s5740_s25 + $0x40] sm:$0xff]   ;;  %261 = vst.msk [vmem:[#allocation2] sm:$0xff] %vm260_vm2, %v5682_v29  ;;  %v5686_v37 = vmov 0.0   ;;  %v5687_v38 = vmov 11  }
  0x1f   : > { %5250 = vmatmul.mubr.msk.bf16.vlgmr.msra.gmra.mrb[0].mxu1 %vm344_vm1, %v5753_v5  ;;  %5266 = vmatpush3.bf16.msra.mxu0 %v5597_v6  ;;  %v5608_v24 = vld [vmem:[%s5740_s25 + $0x38] sm:$0xff]   ;;  %v5610_v28 = vld [vmem:[%s5740_s25 + $0x48] sm:$0xff]   ;;  %262 = vst.msk [vmem:[#allocation2 + $0x8] sm:$0xff] %vm260_vm2, %v5682_v29  ;;  %264 = vst.msk [vmem:[#allocation2 + $0x18] sm:$0xff] %vm260_vm2, %v5682_v29  ;;  %v5688_v41 = vmov 12   ;;  %v5689_v44 = vmov 13  }
  0x20   : > { %5235 = vmatprep.mubr.msk.bf16.mxu0 %vm344_vm1, %v5761_v7  ;;  %5253 = vmatprep.mubr.msk.bf16.mxu1 %vm344_vm1, %v5761_v7  ;;  %265 = vst.msk [vmem:[#allocation2 + $0x20] sm:$0xff] %vm260_vm2, %v5682_v29  ;;  %266 = vst.msk [vmem:[#allocation2 + $0x28] sm:$0xff] %vm260_vm2, %v5682_v29  ;;  %v5611_v32 = vld [vmem:[%s5740_s25 + $0x50] sm:$0xff]   ;;  %v5612_v33 = vld [vmem:[%s5740_s25 + $0x58] sm:$0xff]   ;;  %vm621_vm3 = vcmask 1041409   ;;  %vm623_vm4 = vcmask 1042434  }
  0x21   : > { %5283 = vmatprep.subr.bf16.mxu1 %v5600_v9  ;;  %5301 = vmatprep.subr.bf16.mxu0 %v5605_v12  ;;  %267 = vst.msk [vmem:[#allocation2 + $0x30] sm:$0xff] %vm260_vm2, %v5682_v29  ;;  %268 = vst.msk [vmem:[#allocation2 + $0x38] sm:$0xff] %vm260_vm2, %v5682_v29  ;;  %v5613_v34 = vld [vmem:[%s5740_s25 + $0x60] sm:$0xff]   ;;  %v5614_v35 = vld [vmem:[%s5740_s25 + $0x68] sm:$0xff]   ;;  %vm625_vm5 = vcmask 1043459   ;;  %vm627_vm6 = vcmask 1044484  }
  0x22   : > { %5284 = vmatpush3.bf16.msra.mxu1 %v5600_v9  ;;  %468 = vperm.xlu0 %5567, %v5789_v14   ;;  %269 = vst.msk [vmem:[#allocation2 + $0x40] sm:$0xff] %vm260_vm2, %v5682_v29  ;;  %270 = vst.msk [vmem:[#allocation2 + $0x48] sm:$0xff] %vm260_vm2, %v5682_v29  ;;  %v5615_v39 = vld [vmem:[%s5740_s25 + $0x70] sm:$0xff]   ;;  %v5616_v40 = vld [vmem:[%s5740_s25 + $0x78] sm:$0xff]   ;;  %vm629_vm7 = vcmask 1045509   ;;  %vm631_vm8 = vcmask 1046534  }
  0x23   : > { %5319 = vmatprep.subr.bf16.mxu1 %v5606_v13  ;;  %745 = vperm.xlu1 %5568, %v5789_v14   ;;  %271 = vst.msk [vmem:[#allocation2 + $0x50] sm:$0xff] %vm260_vm2, %v5682_v29  ;;  %272 = vst.msk [vmem:[#allocation2 + $0x58] sm:$0xff] %vm260_vm2, %v5682_v29  ;;  %vm633_vm9 = vcmask 1047559   ;;  %s5692_s30 = smov [#allocation4]   ;;  %p8338_p6 = scmp.eq.s32.totalorder %s4885_s15, 1 }
  0x24   : > { %273 = vst.msk [vmem:[#allocation2 + $0x60] sm:$0xff] %vm260_vm2, %v5682_v29  ;;  %274 = vst.msk [vmem:[#allocation2 + $0x68] sm:$0xff] %vm260_vm2, %v5682_v29  ;;  %v494_v47 = vld [vmem:[#allocation2 + $0x10] sm:$0xff]  ;;  %s4792_s4 = sshll.u32 %s5692_s30, 4  ;;  %s4793_s4 = int_to_ptr.vmem [resolvable:$true] %s4792_s4 }
  0x25   : > { %275 = vst.msk [vmem:[#allocation2 + $0x70] sm:$0xff] %vm260_vm2, %v5682_v29  ;;  %276 = vst.msk [vmem:[#allocation2 + $0x78] sm:$0xff] %vm260_vm2, %v5682_v29  ;;  %v492_v51 = vld [vmem:[#allocation2] sm:$0xff]  ;;  %s5619_s6 = scalar_lea.vmem %s4793_s4, 128  ;;  %p5626_p10 = scmp.lt.s32.totalorder %s4793_s4, %s4793_s4 }
  0x26   : > { %5236 = vmatmul.mubr.msk.bf16.gmra.mrb[4].mxu0 %vm344_vm1, %v5773_v10  ;;  %473 = vperm.xlu0 %5567, %v5797_v16   ;;  %277 = vst.msk [vmem:[#allocation3] sm:$0xff] %vm260_vm2, %v5686_v37  ;;  %v495_v55 = vld [vmem:[#allocation2 + $0x18] sm:$0xff]  ;;  %v493_v62 = vld [vmem:[#allocation2 + $0x8] sm:$0xff]  ;;  %p5620_p7 = scmp.ne.s32.totalorder %s4793_s4, %s5619_s6  ;;  %p5627_p11 = scmp.lt.s32.totalorder %s5619_s6, %s5619_s6 }
  0x27   : > { %5254 = vmatmul.mubr.msk.bf16.gmra.mrb[4].mxu1 %vm344_vm1, %v5773_v10  ;;  %5239 = vmatprep.mubr.msk.bf16.mxu0 %vm344_vm1, %v5776_v11 }
  0x28   : > { %5257 = vmatprep.mubr.msk.bf16.mxu1 %vm344_vm1, %v5776_v11  ;;  %749 = vperm.xlu1 %5568, %v5797_v16   ;;  %p5621_p8 = pnand %p5620_p7, %p8338_p6  ;;  %p5628_p12 = por %p5627_p11, %p5626_p10 }
  0x2a   : > { %5569 = vset.pattern.permute.xlu0 %v5676_v18  ;;  %p5622_p9 = pneg %p5621_p8 }
  0x2b   : > { %1014 = vperm.xlu0 %5569, %v5789_v14  }
  0x2c   : > { %5570 = vset.pattern.permute.xlu1 %v5676_v18  ;;  %p5629_p13 = pnand %p5628_p12, %p5622_p9 }
  0x2d   : > { %1018 = vperm.xlu1 %5570, %v5797_v16  }
  0x2e   : > { %5240 = vmatmul.mubr.msk.bf16.gmra.mrb[8].mxu0 %vm344_vm1, %v5792_v15 }
  0x2f   : > { %5258 = vmatmul.mubr.msk.bf16.gmra.mrb[8].mxu1 %vm344_vm1, %v5792_v15  ;;  %5243 = vmatprep.mubr.msk.bf16.mxu0 %vm344_vm1, %v5800_v17 }
  0x30   : > { %5261 = vmatprep.mubr.msk.bf16.mxu1 %vm344_vm1, %v5800_v17  ;;  %5572 = vset.pattern.permute.xlu0 %v5677_v20 }
  0x31   : > { %5571 = vset.pattern.permute.xlu1 %v5677_v20  ;;  %1287 = vperm.xlu0 %5572, %v5797_v16  }
  0x32   : > { %1283 = vperm.xlu1 %5571, %v5789_v14  }
  0x35   : > { %5574 = vset.pattern.permute.xlu0 %v5679_v23 }
  0x36   : > { %5244 = vmatmul.mubr.msk.bf16.gmra.mrb[12].mxu0 %vm344_vm1, %v5813_v19  ;;  %5573 = vset.pattern.permute.xlu1 %v5678_v22 }
  0x37   : > { %5262 = vmatmul.mubr.msk.bf16.gmra.mrb[12].mxu1 %vm344_vm1, %v5813_v19  ;;  %5267 = vmatprep.mubr.msk.bf16.mxu0 %vm344_vm1, %v5750_v3 }
  0x38   : > { %5285 = vmatprep.mubr.msk.bf16.mxu1 %vm344_vm1, %v5750_v3  ;;  %1552 = vperm.xlu1 %5573, %v5789_v14  }
  0x39   : > { %1821 = vperm.xlu0 %5574, %v5789_v14  }
  0x3c   : > { %1556 = vperm.xlu1 %5573, %v5797_v16  }
  0x3d   : > { %5577 = vset.pattern.permute.xlu0 %v5680_v25 }
  0x3e   : > { %5268 = vmatmul.mubr.msk.bf16.vlgmr.msra.gmra.mrb[16].mxu0 %vm344_vm1, %v5753_v5  ;;  %2094 = vperm.xlu0 %5577, %v5797_v16  }
  0x3f   : > { %5286 = vmatmul.mubr.msk.bf16.vlgmr.msra.gmra.mrb[16].mxu1 %vm344_vm1, %v5753_v5  ;;  %5302 = vmatpush3.bf16.msra.mxu0 %v5605_v12 }
  0x40   : > { %5271 = vmatprep.mubr.msk.bf16.mxu0 %vm344_vm1, %v5761_v7  ;;  %5289 = vmatprep.mubr.msk.bf16.mxu1 %vm344_vm1, %v5761_v7 }
  0x41   : > { %5320 = vmatpush3.bf16.msra.mxu1 %v5606_v13  ;;  %5337 = vmatprep.subr.bf16.mxu0 %v5607_v21 }
  0x42   : > { %5355 = vmatprep.subr.bf16.mxu1 %v5608_v24  ;;  %5575 = vset.pattern.permute.xlu1 %v5679_v23 }
  0x43   : > { %1825 = vperm.xlu1 %5575, %v5797_v16   ;;  %5579 = vset.pattern.permute.xlu0 %v5683_v30 }
  0x44   : > { %2628 = vperm.xlu0 %5579, %v5789_v14  }
  0x46   : > { %5272 = vmatmul.mubr.msk.bf16.gmra.mrb[20].mxu0 %vm344_vm1, %v5773_v10 }
  0x47   : > { %5290 = vmatmul.mubr.msk.bf16.gmra.mrb[20].mxu1 %vm344_vm1, %v5773_v10  ;;  %5275 = vmatprep.mubr.msk.bf16.mxu0 %vm344_vm1, %v5776_v11 }
  0x48   : > { %5293 = vmatprep.mubr.msk.bf16.mxu1 %vm344_vm1, %v5776_v11  ;;  %5576 = vset.pattern.permute.xlu1 %v5680_v25 }
  0x49   : > { %2090 = vperm.xlu1 %5576, %v5789_v14   ;;  %5582 = vset.pattern.permute.xlu0 %v5684_v31 }
  0x4a   : > { %2901 = vperm.xlu0 %5582, %v5797_v16  }
  0x4d   : > { %5578 = vset.pattern.permute.xlu1 %v5681_v26 }
  0x4e   : > { %5276 = vmatmul.mubr.msk.bf16.gmra.mrb[24].mxu0 %vm344_vm1, %v5792_v15  ;;  %2359 = vperm.xlu1 %5578, %v5789_v14  }
  0x4f   : > { %5294 = vmatmul.mubr.msk.bf16.gmra.mrb[24].mxu1 %vm344_vm1, %v5792_v15  ;;  %5279 = vmatprep.mubr.msk.bf16.mxu0 %vm344_vm1, %v5800_v17 }
  0x50   : > { %5297 = vmatprep.mubr.msk.bf16.mxu1 %vm344_vm1, %v5800_v17  ;;  %5584 = vset.pattern.permute.xlu0 %v5687_v38 }
  0x51   : > { %3435 = vperm.xlu0 %5584, %v5789_v14  }
  0x52   : > { %2363 = vperm.xlu1 %5578, %v5797_v16  }
  0x55   : > { %5587 = vset.pattern.permute.xlu0 %v5688_v41 }
  0x56   : > { %5280 = vmatmul.mubr.msk.bf16.gmra.mrb[28].mxu0 %vm344_vm1, %v5813_v19  ;;  %5580 = vset.pattern.permute.xlu1 %v5683_v30 }
  0x57   : > { %5298 = vmatmul.mubr.msk.bf16.gmra.mrb[28].mxu1 %vm344_vm1, %v5813_v19  ;;  %5303 = vmatprep.mubr.msk.bf16.mxu0 %vm344_vm1, %v5750_v3 }
  0x58   : > { %5321 = vmatprep.mubr.msk.bf16.mxu1 %vm344_vm1, %v5750_v3  ;;  %2632 = vperm.xlu1 %5580, %v5797_v16  }
  0x59   : > { %3708 = vperm.xlu0 %5587, %v5797_v16  }
  0x5c   : > { %5581 = vset.pattern.permute.xlu1 %v5684_v31 }
  0x5d   : > { %2897 = vperm.xlu1 %5581, %v5789_v14  }
  0x5e   : > { %5304 = vmatmul.mubr.msk.bf16.vlgmr.msra.gmra.mrb[32].mxu0 %vm344_vm1, %v5753_v5 }
  0x5f   : > { %5322 = vmatmul.mubr.msk.bf16.vlgmr.msra.gmra.mrb[32].mxu1 %vm344_vm1, %v5753_v5  ;;  %5338 = vmatpush3.bf16.msra.mxu0 %v5607_v21 }
  0x60   : > { %5307 = vmatprep.mubr.msk.bf16.mxu0 %vm344_vm1, %v5761_v7  ;;  %5325 = vmatprep.mubr.msk.bf16.mxu1 %vm344_vm1, %v5761_v7 }
  0x61   : > { %5356 = vmatpush3.bf16.msra.mxu1 %v5608_v24  ;;  %5373 = vmatprep.subr.bf16.mxu0 %v5609_v27 }
  0x62   : > { %5391 = vmatprep.subr.bf16.mxu1 %v5610_v28  ;;  %5583 = vset.pattern.permute.xlu1 %v5685_v36 }
  0x63   : > { %3166 = vperm.xlu1 %5583, %v5789_v14  }
  0x66   : > { %5308 = vmatmul.mubr.msk.bf16.gmra.mrb[36].mxu0 %vm344_vm1, %v5773_v10 }
  0x67   : > { %5326 = vmatmul.mubr.msk.bf16.gmra.mrb[36].mxu1 %vm344_vm1, %v5773_v10  ;;  %5311 = vmatprep.mubr.msk.bf16.mxu0 %vm344_vm1, %v5776_v11 }
  0x68   : > { %5329 = vmatprep.mubr.msk.bf16.mxu1 %vm344_vm1, %v5776_v11  ;;  %3170 = vperm.xlu1 %5583, %v5797_v16  }
  0x6c   : > { %5585 = vset.pattern.permute.xlu1 %v5687_v38 }
  0x6d   : > { %3439 = vperm.xlu1 %5585, %v5797_v16  }
  0x6e   : > { %5312 = vmatmul.mubr.msk.bf16.gmra.mrb[40].mxu0 %vm344_vm1, %v5792_v15 }
  0x6f   : > { %5330 = vmatmul.mubr.msk.bf16.gmra.mrb[40].mxu1 %vm344_vm1, %v5792_v15  ;;  %5315 = vmatprep.mubr.msk.bf16.mxu0 %vm344_vm1, %v5800_v17 }
  0x70   : > { %5333 = vmatprep.mubr.msk.bf16.mxu1 %vm344_vm1, %v5800_v17 }
  0x71   : > { %5586 = vset.pattern.permute.xlu1 %v5688_v41 }
  0x72   : > { %3704 = vperm.xlu1 %5586, %v5789_v14  }
  0x76   : > { %5316 = vmatmul.mubr.msk.bf16.gmra.mrb[44].mxu0 %vm344_vm1, %v5813_v19  ;;  %5588 = vset.pattern.permute.xlu1 %v5689_v44 }
  0x77   : > { %5334 = vmatmul.mubr.msk.bf16.gmra.mrb[44].mxu1 %vm344_vm1, %v5813_v19  ;;  %5339 = vmatprep.mubr.msk.bf16.mxu0 %vm344_vm1, %v5750_v3 }
  0x78   : > { %5357 = vmatprep.mubr.msk.bf16.mxu1 %vm344_vm1, %v5750_v3  ;;  %3973 = vperm.xlu1 %5588, %v5789_v14  }
  0x7c   : > { %3977 = vperm.xlu1 %5588, %v5797_v16  }
  0x7e   : > { %5340 = vmatmul.mubr.msk.bf16.vlgmr.msra.gmra.mrb[48].mxu0 %vm344_vm1, %v5753_v5 }
  0x7f   : > { %5358 = vmatmul.mubr.msk.bf16.vlgmr.msra.gmra.mrb[48].mxu1 %vm344_vm1, %v5753_v5  ;;  %5374 = vmatpush3.bf16.msra.mxu0 %v5609_v27 }
  0x80   : > { %5343 = vmatprep.mubr.msk.bf16.mxu0 %vm344_vm1, %v5761_v7  ;;  %5361 = vmatprep.mubr.msk.bf16.mxu1 %vm344_vm1, %v5761_v7 }
  0x81   : > { %5392 = vmatpush3.bf16.msra.mxu1 %v5610_v28  ;;  %5409 = vmatprep.subr.bf16.mxu0 %v5611_v32  ;;  %v498_v28 = vld [vmem:[#allocation2 + $0x30] sm:$0xff] }
  0x82   : > { %5427 = vmatprep.subr.bf16.mxu1 %v5612_v33 }
  0x86   : > { %5344 = vmatmul.mubr.msk.bf16.gmra.mrb[52].mxu0 %vm344_vm1, %v5773_v10 }
  0x87   : > { %5362 = vmatmul.mubr.msk.bf16.gmra.mrb[52].mxu1 %vm344_vm1, %v5773_v10  ;;  %5347 = vmatprep.mubr.msk.bf16.mxu0 %vm344_vm1, %v5776_v11 }
  0x88   : > { %5365 = vmatprep.mubr.msk.bf16.mxu1 %vm344_vm1, %v5776_v11 }
  0x8e   : > { %5348 = vmatmul.mubr.msk.bf16.gmra.mrb[56].mxu0 %vm344_vm1, %v5792_v15 }
  0x8f   : > { %5366 = vmatmul.mubr.msk.bf16.gmra.mrb[56].mxu1 %vm344_vm1, %v5792_v15  ;;  %5351 = vmatprep.mubr.msk.bf16.mxu0 %vm344_vm1, %v5800_v17 }
  0x90   : > { %5369 = vmatprep.mubr.msk.bf16.mxu1 %vm344_vm1, %v5800_v17 }
  0x96   : > { %5352 = vmatmul.mubr.msk.bf16.gmra.mrb[60].mxu0 %vm344_vm1, %v5813_v19 }
  0x97   : > { %5370 = vmatmul.mubr.msk.bf16.gmra.mrb[60].mxu1 %vm344_vm1, %v5813_v19  ;;  %5375 = vmatprep.mubr.msk.bf16.mxu0 %vm344_vm1, %v5750_v3 }
  0x98   : > { %5393 = vmatprep.mubr.msk.bf16.mxu1 %vm344_vm1, %v5750_v3 }
  0x9e   : > { %5376 = vmatmul.mubr.msk.bf16.vlgmr.msra.gmra.mrb[64].mxu0 %vm344_vm1, %v5753_v5 }
  0x9f   : > { %5394 = vmatmul.mubr.msk.bf16.vlgmr.msra.gmra.mrb[64].mxu1 %vm344_vm1, %v5753_v5  ;;  %5410 = vmatpush3.bf16.msra.mxu0 %v5611_v32 }
  0xa0   : > { %5379 = vmatprep.mubr.msk.bf16.mxu0 %vm344_vm1, %v5761_v7  ;;  %5397 = vmatprep.mubr.msk.bf16.mxu1 %vm344_vm1, %v5761_v7 }
  0xa1   : > { %5428 = vmatpush3.bf16.msra.mxu1 %v5612_v33  ;;  %5445 = vmatprep.subr.bf16.mxu0 %v5613_v34  ;;  %v6048_v42 = vpop.permute.xlu0 %468 }
  0xa2   : > { %5463 = vmatprep.subr.bf16.mxu1 %v5614_v35  ;;  %v6050_v43 = vpop.permute.xlu1 %745 }
  0xa5   : > { %v6059_v45 = vpop.permute.xlu0 %473 }
  0xa6   : > { %5380 = vmatmul.mubr.msk.bf16.gmra.mrb[68].mxu0 %vm344_vm1, %v5773_v10 }
  0xa7   : > { %5398 = vmatmul.mubr.msk.bf16.gmra.mrb[68].mxu1 %vm344_vm1, %v5773_v10  ;;  %5383 = vmatprep.mubr.msk.bf16.mxu0 %vm344_vm1, %v5776_v11  ;;  %v6063_v48 = vpop.permute.xlu1 %749 }
  0xa8   : > { %5401 = vmatprep.mubr.msk.bf16.mxu1 %vm344_vm1, %v5776_v11 }
  0xae   : > { %5384 = vmatmul.mubr.msk.bf16.gmra.mrb[72].mxu0 %vm344_vm1, %v5792_v15 }
  0xaf   : > { %5402 = vmatmul.mubr.msk.bf16.gmra.mrb[72].mxu1 %vm344_vm1, %v5792_v15  ;;  %5387 = vmatprep.mubr.msk.bf16.mxu0 %vm344_vm1, %v5800_v17 }
  0xb0   : > { %5405 = vmatprep.mubr.msk.bf16.mxu1 %vm344_vm1, %v5800_v17 }
  0xb6   : > { %5388 = vmatmul.mubr.msk.bf16.gmra.mrb[76].mxu0 %vm344_vm1, %v5813_v19 }
  0xb7   : > { %5406 = vmatmul.mubr.msk.bf16.gmra.mrb[76].mxu1 %vm344_vm1, %v5813_v19  ;;  %5411 = vmatprep.mubr.msk.bf16.mxu0 %vm344_vm1, %v5750_v3 }
  0xb8   : > { %5429 = vmatprep.mubr.msk.bf16.mxu1 %vm344_vm1, %v5750_v3 }
  0xbe   : > { %5412 = vmatmul.mubr.msk.bf16.vlgmr.msra.gmra.mrb[80].mxu0 %vm344_vm1, %v5753_v5 }
  0xbf   : > { %5430 = vmatmul.mubr.msk.bf16.vlgmr.msra.gmra.mrb[80].mxu1 %vm344_vm1, %v5753_v5  ;;  %5446 = vmatpush3.bf16.msra.mxu0 %v5613_v34  ;;  %v496_v34 = vld [vmem:[#allocation2 + $0x20] sm:$0xff] }
  0xc0   : > { %5415 = vmatprep.mubr.msk.bf16.mxu0 %vm344_vm1, %v5761_v7  ;;  %5433 = vmatprep.mubr.msk.bf16.mxu1 %vm344_vm1, %v5761_v7 }
  0xc1   : > { %5464 = vmatpush3.bf16.msra.mxu1 %v5614_v35  ;;  %5481 = vmatprep.subr.bf16.mxu0 %v5615_v39 }
  0xc2   : > { %5499 = vmatprep.subr.bf16.mxu1 %v5616_v40 }
  0xc6   : > { %5416 = vmatmul.mubr.msk.bf16.gmra.mrb[84].mxu0 %vm344_vm1, %v5773_v10 }
  0xc7   : > { %5434 = vmatmul.mubr.msk.bf16.gmra.mrb[84].mxu1 %vm344_vm1, %v5773_v10  ;;  %5419 = vmatprep.mubr.msk.bf16.mxu0 %vm344_vm1, %v5776_v11 }
  0xc8   : > { %5437 = vmatprep.mubr.msk.bf16.mxu1 %vm344_vm1, %v5776_v11 }
  0xce   : > { %5420 = vmatmul.mubr.msk.bf16.gmra.mrb[88].mxu0 %vm344_vm1, %v5792_v15 }
  0xcf   : > { %5438 = vmatmul.mubr.msk.bf16.gmra.mrb[88].mxu1 %vm344_vm1, %v5792_v15  ;;  %5423 = vmatprep.mubr.msk.bf16.mxu0 %vm344_vm1, %v5800_v17 }
  0xd0   : > { %5441 = vmatprep.mubr.msk.bf16.mxu1 %vm344_vm1, %v5800_v17 }
  0xd6   : > { %5424 = vmatmul.mubr.msk.bf16.gmra.mrb[92].mxu0 %vm344_vm1, %v5813_v19 }
  0xd7   : > { %5442 = vmatmul.mubr.msk.bf16.gmra.mrb[92].mxu1 %vm344_vm1, %v5813_v19  ;;  %5447 = vmatprep.mubr.msk.bf16.mxu0 %vm344_vm1, %v5750_v3 }
  0xd8   : > { %5465 = vmatprep.mubr.msk.bf16.mxu1 %vm344_vm1, %v5750_v3 }
  0xde   : > { %5448 = vmatmul.mubr.msk.bf16.vlgmr.msra.gmra.mrb[96].mxu0 %vm344_vm1, %v5753_v5 }
  0xdf   : > { %5466 = vmatmul.mubr.msk.bf16.vlgmr.msra.gmra.mrb[96].mxu1 %vm344_vm1, %v5753_v5  ;;  %5482 = vmatpush3.bf16.msra.mxu0 %v5615_v39 }
  0xe0   : > { %5451 = vmatprep.mubr.msk.bf16.mxu0 %vm344_vm1, %v5761_v7  ;;  %5469 = vmatprep.mubr.msk.bf16.mxu1 %vm344_vm1, %v5761_v7 }
  0xe1   : > { %5500 = vmatpush3.bf16.msra.mxu1 %v5616_v40 }
  0xe6   : > { %5452 = vmatmul.mubr.msk.bf16.gmra.mrb[100].mxu0 %vm344_vm1, %v5773_v10 }
  0xe7   : > { %5470 = vmatmul.mubr.msk.bf16.gmra.mrb[100].mxu1 %vm344_vm1, %v5773_v10  ;;  %5455 = vmatprep.mubr.msk.bf16.mxu0 %vm344_vm1, %v5776_v11 }
  0xe8   : > { %5473 = vmatprep.mubr.msk.bf16.mxu1 %vm344_vm1, %v5776_v11 }
  0xee   : > { %5456 = vmatmul.mubr.msk.bf16.gmra.mrb[104].mxu0 %vm344_vm1, %v5792_v15 }
  0xef   : > { %5474 = vmatmul.mubr.msk.bf16.gmra.mrb[104].mxu1 %vm344_vm1, %v5792_v15  ;;  %5459 = vmatprep.mubr.msk.bf16.mxu0 %vm344_vm1, %v5800_v17 }
  0xf0   : > { %5477 = vmatprep.mubr.msk.bf16.mxu1 %vm344_vm1, %v5800_v17 }
  0xf1   : > { %v5233_v46 = vpop.f32.mrb[0].mxu0 }
  0xf2   : > { %v478_v49 = vmul.f32 %v5233_v46, %v6048_v42  ;;  %v403_v50 = vpop.f32.mrb[1].mxu0  ;;  %v5251_v52 = vpop.f32.mrb[0].mxu1 }
  0xf3   : > { %v476_v53 = vmul.f32 %v6048_v42, %v403_v50  ;;  %v5234_v54 = vpop.f32.mrb[2].mxu0  ;;  %v6069_v56 = vmul.f32 %v5251_v52, %v6050_v43  ;;  %v681_v57 = vpop.f32.mrb[1].mxu1 }
  0xf4   : > { %v510_v58 = vmax.f32 %v494_v47, %v478_v49  ;;  %v550_v59 = vsel %vm260_vm2, %v478_v49, -inf  ;;  %v479_v60 = vmul.f32 %v5234_v54, %v6059_v45  ;;  %v406_v61 = vpop.f32.mrb[3].mxu0  ;;  %v6074_v63 = vmul.f32 %v6050_v43, %v681_v57  ;;  %v5252_v0 = vpop.f32.mrb[2].mxu1 }
  0xf5   : > { %v508_v1 = vmax.f32 %v492_v51, %v476_v53  ;;  %v541_v2 = vsel %vm260_vm2, %v476_v53, -inf  ;;  %v826_v4 = vsel %vm260_vm2, %v6069_v56, -inf  ;;  %v477_v6 = vmul.f32 %v6059_v45, %v406_v61  ;;  %v684_v8 = vpop.f32.mrb[3].mxu1 }
  0xf6   : > { %526 = vst.msk [vmem:[#allocation2 + $0x10] sm:$0xff] %vm260_vm2, %v510_v58  ;;  %v511_v9 = vmax.f32 %v495_v55, %v479_v60  ;;  %v551_v12 = vsel %vm260_vm2, %v479_v60, -inf  ;;  %v817_v13 = vsel %vm260_vm2, %v6074_v63, -inf  ;;  %v6085_v14 = vmul.f32 %v5252_v0, %v6063_v48  ;;  %5460 = vmatmul.mubr.msk.bf16.gmra.mrb[108].mxu0 %vm344_vm1, %v5813_v19 }
  0xf7   : > { %524 = vst.msk [vmem:[#allocation2] sm:$0xff] %vm260_vm2, %v508_v1  ;;  %v552_v16 = vmax.f32 %v550_v59, %v551_v12  ;;  %v509_v18 = vmax.f32 %v493_v62, %v477_v6  ;;  %v542_v20 = vsel %vm260_vm2, %v477_v6, -inf  ;;  %v6092_v21 = vmul.f32 %v6063_v48, %v684_v8  ;;  %5478 = vmatmul.mubr.msk.bf16.gmra.mrb[108].mxu1 %vm344_vm1, %v5813_v19 }
  0xf8   : > { %5483 = vmatprep.mubr.msk.bf16.mxu0 %vm344_vm1, %v5750_v3  ;;  %527 = vst.msk [vmem:[#allocation2 + $0x18] sm:$0xff] %vm260_vm2, %v511_v9  ;;  %v543_v22 = vmax.f32 %v541_v2, %v542_v20  ;;  %v827_v23 = vsel %vm260_vm2, %v6085_v14, -inf  ;;  %5501 = vmatprep.mubr.msk.bf16.mxu1 %vm344_vm1, %v5750_v3 }
  0xf9   : > { %v553_v24 = vrot.slane %v552_v16, 4  ;;  %525 = vst.msk [vmem:[#allocation2 + $0x8] sm:$0xff] %vm260_vm2, %v509_v18  ;;  %v828_v25 = vmax.f32 %v826_v4, %v827_v23  ;;  %v818_v26 = vsel %vm260_vm2, %v6092_v21, -inf  ;;  %v5237_v27 = vpop.f32.mrb[4].mxu0 }
  0xfa   : > { %v544_v29 = vrot.slane %v543_v22, 4  ;;  %v819_v30 = vmax.f32 %v817_v13, %v818_v26  ;;  %v482_v31 = vmul.f32 %v5237_v27, %v6048_v42  ;;  %v5255_v32 = vpop.f32.mrb[4].mxu1  ;;  %v419_v33 = vpop.f32.mrb[5].mxu0 }
  0xfb   : > { %v554_v35 = vmax.f32 %v552_v16, %v553_v24  ;;  %v829_v36 = vrot.slane %v828_v25, 4  ;;  %v6108_v3 = vmul.f32 %v5255_v32, %v6050_v43  ;;  %v480_v37 = vmul.f32 %v6048_v42, %v419_v33  ;;  %v697_v38 = vpop.f32.mrb[5].mxu1  ;;  %v5238_v39 = vpop.f32.mrb[6].mxu0 }
  0xfc   : > { %v545_v40 = vmax.f32 %v543_v22, %v544_v29  ;;  %v820_v41 = vrot.slane %v819_v30, 4  ;;  %v514_v44 = vmax.f32 %v498_v28, %v482_v31  ;;  %v568_v46 = vsel %vm260_vm2, %v482_v31, -inf  ;;  %v5256_v47 = vpop.f32.mrb[6].mxu1  ;;  %v422_v49 = vpop.f32.mrb[7].mxu0 }
  0xfd   : > { %v555_v50 = vrot.slane %v554_v35, 2  ;;  %v770_v51 = vld [vmem:[#allocation2 + $0x10] sm:$0xff]  ;;  %v830_v52 = vmax.f32 %v828_v25, %v829_v36  ;;  %v844_v53 = vsel %vm260_vm2, %v6108_v3, -inf  ;;  %v512_v54 = vmax.f32 %v496_v34, %v480_v37  ;;  %v700_v55 = vpop.f32.mrb[7].mxu1 }
  0xfe   : > { %v786_v57 = vmax.f32 %v770_v51, %v6069_v56  ;;  %v546_v58 = vrot.slane %v545_v40, 2  ;;  %v768_v59 = vld [vmem:[#allocation2] sm:$0xff]  ;;  %v821_v60 = vmax.f32 %v819_v30, %v820_v41  ;;  %530 = vst.msk [vmem:[#allocation2 + $0x30] sm:$0xff] %vm260_vm2, %v514_v44  ;;  %v6117_v61 = vsel %vm260_vm2, %v480_v37, -inf  ;;  %5484 = vmatmul.mubr.msk.bf16.vlgmr.msra.gmra.mrb[112].mxu0 %vm344_vm1, %v5753_v5  ;;  %v499_v56 = vld [vmem:[#allocation2 + $0x38] sm:$0xff] }
  0xff   : > { %v556_v62 = vmax.f32 %v554_v35, %v555_v50  ;;  %v784_v0 = vmax.f32 %v768_v59, %v6074_v63  ;;  %v831_v1 = vrot.slane %v830_v52, 2  ;;  %528 = vst.msk [vmem:[#allocation2 + $0x20] sm:$0xff] %vm260_vm2, %v512_v54  ;;  %v6124_v2 = vmul.f32 %v6050_v43, %v697_v38  ;;  %5502 = vmatmul.mubr.msk.bf16.vlgmr.msra.gmra.mrb[112].mxu1 %vm344_vm1, %v5753_v5  ;;  %v497_v35 = vld [vmem:[#allocation2 + $0x28] sm:$0xff] }
 0x100   : > { %5487 = vmatprep.mubr.msk.bf16.mxu0 %vm344_vm1, %v5761_v7  ;;  %802 = vst.msk [vmem:[#allocation2 + $0x10] sm:$0xff] %vm260_vm2, %v786_v57  ;;  %v547_v4 = vmax.f32 %v545_v40, %v546_v58  ;;  %v769_v6 = vld [vmem:[#allocation2 + $0x8] sm:$0xff]  ;;  %v822_v8 = vrot.slane %v821_v60, 2  ;;  %v483_v63 = vmul.f32 %v5238_v39, %v6059_v45  ;;  %v6133_v9 = vmul.f32 %v5256_v47, %v6063_v48 }
 0x101   : > { %5505 = vmatprep.mubr.msk.bf16.mxu1 %vm344_vm1, %v5761_v7  ;;  %v557_v12 = vrot.slane %v556_v62, 1  ;;  %800 = vst.msk [vmem:[#allocation2] sm:$0xff] %vm260_vm2, %v784_v0  ;;  %v785_v5 = vmax.f32 %v769_v6, %v6092_v21  ;;  %v832_v13 = vmax.f32 %v830_v52, %v831_v1  ;;  %v835_v16 = vsel %vm260_vm2, %v6124_v2, -inf  ;;  %v5241_v18 = vpop.f32.mrb[8].mxu0 }
 0x102   : > { %v548_v20 = vrot.slane %v547_v4, 1  ;;  %v823_v22 = vmax.f32 %v821_v60, %v822_v8  ;;  %v515_v23 = vmax.f32 %v499_v56, %v483_v63  ;;  %v569_v24 = vsel %vm260_vm2, %v483_v63, -inf  ;;  %v5259_v25 = vpop.f32.mrb[8].mxu1  ;;  %v435_v26 = vpop.f32.mrb[9].mxu0  ;;  %v500_v63 = vld [vmem:[#allocation2 + $0x40] sm:$0xff] }
 0x103   : > { %v558_v27 = vmax.f32 %v556_v62, %v557_v12  ;;  %801 = vst.msk [vmem:[#allocation2 + $0x8] sm:$0xff] %vm260_vm2, %v785_v5  ;;  %v833_v7 = vrot.slane %v832_v13, 1  ;;  %v570_v28 = vmax.f32 %v568_v46, %v569_v24  ;;  %v845_v21 = vsel %vm260_vm2, %v6133_v9, -inf  ;;  %v713_v29 = vpop.f32.mrb[9].mxu1  ;;  %v5242_v30 = vpop.f32.mrb[10].mxu0 }
 0x104   : > { %v549_v31 = vmax.f32 %v547_v4, %v548_v20  ;;  %v824_v32 = vrot.slane %v823_v22, 1  ;;  %531 = vst.msk [vmem:[#allocation2 + $0x38] sm:$0xff] %vm260_vm2, %v515_v23  ;;  %v846_v33 = vmax.f32 %v844_v53, %v845_v21  ;;  %v481_v34 = vmul.f32 %v6059_v45, %v422_v49  ;;  %v6147_v36 = vpop.f32.mrb[10].mxu1  ;;  %v6149_v37 = vpop.f32.mrb[11].mxu0  ;;  %v502_v53 = vld [vmem:[#allocation2 + $0x50] sm:$0xff] }
 0x105   : > { %v834_v38 = vmax.f32 %v832_v13, %v833_v7  ;;  %v774_v39 = vld [vmem:[#allocation2 + $0x30] sm:$0xff]  ;;  %v571_v40 = vrot.slane %v570_v28, 4  ;;  %v6152_v41 = vmul.f32 %v6063_v48, %v700_v55  ;;  %v486_v44 = vmul.f32 %v5241_v18, %v6048_v42  ;;  %v6155_v46 = vpop.f32.mrb[11].mxu1 }
 0x106   : > { %v6158_v47 = vsel %vm621_vm3, %v558_v27, %v549_v31  ;;  %v825_v50 = vmax.f32 %v823_v22, %v824_v32  ;;  %v790_v49 = vmax.f32 %v774_v39, %v6108_v3  ;;  %v772_v51 = vld [vmem:[#allocation2 + $0x20] sm:$0xff]  ;;  %v847_v52 = vrot.slane %v846_v33, 4  ;;  %5488 = vmatmul.mubr.msk.bf16.gmra.mrb[116].mxu0 %vm344_vm1, %v5773_v10  ;;  %v503_v22 = vld [vmem:[#allocation2 + $0x58] sm:$0xff] }
 0x107   : > { %v788_v54 = vmax.f32 %v772_v51, %v6124_v2  ;;  %v572_v55 = vmax.f32 %v570_v28, %v571_v40  ;;  %v513_v57 = vmax.f32 %v497_v35, %v481_v34  ;;  %v560_v58 = vsel %vm260_vm2, %v481_v34, -inf  ;;  %5506 = vmatmul.mubr.msk.bf16.gmra.mrb[116].mxu1 %vm344_vm1, %v5773_v10  ;;  %5491 = vmatprep.mubr.msk.bf16.mxu0 %vm344_vm1, %v5776_v11 }
 0x108   : > { %v6170_v3 = vsel %vm621_vm3, %v834_v38, %v825_v50  ;;  %806 = vst.msk [vmem:[#allocation2 + $0x30] sm:$0xff] %vm260_vm2, %v790_v49  ;;  %v848_v59 = vmax.f32 %v846_v33, %v847_v52  ;;  %v561_v60 = vmax.f32 %v6117_v61, %v560_v58  ;;  %v836_v62 = vsel %vm260_vm2, %v6152_v41, -inf  ;;  %5509 = vmatprep.mubr.msk.bf16.mxu1 %vm344_vm1, %v5776_v11  ;;  %v501_v49 = vld [vmem:[#allocation2 + $0x48] sm:$0xff] }
 0x109   : > { %804 = vst.msk [vmem:[#allocation2 + $0x20] sm:$0xff] %vm260_vm2, %v788_v54  ;;  %v573_v10 = vrot.slane %v572_v55, 2  ;;  %529 = vst.msk [vmem:[#allocation2 + $0x28] sm:$0xff] %vm260_vm2, %v513_v57  ;;  %v837_v0 = vmax.f32 %v835_v16, %v836_v62  ;;  %v518_v1 = vmax.f32 %v502_v53, %v486_v44  ;;  %v586_v2 = vsel %vm260_vm2, %v486_v44, -inf  ;;  %v6181_v56 = vpop.f32.mrb[12].mxu0 }
 0x10a   : > { %v849_v4 = vrot.slane %v848_v59, 2  ;;  %v562_v6 = vrot.slane %v561_v60, 4  ;;  %v6184_v61 = vmul.f32 %v5259_v25, %v6050_v43  ;;  %v484_v8 = vmul.f32 %v6048_v42, %v435_v26  ;;  %v6187_v11 = vpop.f32.mrb[12].mxu1  ;;  %v6189_v12 = vpop.f32.mrb[13].mxu0 }
 0x10b   : > { %v574_v5 = vmax.f32 %v572_v55, %v573_v10  ;;  %v775_v13 = vld [vmem:[#allocation2 + $0x38] sm:$0xff]  ;;  %v838_v16 = vrot.slane %v837_v0, 4  ;;  %534 = vst.msk [vmem:[#allocation2 + $0x50] sm:$0xff] %vm260_vm2, %v518_v1  ;;  %v6193_v18 = vmul.f32 %v6050_v43, %v713_v29  ;;  %v487_v20 = vmul.f32 %v5242_v30, %v6059_v45  ;;  %v6196_v23 = vpop.f32.mrb[13].mxu1  ;;  %v6198_v24 = vpop.f32.mrb[14].mxu0 }
 0x10c   : > { %v791_v25 = vmax.f32 %v775_v13, %v6133_v9  ;;  %v850_v26 = vmax.f32 %v848_v59, %v849_v4  ;;  %v563_v27 = vmax.f32 %v561_v60, %v562_v6  ;;  %v862_v7 = vsel %vm260_vm2, %v6184_v61, -inf  ;;  %v6203_v28 = vpop.f32.mrb[14].mxu1  ;;  %v6205_v21 = vpop.f32.mrb[15].mxu0 }
 0x10d   : > { %v575_v29 = vrot.slane %v574_v5, 1  ;;  %v839_v31 = vmax.f32 %v837_v0, %v838_v16  ;;  %v516_v30 = vmax.f32 %v500_v63, %v484_v8  ;;  %v577_v32 = vsel %vm260_vm2, %v484_v8, -inf  ;;  %v6208_v33 = vpop.f32.mrb[15].mxu1 }
 0x10e   : > { %807 = vst.msk [vmem:[#allocation2 + $0x38] sm:$0xff] %vm260_vm2, %v791_v25  ;;  %v851_v9 = vrot.slane %v850_v26, 1  ;;  %v564_v34 = vrot.slane %v563_v27, 2  ;;  %v853_v35 = vsel %vm260_vm2, %v6193_v18, -inf  ;;  %v519_v38 = vmax.f32 %v503_v22, %v487_v20  ;;  %5492 = vmatmul.mubr.msk.bf16.gmra.mrb[120].mxu0 %vm344_vm1, %v5792_v15 }
 0x10f   : > { %v576_v39 = vmax.f32 %v574_v5, %v575_v29  ;;  %v840_v40 = vrot.slane %v839_v31, 2  ;;  %532 = vst.msk [vmem:[#allocation2 + $0x40] sm:$0xff] %vm260_vm2, %v516_v30  ;;  %v587_v44 = vsel %vm260_vm2, %v487_v20, -inf  ;;  %v6219_v50 = vmul.f32 %v6147_v36, %v6063_v48  ;;  %5510 = vmatmul.mubr.msk.bf16.gmra.mrb[120].mxu1 %vm344_vm1, %v5792_v15  ;;  %5495 = vmatprep.mubr.msk.bf16.mxu0 %vm344_vm1, %v5800_v17 }
 0x110   : > { %v852_v51 = vmax.f32 %v850_v26, %v851_v9  ;;  %v565_v52 = vmax.f32 %v563_v27, %v564_v34  ;;  %v773_v53 = vld [vmem:[#allocation2 + $0x28] sm:$0xff]  ;;  %535 = vst.msk [vmem:[#allocation2 + $0x58] sm:$0xff] %vm260_vm2, %v519_v38  ;;  %v588_v54 = vmax.f32 %v586_v2, %v587_v44  ;;  %v485_v55 = vmul.f32 %v6059_v45, %v6149_v37  ;;  %v506_v34 = vld [vmem:[#allocation2 + $0x70] sm:$0xff] }
 0x111   : > { %5513 = vmatprep.mubr.msk.bf16.mxu1 %vm344_vm1, %v5800_v17  ;;  %v789_v36 = vmax.f32 %v773_v53, %v6152_v41  ;;  %v841_v57 = vmax.f32 %v839_v31, %v840_v40  ;;  %v863_v15 = vsel %vm260_vm2, %v6219_v50, -inf  ;;  %v6235_v58 = vmul.f32 %v6063_v48, %v6155_v46  ;;  %v6237_v59 = vpop.f32.mrb[16].mxu0 }
 0x112   : > { %v566_v60 = vrot.slane %v565_v52, 1  ;;  %v778_v62 = vld [vmem:[#allocation2 + $0x50] sm:$0xff]  ;;  %v589_v10 = vrot.slane %v588_v54, 4  ;;  %v864_v0 = vmax.f32 %v862_v7, %v863_v15  ;;  %v517_v37 = vmax.f32 %v501_v49, %v485_v55  ;;  %v6239_v1 = vpop.f32.mrb[17].mxu0  ;;  %v6241_v17 = vpop.f32.mrb[16].mxu1 }
 0x113   : > { %805 = vst.msk [vmem:[#allocation2 + $0x28] sm:$0xff] %vm260_vm2, %v789_v36  ;;  %v842_v41 = vrot.slane %v841_v57, 1  ;;  %v794_v2 = vmax.f32 %v778_v62, %v6184_v61  ;;  %v578_v4 = vsel %vm260_vm2, %v485_v55, -inf  ;;  %v854_v46 = vsel %vm260_vm2, %v6235_v58, -inf  ;;  %v6248_v6 = vpop.f32.mrb[18].mxu0  ;;  %v6250_v8 = vpop.f32.mrb[17].mxu1 }
 0x114   : > { %v567_v63 = vmax.f32 %v565_v52, %v566_v60  ;;  %v590_v5 = vmax.f32 %v588_v54, %v589_v10  ;;  %v865_v13 = vrot.slane %v864_v0, 4  ;;  %533 = vst.msk [vmem:[#allocation2 + $0x48] sm:$0xff] %vm260_vm2, %v517_v37  ;;  %v579_v16 = vmax.f32 %v577_v32, %v578_v4  ;;  %v6253_v20 = vpop.f32.mrb[19].mxu0  ;;  %v6255_v22 = vpop.f32.mrb[18].mxu1 }
 0x115   : > { %v843_v61 = vmax.f32 %v841_v57, %v842_v41  ;;  %810 = vst.msk [vmem:[#allocation2 + $0x50] sm:$0xff] %vm260_vm2, %v794_v2  ;;  %v855_v25 = vmax.f32 %v853_v35, %v854_v46  ;;  %v490_v26 = vmul.f32 %v6181_v56, %v6048_v42  ;;  %v6262_v27 = vmul.f32 %v6187_v11, %v6050_v43  ;;  %v6264_v7 = vpop.f32.mrb[19].mxu1  ;;  %v504_v57 = vld [vmem:[#allocation2 + $0x60] sm:$0xff]  ;;  %v507_v41 = vld [vmem:[#allocation2 + $0x78] sm:$0xff] }
 0x116   : > { %v624_v29 = vsel %vm623_vm4, %v567_v63, %v6158_v47  ;;  %v776_v31 = vld [vmem:[#allocation2 + $0x40] sm:$0xff]  ;;  %v591_v30 = vrot.slane %v590_v5, 2  ;;  %v866_v32 = vmax.f32 %v864_v0, %v865_v13  ;;  %v580_v9 = vrot.slane %v579_v16, 4  ;;  %5496 = vmatmul.mubr.msk.bf16.gmra.mrb[124].mxu0 %vm344_vm1, %v5813_v19 }
 0x117   : > { %v898_v56 = vsel %vm623_vm4, %v843_v61, %v6170_v3  ;;  %v792_v35 = vmax.f32 %v776_v31, %v6193_v18  ;;  %v779_v11 = vld [vmem:[#allocation2 + $0x58] sm:$0xff]  ;;  %v6274_v38 = vsel %vm625_vm5, %v576_v39, %v624_v29  ;;  %v856_v40 = vrot.slane %v855_v25, 4  ;;  %5514 = vmatmul.mubr.msk.bf16.gmra.mrb[124].mxu1 %vm344_vm1, %v5813_v19  ;;  %v6314_v61 = vpop.permute.xlu0 %1014 }
 0x118   : > { %v592_v47 = vmax.f32 %v590_v5, %v591_v30  ;;  %v795_v44 = vmax.f32 %v779_v11, %v6219_v50  ;;  %v867_v49 = vrot.slane %v866_v32, 2  ;;  %v581_v52 = vmax.f32 %v579_v16, %v580_v9  ;;  %v505_v30 = vld [vmem:[#allocation2 + $0x68] sm:$0xff] }
 0x119   : > { %808 = vst.msk [vmem:[#allocation2 + $0x40] sm:$0xff] %vm260_vm2, %v792_v35  ;;  %v857_v53 = vmax.f32 %v855_v25, %v856_v40  ;;  %v6281_v3 = vsel %vm625_vm5, %v852_v51, %v898_v56  ;;  %v522_v18 = vmax.f32 %v506_v34, %v490_v26  ;;  %v604_v39 = vsel %vm260_vm2, %v490_v26, -inf  ;;  %v6284_v54 = vpop.f32.mrb[20].mxu0 }
 0x11a   : > { %v593_v55 = vrot.slane %v592_v47, 1  ;;  %811 = vst.msk [vmem:[#allocation2 + $0x58] sm:$0xff] %vm260_vm2, %v795_v44  ;;  %v868_v19 = vmax.f32 %v866_v32, %v867_v49  ;;  %v582_v36 = vrot.slane %v581_v52, 2  ;;  %v880_v50 = vsel %vm260_vm2, %v6262_v27, -inf  ;;  %v6289_v15 = vpop.f32.mrb[20].mxu1  ;;  %v6291_v60 = vpop.f32.mrb[21].mxu0 }
 0x11b   : > { %v777_v51 = vld [vmem:[#allocation2 + $0x48] sm:$0xff]  ;;  %v858_v62 = vrot.slane %v857_v53, 2  ;;  %538 = vst.msk [vmem:[#allocation2 + $0x70] sm:$0xff] %vm260_vm2, %v522_v18  ;;  %v488_v10 = vmul.f32 %v6048_v42, %v6189_v12  ;;  %v6298_v0 = vmul.f32 %v6050_v43, %v6196_v23  ;;  %v491_v37 = vmul.f32 %v6198_v24, %v6059_v45  ;;  %v6302_v2 = vpop.f32.mrb[21].mxu1  ;;  %v6304_v4 = vpop.f32.mrb[22].mxu0 }
 0x11c   : > { %v594_v46 = vmax.f32 %v592_v47, %v593_v55  ;;  %v869_v63 = vrot.slane %v868_v19, 1  ;;  %v583_v5 = vmax.f32 %v581_v52, %v582_v36  ;;  %v793_v13 = vmax.f32 %v777_v51, %v6235_v58  ;;  %v6307_v16 = vpop.f32.mrb[22].mxu1  ;;  %v6309_v42 = vpop.f32.mrb[23].mxu0 }
 0x11d   : > { %v859_v12 = vmax.f32 %v857_v53, %v858_v62  ;;  %v520_v43 = vmax.f32 %v504_v57, %v488_v10  ;;  %v595_v23 = vsel %vm260_vm2, %v488_v10, -inf  ;;  %v871_v24 = vsel %vm260_vm2, %v6298_v0, -inf  ;;  %v6316_v25 = vpop.f32.mrb[23].mxu1  ;;  %v6334_v47 = vpop.permute.xlu1 %1018 }
 0x11e   : > { %v870_v26 = vmax.f32 %v868_v19, %v869_v63  ;;  %v584_v29 = vrot.slane %v583_v5, 1  ;;  %809 = vst.msk [vmem:[#allocation2 + $0x48] sm:$0xff] %vm260_vm2, %v793_v13  ;;  %v523_v58 = vmax.f32 %v507_v41, %v491_v37  ;;  %v605_v31 = vsel %vm260_vm2, %v491_v37, -inf  ;;  %v1039_v41 = vld [vmem:[#allocation2 + $0x10] sm:$0xff] }
 0x11f   : > { %v860_v32 = vrot.slane %v859_v12, 1  ;;  %536 = vst.msk [vmem:[#allocation2 + $0x60] sm:$0xff] %vm260_vm2, %v520_v43  ;;  %v606_v9 = vmax.f32 %v604_v39, %v605_v31  ;;  %v6323_v34 = vmul.f32 %v6203_v28, %v6063_v48  ;;  %v489_v56 = vmul.f32 %v6059_v45, %v6205_v21 }
 0x120   : > { %v585_v35 = vmax.f32 %v583_v5, %v584_v29  ;;  %539 = vst.msk [vmem:[#allocation2 + $0x78] sm:$0xff] %vm260_vm2, %v523_v58  ;;  %v6330_v11 = vmul.f32 %v6063_v48, %v6208_v33  ;;  %v1023_v40 = vmul.f32 %v6237_v59, %v6314_v61  ;;  %v1021_v44 = vmul.f32 %v6314_v61, %v6239_v1 }
 0x121   : > { %v861_v28 = vmax.f32 %v859_v12, %v860_v32  ;;  %v607_v49 = vrot.slane %v606_v9, 4  ;;  %v881_v45 = vsel %vm260_vm2, %v6323_v34, -inf  ;;  %v521_v21 = vmax.f32 %v505_v30, %v489_v56  ;;  %v6340_v52 = vpop.f32.mrb[24].mxu0  ;;  %v6374_v30 = vpop.permute.xlu1 %1283 }
 0x122   : > { %v628_v48 = vsel %vm627_vm6, %v585_v35, %v6274_v38  ;;  %v782_v33 = vld [vmem:[#allocation2 + $0x70] sm:$0xff]  ;;  %v882_v53 = vmax.f32 %v880_v50, %v881_v45  ;;  %v596_v59 = vsel %vm260_vm2, %v489_v56, -inf  ;;  %v872_v18 = vsel %vm260_vm2, %v6330_v11, -inf  ;;  %v6347_v39 = vpop.f32.mrb[24].mxu1  ;;  %v6349_v1 = vpop.f32.mrb[25].mxu0 }
 0x123   : > { %v900_v55 = vsel %vm627_vm6, %v861_v28, %v6281_v3  ;;  %v798_v19 = vmax.f32 %v782_v33, %v6262_v27  ;;  %v608_v36 = vmax.f32 %v606_v9, %v607_v49  ;;  %537 = vst.msk [vmem:[#allocation2 + $0x68] sm:$0xff] %vm260_vm2, %v521_v21  ;;  %v597_v38 = vmax.f32 %v595_v23, %v596_v59  ;;  %v6355_v57 = vpop.f32.mrb[25].mxu1  ;;  %v6357_v50 = vpop.f32.mrb[26].mxu0  ;;  %v771_v3 = vld [vmem:[#allocation2 + $0x18] sm:$0xff]  ;;  %v1037_v23 = vld [vmem:[#allocation2] sm:$0xff] }
 0x124   : > { %v883_v51 = vrot.slane %v882_v53, 4  ;;  %v6360_v62 = vsel %vm629_vm7, %v594_v46, %v628_v48  ;;  %v873_v10 = vmax.f32 %v871_v24, %v872_v18  ;;  %v6363_v37 = vsel %vm629_vm7, %v870_v26, %v900_v55  ;;  %v6365_v63 = vpop.f32.mrb[26].mxu1  ;;  %v6367_v27 = vpop.f32.mrb[27].mxu0 }
 0x125   : > { %814 = vst.msk [vmem:[#allocation2 + $0x70] sm:$0xff] %vm260_vm2, %v798_v19  ;;  %v609_v5 = vrot.slane %v608_v36, 2  ;;  %v598_v13 = vrot.slane %v597_v38, 4  ;;  %v1055_v12 = vmax.f32 %v1039_v41, %v1023_v40  ;;  %v1095_v43 = vsel %vm260_vm2, %v1023_v40, -inf  ;;  %v6371_v46 = vpop.f32.mrb[27].mxu1  ;;  %v6379_v28 = vpop.permute.xlu0 %1287 }
 0x126   : > { %v780_v24 = vld [vmem:[#allocation2 + $0x60] sm:$0xff]  ;;  %v884_v29 = vmax.f32 %v882_v53, %v883_v51  ;;  %v874_v26 = vrot.slane %v873_v10, 4  ;;  %v1053_v58 = vmax.f32 %v1037_v23, %v1021_v44  ;;  %v1086_v31 = vsel %vm260_vm2, %v1021_v44, -inf }
 0x127   : > { %v796_v32 = vmax.f32 %v780_v24, %v6298_v0  ;;  %v610_v9 = vmax.f32 %v608_v36, %v609_v5  ;;  %v783_v56 = vld [vmem:[#allocation2 + $0x78] sm:$0xff]  ;;  %v599_v35 = vmax.f32 %v597_v38, %v598_v13  ;;  %1071 = vst.msk [vmem:[#allocation2 + $0x10] sm:$0xff] %vm260_vm2, %v1055_v12  ;;  %v787_v40 = vmax.f32 %v771_v3, %v6085_v14 }
 0x128   : > { %v799_v49 = vmax.f32 %v783_v56, %v6323_v34  ;;  %v885_v45 = vrot.slane %v884_v29, 2  ;;  %v875_v21 = vmax.f32 %v873_v10, %v874_v26  ;;  %1069 = vst.msk [vmem:[#allocation2] sm:$0xff] %vm260_vm2, %v1053_v58  ;;  %v6385_v44 = vmul.f32 %v6248_v6, %v6334_v47  ;;  %v1038_v10 = vld [vmem:[#allocation2 + $0x8] sm:$0xff] }
 0x129   : > { %812 = vst.msk [vmem:[#allocation2 + $0x60] sm:$0xff] %vm260_vm2, %v796_v32  ;;  %v611_v0 = vrot.slane %v610_v9, 1  ;;  %v600_v48 = vrot.slane %v599_v35, 2  ;;  %803 = vst.msk [vmem:[#allocation2 + $0x18] sm:$0xff] %vm260_vm2, %v787_v40  ;;  %v1022_v14 = vmul.f32 %v6334_v47, %v6253_v20  ;;  %v6393_v34 = vmul.f32 %v6241_v17, %v6374_v30  ;;  %v6395_v33 = vpop.f32.mrb[28].mxu0 }
 0x12a   : > { %815 = vst.msk [vmem:[#allocation2 + $0x78] sm:$0xff] %vm260_vm2, %v799_v49  ;;  %v886_v53 = vmax.f32 %v884_v29, %v885_v45  ;;  %v781_v6 = vld [vmem:[#allocation2 + $0x68] sm:$0xff]  ;;  %v876_v59 = vrot.slane %v875_v21, 2  ;;  %v1096_v18 = vsel %vm260_vm2, %v6385_v44, -inf  ;;  %v6402_v55 = vmul.f32 %v6255_v22, %v6379_v28  ;;  %v6404_v19 = vpop.f32.mrb[28].mxu1  ;;  %v6406_v20 = vpop.f32.mrb[29].mxu0 }
 0x12b   : > { %v612_v17 = vmax.f32 %v610_v9, %v611_v0  ;;  %v601_v36 = vmax.f32 %v599_v35, %v600_v48  ;;  %v797_v38 = vmax.f32 %v781_v6, %v6330_v11  ;;  %v1097_v51 = vmax.f32 %v1095_v43, %v1096_v18  ;;  %v6409_v41 = vpop.f32.mrb[29].mxu1  ;;  %v6411_v3 = vpop.f32.mrb[30].mxu0  ;;  %v540_v0 = vld [vmem:[#allocation3] sm:$0xff] }
 0x12c   : > { %v887_v5 = vrot.slane %v886_v53, 1  ;;  %v877_v13 = vmax.f32 %v875_v21, %v876_v59  ;;  %v1054_v12 = vmax.f32 %v1038_v10, %v1022_v14  ;;  %v1087_v22 = vsel %vm260_vm2, %v1022_v14, -inf  ;;  %v6414_v23 = vpop.f32.mrb[30].mxu1  ;;  %v6416_v24 = vpop.f32.mrb[31].mxu0 }
 0x12d   : > { %v602_v29 = vrot.slane %v601_v36, 1  ;;  %813 = vst.msk [vmem:[#allocation2 + $0x68] sm:$0xff] %vm260_vm2, %v797_v38  ;;  %v1098_v26 = vrot.slane %v1097_v51, 4  ;;  %v1088_v11 = vmax.f32 %v1086_v31, %v1087_v22  ;;  %v1364_v43 = vsel %vm260_vm2, %v6393_v34, -inf  ;;  %v6421_v58 = vpop.f32.mrb[31].mxu1 }
 0x12e   : > { %v888_v32 = vmax.f32 %v886_v53, %v887_v5  ;;  %v878_v9 = vrot.slane %v877_v13, 1  ;;  %1070 = vst.msk [vmem:[#allocation2 + $0x8] sm:$0xff] %vm260_vm2, %v1054_v12  ;;  %v1365_v56 = vsel %vm260_vm2, %v6402_v55, -inf  ;;  %v1290_v35 = vmul.f32 %v6374_v30, %v6250_v8 }
 0x12f   : > { %v603_v40 = vmax.f32 %v601_v36, %v602_v29  ;;  %v1099_v49 = vmax.f32 %v1097_v51, %v1098_v26  ;;  %v1089_v45 = vrot.slane %v1088_v11, 4  ;;  %v1366_v21 = vmax.f32 %v1364_v43, %v1365_v56  ;;  %v1306_v31 = vld [vmem:[#allocation2] sm:$0xff] }
 0x130   : > { %v879_v48 = vmax.f32 %v877_v13, %v878_v9  ;;  %v1040_v14 = vld [vmem:[#allocation2 + $0x18] sm:$0xff]  ;;  %v1291_v53 = vmul.f32 %v6379_v28, %v6264_v7  ;;  %v1322_v6 = vmax.f32 %v1306_v31, %v1290_v35  ;;  %v1355_v59 = vsel %vm260_vm2, %v1290_v35, -inf  ;;  %v1043_v31 = vld [vmem:[#allocation2 + $0x30] sm:$0xff] }
 0x131   : > { %v632_v18 = vsel %vm631_vm8, %v603_v40, %v6360_v62  ;;  %v1056_v38 = vmax.f32 %v1040_v14, %v6385_v44  ;;  %v1100_v8 = vrot.slane %v1099_v49, 2  ;;  %v1090_v36 = vmax.f32 %v1088_v11, %v1089_v45  ;;  %v6434_v51 = vpop.f32.mrb[32].mxu0 }
 0x132   : > { %v634_v10 = vsel %vm633_vm9, %v612_v17, %v632_v18  ;;  %v902_v5 = vsel %vm631_vm8, %v879_v48, %v6363_v37  ;;  %v1356_v13 = vsel %vm260_vm2, %v1291_v53, -inf  ;;  %v1367_v7 = vrot.slane %v1366_v21, 4  ;;  %1338 = vst.msk [vmem:[#allocation2] sm:$0xff] %vm260_vm2, %v1322_v6  ;;  %v6441_v12 = vpop.f32.mrb[33].mxu0  ;;  %v6443_v22 = vpop.f32.mrb[32].mxu1 }
 0x133   : > { %v636_v62 = vadd.f32 %v634_v10, %v540_v0  ;;  %v903_v44 = vsel %vm633_vm9, %v888_v32, %v902_v5  ;;  %1072 = vst.msk [vmem:[#allocation2 + $0x18] sm:$0xff] %vm260_vm2, %v1056_v38  ;;  %v1101_v29 = vmax.f32 %v1099_v49, %v1100_v8  ;;  %v1091_v26 = vrot.slane %v1090_v36, 2  ;;  %v6447_v17 = vpop.f32.mrb[34].mxu0  ;;  %v6449_v11 = vpop.f32.mrb[33].mxu1 }
 0x134   : > { %v1357_v37 = vmax.f32 %v1355_v59, %v1356_v13  ;;  %v1368_v43 = vmax.f32 %v1366_v21, %v1367_v7  ;;  %v1027_v9 = vmul.f32 %v6284_v54, %v6314_v61  ;;  %v6455_v56 = vmul.f32 %v6289_v15, %v6374_v30  ;;  %v6457_v35 = vpop.f32.mrb[35].mxu0  ;;  %v6459_v32 = vpop.f32.mrb[34].mxu1 }
 0x135   : > { %637 = vst.msk [vmem:[#allocation3] sm:$0xff] %vm260_vm2, %v636_v62  ;;  %v1102_v40 = vrot.slane %v1101_v29, 1  ;;  %v1092_v49 = vmax.f32 %v1090_v36, %v1091_v26  ;;  %v1307_v45 = vld [vmem:[#allocation2 + $0x8] sm:$0xff]  ;;  %v1025_v21 = vmul.f32 %v6314_v61, %v6291_v60  ;;  %v6466_v54 = vmul.f32 %v6374_v30, %v6302_v2  ;;  %v6468_v0 = vpop.f32.mrb[35].mxu1  ;;  %v1041_v36 = vld [vmem:[#allocation2 + $0x20] sm:$0xff] }
 0x136   : > { %v1323_v15 = vmax.f32 %v1307_v45, %v1291_v53  ;;  %v1358_v48 = vrot.slane %v1357_v37, 4  ;;  %v1369_v14 = vrot.slane %v1368_v43, 2  ;;  %v1059_v6 = vmax.f32 %v1043_v31, %v1027_v9 }
 0x137   : > { %v1103_v59 = vmax.f32 %v1101_v29, %v1102_v40  ;;  %v1093_v18 = vrot.slane %v1092_v49, 1  ;;  %v1113_v38 = vsel %vm260_vm2, %v1027_v9, -inf  ;;  %v1382_v8 = vsel %vm260_vm2, %v6455_v56, -inf }
 0x138   : > { %1339 = vst.msk [vmem:[#allocation2 + $0x8] sm:$0xff] %vm260_vm2, %v1323_v15  ;;  %v1359_v60 = vmax.f32 %v1357_v37, %v1358_v48  ;;  %v1370_v10 = vmax.f32 %v1368_v43, %v1369_v14  ;;  %1075 = vst.msk [vmem:[#allocation2 + $0x30] sm:$0xff] %vm260_vm2, %v1059_v6  ;;  %v1057_v2 = vmax.f32 %v1041_v36, %v1025_v21  ;;  %v1104_v53 = vsel %vm260_vm2, %v1025_v21, -inf  ;;  %v1044_v43 = vld [vmem:[#allocation2 + $0x38] sm:$0xff]  ;;  %v1042_v36 = vld [vmem:[#allocation2 + $0x28] sm:$0xff] }
 0x139   : > { %v1094_v5 = vmax.f32 %v1092_v49, %v1093_v18  ;;  %v1373_v13 = vsel %vm260_vm2, %v6466_v54, -inf  ;;  %v1028_v7 = vmul.f32 %v6304_v4, %v6334_v47  ;;  %v6482_v62 = vmul.f32 %v6307_v16, %v6379_v28  ;;  %v6484_v29 = vpop.f32.mrb[36].mxu0 }
 0x13a   : > { %v1360_v26 = vrot.slane %v1359_v60, 2  ;;  %v1371_v37 = vrot.slane %v1370_v10, 1  ;;  %1073 = vst.msk [vmem:[#allocation2 + $0x20] sm:$0xff] %vm260_vm2, %v1057_v2  ;;  %v1026_v9 = vmul.f32 %v6334_v47, %v6309_v42  ;;  %v6491_v40 = vmul.f32 %v6379_v28, %v6316_v25  ;;  %v6493_v49 = vpop.f32.mrb[36].mxu1  ;;  %v6495_v4 = vpop.f32.mrb[37].mxu0 }
 0x13b   : > { %v6498_v16 = vsel %vm621_vm3, %v1103_v59, %v1094_v5  ;;  %v1060_v45 = vmax.f32 %v1044_v43, %v1028_v7  ;;  %v1114_v31 = vsel %vm260_vm2, %v1028_v7, -inf  ;;  %v1383_v21 = vsel %vm260_vm2, %v6482_v62, -inf  ;;  %v6503_v15 = vpop.f32.mrb[37].mxu1  ;;  %v6505_v42 = vpop.f32.mrb[38].mxu0 }
 0x13c   : > { %8378 = vst [vmem:[#allocation7_spill] sm:$0xff] %v6503_v15  ;;  %8379 = vst [vmem:[#allocation8_spill] sm:$0xff] %v6505_v42  ;;  %v816_v48 = vld [vmem:[#allocation3] sm:$0xff]  ;;  %v1361_v25 = vmax.f32 %v1359_v60, %v1360_v26  ;;  %v1372_v14 = vmax.f32 %v1370_v10, %v1371_v37  ;;  %v1115_v6 = vmax.f32 %v1113_v38, %v1114_v31  ;;  %v6507_v2 = vpop.f32.mrb[38].mxu1  ;;  %v6509_v59 = vpop.f32.mrb[39].mxu0  ;;  %v1105_v43 = vsel %vm260_vm2, %v1026_v9, -inf }
 0x13d   : > { %v1384_v18 = vmax.f32 %v1382_v8, %v1383_v21  ;;  %v905_v5 = vadd.f32 %v903_v44, %v816_v48  ;;  %1076 = vst.msk [vmem:[#allocation2 + $0x38] sm:$0xff] %vm260_vm2, %v1060_v45  ;;  %v1058_v7 = vmax.f32 %v1042_v36, %v1026_v9  ;;  %v1374_v15 = vsel %vm260_vm2, %v6491_v40, -inf  ;;  %v6515_v42 = vpop.f32.mrb[39].mxu1  ;;  %v1047_v36 = vld [vmem:[#allocation2 + $0x50] sm:$0xff] }
 0x13e   : > { %v1362_v60 = vrot.slane %v1361_v25, 1  ;;  %v1116_v10 = vrot.slane %v1115_v6, 4  ;;  %v1106_v8 = vmax.f32 %v1104_v53, %v1105_v43  ;;  %v1375_v44 = vmax.f32 %v1373_v13, %v1374_v15 }
 0x13f   : > { %v1385_v38 = vrot.slane %v1384_v18, 4  ;;  %906 = vst.msk [vmem:[#allocation3] sm:$0xff] %vm260_vm2, %v905_v5  ;;  %v1312_v26 = vld [vmem:[#allocation2 + $0x30] sm:$0xff]  ;;  %1074 = vst.msk [vmem:[#allocation2 + $0x28] sm:$0xff] %vm260_vm2, %v1058_v7  ;;  %v1031_v37 = vmul.f32 %v6340_v52, %v6314_v61  ;;  %v6523_v9 = vmul.f32 %v6347_v39, %v6374_v30  ;;  %v1029_v45 = vmul.f32 %v6314_v61, %v6349_v1 }
 0x140   : > { %v1363_v31 = vmax.f32 %v1361_v25, %v1362_v60  ;;  %v1328_v21 = vmax.f32 %v1312_v26, %v6455_v56  ;;  %v1117_v53 = vmax.f32 %v1115_v6, %v1116_v10  ;;  %v1107_v43 = vrot.slane %v1106_v8, 4  ;;  %v1045_v6 = vld [vmem:[#allocation2 + $0x40] sm:$0xff] }
 0x141   : > { %v1386_v48 = vmax.f32 %v1384_v18, %v1385_v38  ;;  %v1310_v5 = vld [vmem:[#allocation2 + $0x20] sm:$0xff]  ;;  %v1376_v7 = vrot.slane %v1375_v44, 4  ;;  %v1063_v13 = vmax.f32 %v1047_v36, %v1031_v37  ;;  %v1131_v15 = vsel %vm260_vm2, %v1031_v37, -inf  ;;  %v6529_v52 = vpop.f32.mrb[40].mxu0 }
 0x142   : > { %v6532_v39 = vsel %vm621_vm3, %v1372_v14, %v1363_v31  ;;  %1344 = vst.msk [vmem:[#allocation2 + $0x30] sm:$0xff] %vm260_vm2, %v1328_v21  ;;  %v1326_v1 = vmax.f32 %v1310_v5, %v6466_v54  ;;  %v1118_v25 = vrot.slane %v1117_v53, 2  ;;  %v6536_v18 = vpop.f32.mrb[40].mxu1  ;;  %v6538_v60 = vpop.f32.mrb[41].mxu0  ;;  %v1108_v10 = vmax.f32 %v1106_v8, %v1107_v43 }
 0x143   : > { %v1387_v56 = vrot.slane %v1386_v48, 2  ;;  %8380 = vst [vmem:[#allocation9_spill] sm:$0xff] %v6536_v18  ;;  %8381 = vst [vmem:[#allocation10_spill] sm:$0xff] %v6538_v60  ;;  %v1377_v38 = vmax.f32 %v1375_v44, %v1376_v7  ;;  %v1400_v26 = vsel %vm260_vm2, %v6523_v9, -inf  ;;  %v1061_v14 = vmax.f32 %v1045_v6, %v1029_v45  ;;  %v6543_v37 = vpop.f32.mrb[41].mxu1  ;;  %v6545_v31 = vpop.f32.mrb[42].mxu0 }
 0x144   : > { %1079 = vst.msk [vmem:[#allocation2 + $0x50] sm:$0xff] %vm260_vm2, %v1063_v13  ;;  %8382 = vst [vmem:[#allocation11_spill] sm:$0xff] %v6543_v37  ;;  %v1119_v54 = vmax.f32 %v1117_v53, %v1118_v25  ;;  %v1313_v21 = vld [vmem:[#allocation2 + $0x38] sm:$0xff]  ;;  %v1122_v5 = vsel %vm260_vm2, %v1029_v45, -inf  ;;  %v6551_v8 = vmul.f32 %v6374_v30, %v6355_v57  ;;  %v6553_v44 = vpop.f32.mrb[42].mxu1  ;;  %v6555_v43 = vpop.f32.mrb[43].mxu0  ;;  %v1032_v53 = vmul.f32 %v6357_v50, %v6334_v47 }
 0x145   : > { %8383 = vst [vmem:[#allocation12_spill] sm:$0xff] %v6545_v31  ;;  %1342 = vst.msk [vmem:[#allocation2 + $0x20] sm:$0xff] %vm260_vm2, %v1326_v1  ;;  %v1388_v36 = vmax.f32 %v1386_v48, %v1387_v56  ;;  %v1329_v7 = vmax.f32 %v1313_v21, %v6482_v62  ;;  %v1109_v13 = vrot.slane %v1108_v10, 2  ;;  %v1378_v6 = vrot.slane %v1377_v38, 2  ;;  %v6561_v48 = vpop.f32.mrb[43].mxu1  ;;  %v1048_v56 = vld [vmem:[#allocation2 + $0x58] sm:$0xff] }
 0x146   : > { %8384 = vst [vmem:[#allocation13_spill] sm:$0xff] %v6553_v44  ;;  %8385 = vst [vmem:[#allocation14_spill] sm:$0xff] %v6555_v43  ;;  %v1120_v45 = vrot.slane %v1119_v54, 1  ;;  %v1311_v25 = vld [vmem:[#allocation2 + $0x28] sm:$0xff]  ;;  %v1391_v57 = vsel %vm260_vm2, %v6551_v8, -inf  ;;  %v6567_v43 = vmul.f32 %v6365_v63, %v6379_v28  ;;  %v1064_v50 = vmax.f32 %v1048_v56, %v1032_v53 }
 0x147   : > { %1077 = vst.msk [vmem:[#allocation2 + $0x40] sm:$0xff] %vm260_vm2, %v1061_v14  ;;  %8386 = vst [vmem:[#allocation15_spill] sm:$0xff] %v6561_v48  ;;  %v1389_v1 = vrot.slane %v1388_v36, 1  ;;  %v1110_v62 = vmax.f32 %v1108_v10, %v1109_v13  ;;  %v1327_v14 = vmax.f32 %v1311_v25, %v6491_v40  ;;  %v1379_v21 = vmax.f32 %v1377_v38, %v1378_v6 }
 0x148   : > { %1345 = vst.msk [vmem:[#allocation2 + $0x38] sm:$0xff] %vm260_vm2, %v1329_v7  ;;  %v1121_v44 = vmax.f32 %v1119_v54, %v1120_v45  ;;  %v1132_v31 = vsel %vm260_vm2, %v1032_v53, -inf  ;;  %v1401_v37 = vsel %vm260_vm2, %v6567_v43, -inf  ;;  %1080 = vst.msk [vmem:[#allocation2 + $0x58] sm:$0xff] %vm260_vm2, %v1064_v50  ;;  %v1030_v38 = vmul.f32 %v6334_v47, %v6367_v27  ;;  %v1046_v53 = vld [vmem:[#allocation2 + $0x48] sm:$0xff] }
 0x149   : > { %v1390_v48 = vmax.f32 %v1388_v36, %v1389_v1  ;;  %v1111_v60 = vrot.slane %v1110_v62, 1  ;;  %1343 = vst.msk [vmem:[#allocation2 + $0x28] sm:$0xff] %vm260_vm2, %v1327_v14  ;;  %v1380_v18 = vrot.slane %v1379_v21, 1  ;;  %v1133_v63 = vmax.f32 %v1131_v15, %v1132_v31  ;;  %v6576_v10 = vpop.f32.mrb[44].mxu0 }
 0x14a   : > { %v1402_v7 = vmax.f32 %v1400_v26, %v1401_v37  ;;  %v6582_v54 = vmul.f32 %v6379_v28, %v6371_v46  ;;  %v1035_v36 = vmul.f32 %v6395_v33, %v6314_v61  ;;  %v6588_v13 = vmul.f32 %v6404_v19, %v6374_v30  ;;  %v6590_v6 = vpop.f32.mrb[44].mxu1  ;;  %v6592_v15 = vpop.f32.mrb[45].mxu0 }
 0x14b   : > { %v1316_v40 = vld [vmem:[#allocation2 + $0x50] sm:$0xff]  ;;  %v1112_v26 = vmax.f32 %v1110_v62, %v1111_v60  ;;  %v1381_v37 = vmax.f32 %v1379_v21, %v1380_v18  ;;  %v1134_v27 = vrot.slane %v1133_v63, 4  ;;  %v6595_v45 = vpop.f32.mrb[45].mxu1  ;;  %v6597_v46 = vpop.f32.mrb[46].mxu0  ;;  %v1062_v25 = vmax.f32 %v1046_v53, %v1030_v38 }
 0x14c   : > { %v1332_v31 = vmax.f32 %v1316_v40, %v6523_v9  ;;  %v1403_v33 = vrot.slane %v1402_v7, 4  ;;  %v1123_v19 = vsel %vm260_vm2, %v1030_v38, -inf  ;;  %v1392_v56 = vsel %vm260_vm2, %v6582_v54, -inf  ;;  %v6602_v14 = vpop.f32.mrb[46].mxu1  ;;  %v6604_v60 = vpop.f32.mrb[47].mxu0 }
 0x14d   : > { %8387 = vst [vmem:[#allocation16_spill] sm:$0xff] %v6602_v14  ;;  %8388 = vst [vmem:[#allocation17_spill] sm:$0xff] %v6604_v60  ;;  %v1167_v9 = vsel %vm623_vm4, %v1112_v26, %v6498_v16  ;;  %v1436_v18 = vsel %vm623_vm4, %v1381_v37, %v6532_v39  ;;  %v1135_v21 = vmax.f32 %v1133_v63, %v1134_v27  ;;  %v6612_v50 = vpop.f32.mrb[47].mxu1  ;;  %v1051_v14 = vld [vmem:[#allocation2 + $0x70] sm:$0xff] }
 0x14e   : > { %v1314_v1 = vld [vmem:[#allocation2 + $0x40] sm:$0xff]  ;;  %1348 = vst.msk [vmem:[#allocation2 + $0x50] sm:$0xff] %vm260_vm2, %v1332_v31  ;;  %v1404_v40 = vmax.f32 %v1402_v7, %v1403_v33  ;;  %1078 = vst.msk [vmem:[#allocation2 + $0x48] sm:$0xff] %vm260_vm2, %v1062_v25  ;;  %v1124_v38 = vmax.f32 %v1122_v5, %v1123_v19  ;;  %v6616_v53 = vsel %vm625_vm5, %v1121_v44, %v1167_v9  ;;  %v1418_v5 = vsel %vm260_vm2, %v6588_v13, -inf }
 0x14f   : > { %v1330_v62 = vmax.f32 %v1314_v1, %v6551_v8  ;;  %v1393_v60 = vmax.f32 %v1391_v57, %v1392_v56  ;;  %v1136_v16 = vrot.slane %v1135_v21, 2  ;;  %v6620_v39 = vsel %vm625_vm5, %v1390_v48, %v1436_v18  ;;  %v1317_v63 = vld [vmem:[#allocation2 + $0x58] sm:$0xff]  ;;  %v1049_v56 = vld [vmem:[#allocation2 + $0x60] sm:$0xff] }
 0x150   : > { %v1067_v26 = vmax.f32 %v1051_v14, %v1035_v36  ;;  %v1149_v8 = vsel %vm260_vm2, %v1035_v36, -inf  ;;  %v1405_v37 = vrot.slane %v1404_v40, 2  ;;  %v1125_v7 = vrot.slane %v1124_v38, 4  ;;  %v6633_v36 = vpop.permute.xlu1 %1552  ;;  %v1052_v18 = vld [vmem:[#allocation2 + $0x78] sm:$0xff] }
 0x151   : > { %1346 = vst.msk [vmem:[#allocation2 + $0x40] sm:$0xff] %vm260_vm2, %v1330_v62  ;;  %v1394_v31 = vrot.slane %v1393_v60, 4  ;;  %v1137_v44 = vmax.f32 %v1135_v21, %v1136_v16  ;;  %v1333_v57 = vmax.f32 %v1317_v63, %v6567_v43  ;;  %v1033_v27 = vmul.f32 %v6314_v61, %v6406_v20  ;;  %v6635_v1 = vpop.f32.mrb[48].mxu0 }
 0x152   : > { %1083 = vst.msk [vmem:[#allocation2 + $0x70] sm:$0xff] %vm260_vm2, %v1067_v26  ;;  %v6631_v48 = vmul.f32 %v6374_v30, %v6409_v41  ;;  %v1406_v33 = vmax.f32 %v1404_v40, %v1405_v37  ;;  %v1126_v25 = vmax.f32 %v1124_v38, %v1125_v7  ;;  %v1036_v43 = vmul.f32 %v6411_v3, %v6334_v47  ;;  %v6639_v14 = vpop.f32.mrb[49].mxu0  ;;  %v6641_v9 = vpop.f32.mrb[48].mxu1 }
 0x153   : > { %v1395_v19 = vmax.f32 %v1393_v60, %v1394_v31  ;;  %8389 = vst [vmem:[#allocation18_spill] sm:$0xff] %v6641_v9  ;;  %v1138_v61 = vrot.slane %v1137_v44, 1  ;;  %1349 = vst.msk [vmem:[#allocation2 + $0x58] sm:$0xff] %vm260_vm2, %v1333_v57  ;;  %v1065_v30 = vmax.f32 %v1049_v56, %v1033_v27  ;;  %v1140_v20 = vsel %vm260_vm2, %v1033_v27, -inf  ;;  %v6649_v60 = vpop.f32.mrb[50].mxu0  ;;  %v6651_v62 = vpop.f32.mrb[49].mxu1 }
 0x154   : > { %v6647_v41 = vsel %vm260_vm2, %v6631_v48, -inf  ;;  %8390 = vst [vmem:[#allocation19_spill] sm:$0xff] %v6651_v62  ;;  %v1407_v3 = vrot.slane %v1406_v33, 1  ;;  %v1127_v21 = vrot.slane %v1126_v25, 2  ;;  %v1068_v38 = vmax.f32 %v1052_v18, %v1036_v43  ;;  %v6653_v16 = vpop.f32.mrb[51].mxu0  ;;  %v6655_v26 = vpop.f32.mrb[50].mxu1 }
 0x155   : > { %v1396_v40 = vrot.slane %v1395_v19, 2  ;;  %8391 = vst [vmem:[#allocation20_spill] sm:$0xff] %v6653_v16  ;;  %8392 = vst [vmem:[#allocation21_spill] sm:$0xff] %v6655_v26  ;;  %v1139_v63 = vmax.f32 %v1137_v44, %v1138_v61  ;;  %v1315_v37 = vld [vmem:[#allocation2 + $0x48] sm:$0xff]  ;;  %v1150_v7 = vsel %vm260_vm2, %v1036_v43, -inf  ;;  %v6661_v31 = vmul.f32 %v6414_v23, %v6379_v28  ;;  %v6665_v27 = vpop.f32.mrb[51].mxu1 }
 0x156   : > { %1081 = vst.msk [vmem:[#allocation2 + $0x60] sm:$0xff] %vm260_vm2, %v1065_v30  ;;  %v1034_v57 = vmul.f32 %v6334_v47, %v6416_v24  ;;  %v1408_v56 = vmax.f32 %v1406_v33, %v1407_v3  ;;  %v1128_v18 = vmax.f32 %v1126_v25, %v1127_v21  ;;  %v1331_v62 = vmax.f32 %v1315_v37, %v6582_v54  ;;  %v1050_v44 = vld [vmem:[#allocation2 + $0x68] sm:$0xff]  ;;  %v1308_v61 = vld [vmem:[#allocation2 + $0x10] sm:$0xff]  ;;  %v6680_v21 = vpop.permute.xlu1 %1556 }
 0x157   : > { %v1397_v26 = vmax.f32 %v1395_v19, %v1396_v40  ;;  %1084 = vst.msk [vmem:[#allocation2 + $0x78] sm:$0xff] %vm260_vm2, %v1068_v38  ;;  %v1151_v30 = vmax.f32 %v1149_v8, %v1150_v7  ;;  %v1419_v43 = vsel %vm260_vm2, %v6661_v31, -inf  ;;  %v6677_v8 = vmul.f32 %v6379_v28, %v6421_v58 }
 0x158   : > { %v1066_v23 = vmax.f32 %v1050_v44, %v1034_v57  ;;  %v1141_v16 = vsel %vm260_vm2, %v1034_v57, -inf  ;;  %v1129_v9 = vrot.slane %v1128_v18, 1  ;;  %1347 = vst.msk [vmem:[#allocation2 + $0x48] sm:$0xff] %vm260_vm2, %v1331_v62  ;;  %v1420_v33 = vmax.f32 %v1418_v5, %v1419_v43 }
 0x159   : > { %v1398_v47 = vrot.slane %v1397_v26, 1  ;;  %v1320_v24 = vld [vmem:[#allocation2 + $0x70] sm:$0xff]  ;;  %v1142_v25 = vmax.f32 %v1140_v20, %v1141_v16  ;;  %v1152_v19 = vrot.slane %v1151_v30, 4  ;;  %v1324_v3 = vmax.f32 %v1308_v61, %v6393_v34  ;;  %v6682_v40 = vpop.f32.mrb[52].mxu0 }
 0x15a   : > { %v1336_v54 = vmax.f32 %v1320_v24, %v6588_v13  ;;  %1082 = vst.msk [vmem:[#allocation2 + $0x68] sm:$0xff] %vm260_vm2, %v1066_v23  ;;  %v1130_v62 = vmax.f32 %v1128_v18, %v1129_v9  ;;  %v1421_v37 = vrot.slane %v1420_v33, 4  ;;  %v6684_v20 = vpop.f32.mrb[52].mxu1  ;;  %v6686_v13 = vpop.f32.mrb[53].mxu0  ;;  %v1410_v28 = vsel %vm260_vm2, %v6677_v8, -inf }
 0x15b   : > { %v1399_v38 = vmax.f32 %v1397_v26, %v1398_v47  ;;  %v1143_v5 = vrot.slane %v1142_v25, 4  ;;  %v1153_v16 = vmax.f32 %v1151_v30, %v1152_v19  ;;  %1340 = vst.msk [vmem:[#allocation2 + $0x10] sm:$0xff] %vm260_vm2, %v1324_v3  ;;  %v6694_v34 = vmul.f32 %v6434_v51, %v6633_v36  ;;  %v6698_v9 = vpop.f32.mrb[53].mxu1  ;;  %v6700_v26 = vpop.f32.mrb[54].mxu0  ;;  %v1575_v3 = vld [vmem:[#allocation2] sm:$0xff] }
 0x15c   : > { %1352 = vst.msk [vmem:[#allocation2 + $0x70] sm:$0xff] %vm260_vm2, %v1336_v54  ;;  %v1559_v58 = vmul.f32 %v6633_v36, %v6441_v12  ;;  %v1169_v7 = vsel %vm627_vm6, %v1130_v62, %v6616_v53  ;;  %v1422_v44 = vmax.f32 %v1420_v33, %v1421_v37  ;;  %v6706_v30 = vpop.f32.mrb[54].mxu1  ;;  %v6708_v51 = vpop.f32.mrb[55].mxu0  ;;  %v1411_v24 = vmax.f32 %v6647_v41, %v1410_v28  ;;  %v1309_v54 = vld [vmem:[#allocation2 + $0x18] sm:$0xff] }
 0x15d   : > { %v1438_v57 = vsel %vm627_vm6, %v1399_v38, %v6620_v39  ;;  %v1318_v18 = vld [vmem:[#allocation2 + $0x60] sm:$0xff]  ;;  %v1144_v61 = vmax.f32 %v1142_v25, %v1143_v5  ;;  %v1154_v12 = vrot.slane %v1153_v16, 2  ;;  %v1170_v47 = vsel %vm629_vm7, %v1139_v63, %v1169_v7  ;;  %v6713_v53 = vpop.f32.mrb[55].mxu1  ;;  %v6722_v41 = vpop.permute.xlu1 %1825 }
 0x15e   : > { %v1334_v43 = vmax.f32 %v1318_v18, %v6631_v48  ;;  %v1321_v23 = vld [vmem:[#allocation2 + $0x78] sm:$0xff]  ;;  %v1423_v19 = vrot.slane %v1422_v44, 2  ;;  %v6717_v25 = vsel %vm629_vm7, %v1408_v56, %v1438_v57  ;;  %v1412_v62 = vrot.slane %v1411_v24, 4 }
 0x15f   : > { %v1337_v39 = vmax.f32 %v1321_v23, %v6661_v31  ;;  %v1145_v33 = vrot.slane %v1144_v61, 2  ;;  %v1155_v48 = vmax.f32 %v1153_v16, %v1154_v12  ;;  %v1633_v63 = vsel %vm260_vm2, %v6694_v34, -inf }
 0x160   : > { %1350 = vst.msk [vmem:[#allocation2 + $0x60] sm:$0xff] %vm260_vm2, %v1334_v43  ;;  %v1591_v38 = vmax.f32 %v1575_v3, %v1559_v58  ;;  %v1424_v37 = vmax.f32 %v1422_v44, %v1423_v19  ;;  %v1624_v28 = vsel %vm260_vm2, %v1559_v58, -inf  ;;  %v1325_v56 = vmax.f32 %v1309_v54, %v6402_v55  ;;  %v6733_v43 = vpop.permute.xlu0 %1821 }
 0x161   : > { %1353 = vst.msk [vmem:[#allocation2 + $0x78] sm:$0xff] %vm260_vm2, %v1337_v39  ;;  %v1146_v31 = vmax.f32 %v1144_v61, %v1145_v33  ;;  %v1319_v5 = vld [vmem:[#allocation2 + $0x68] sm:$0xff]  ;;  %v1156_v7 = vrot.slane %v1155_v48, 1  ;;  %v1413_v16 = vmax.f32 %v1411_v24, %v1412_v62  ;;  %v6731_v18 = vmul.f32 %v6447_v17, %v6680_v21  ;;  %v6735_v12 = vpop.f32.mrb[56].mxu0 }
 0x162   : > { %v1335_v57 = vmax.f32 %v1319_v5, %v6677_v8  ;;  %1607 = vst.msk [vmem:[#allocation2] sm:$0xff] %vm260_vm2, %v1591_v38  ;;  %v1425_v44 = vrot.slane %v1424_v37, 1  ;;  %v1577_v23 = vld [vmem:[#allocation2 + $0x10] sm:$0xff]  ;;  %1341 = vst.msk [vmem:[#allocation2 + $0x18] sm:$0xff] %vm260_vm2, %v1325_v56  ;;  %v1560_v55 = vmul.f32 %v6680_v21, %v6457_v35  ;;  %v6742_v8 = vmul.f32 %v6459_v32, %v6722_v41  ;;  %v6744_v58 = vpop.f32.mrb[56].mxu1  ;;  %v6746_v17 = vpop.f32.mrb[57].mxu0 }
 0x163   : > { %v1147_v61 = vrot.slane %v1146_v31, 1  ;;  %v1157_v24 = vmax.f32 %v1155_v48, %v1156_v7  ;;  %v1414_v54 = vrot.slane %v1413_v16, 2  ;;  %v1593_v39 = vmax.f32 %v1577_v23, %v6694_v34  ;;  %v1576_v33 = vld [vmem:[#allocation2 + $0x8] sm:$0xff]  ;;  %v6752_v3 = vpop.f32.mrb[57].mxu1  ;;  %v6754_v35 = vpop.f32.mrb[58].mxu0 }
 0x164   : > { %1351 = vst.msk [vmem:[#allocation2 + $0x68] sm:$0xff] %vm260_vm2, %v1335_v57  ;;  %v1634_v19 = vsel %vm260_vm2, %v6731_v18, -inf  ;;  %v1426_v32 = vmax.f32 %v1424_v37, %v1425_v44  ;;  %v1592_v5 = vmax.f32 %v1576_v33, %v1560_v55  ;;  %v6756_v56 = vpop.f32.mrb[58].mxu1  ;;  %v6758_v48 = vpop.f32.mrb[59].mxu0  ;;  %v1625_v34 = vsel %vm260_vm2, %v1560_v55, -inf }
 0x165   : > { %v1148_v62 = vmax.f32 %v1146_v31, %v1147_v61  ;;  %v1635_v38 = vmax.f32 %v1633_v63, %v1634_v19  ;;  %8393 = vst [vmem:[#allocation22_spill] sm:$0xff] %v6756_v56  ;;  %8394 = vst [vmem:[#allocation23_spill] sm:$0xff] %v6758_v48  ;;  %v1415_v7 = vmax.f32 %v1413_v16, %v1414_v54  ;;  %v1903_v57 = vsel %vm260_vm2, %v6742_v8, -inf  ;;  %v6768_v37 = vpop.f32.mrb[59].mxu1  ;;  %v1085_v61 = vld [vmem:[#allocation3] sm:$0xff] }
 0x166   : > { %1609 = vst.msk [vmem:[#allocation2 + $0x10] sm:$0xff] %vm260_vm2, %v1593_v39  ;;  %v6766_v23 = vmul.f32 %v6443_v22, %v6733_v43  ;;  %8395 = vst [vmem:[#allocation24_spill] sm:$0xff] %v6768_v37  ;;  %v1626_v44 = vmax.f32 %v1624_v28, %v1625_v34  ;;  %v1828_v16 = vmul.f32 %v6733_v43, %v6449_v11 }
 0x167   : > { %v1171_v63 = vsel %vm631_vm8, %v1148_v62, %v1170_v47  ;;  %v1636_v31 = vrot.slane %v1635_v38, 4  ;;  %1608 = vst.msk [vmem:[#allocation2 + $0x8] sm:$0xff] %vm260_vm2, %v1592_v5  ;;  %v1416_v54 = vrot.slane %v1415_v7, 1  ;;  %v1829_v22 = vmul.f32 %v6722_v41, %v6468_v0 }
 0x168   : > { %v1172_v55 = vsel %vm633_vm9, %v1157_v24, %v1171_v63  ;;  %v1902_v39 = vsel %vm260_vm2, %v6766_v23, -inf  ;;  %v1627_v47 = vrot.slane %v1626_v44, 4  ;;  %v1893_v11 = vsel %vm260_vm2, %v1828_v16, -inf }
 0x169   : > { %v1174_v19 = vadd.f32 %v1172_v55, %v1085_v61  ;;  %v1637_v33 = vmax.f32 %v1635_v38, %v1636_v31  ;;  %v1904_v62 = vmax.f32 %v1902_v39, %v1903_v57  ;;  %v1844_v37 = vld [vmem:[#allocation2] sm:$0xff]  ;;  %v1417_v5 = vmax.f32 %v1415_v7, %v1416_v54  ;;  %v1578_v28 = vld [vmem:[#allocation2 + $0x18] sm:$0xff]  ;;  %v6781_v24 = vpop.f32.mrb[60].mxu0  ;;  %v1581_v39 = vld [vmem:[#allocation2 + $0x30] sm:$0xff] }
 0x16a   : > { %v1860_v34 = vmax.f32 %v1844_v37, %v1828_v16  ;;  %v1894_v48 = vsel %vm260_vm2, %v1829_v22, -inf  ;;  %v1594_v63 = vmax.f32 %v1578_v28, %v6731_v18  ;;  %v1628_v0 = vmax.f32 %v1626_v44, %v1627_v47  ;;  %v6785_v38 = vpop.f32.mrb[60].mxu1  ;;  %v6787_v57 = vpop.f32.mrb[61].mxu0 }
 0x16b   : > { %1175 = vst.msk [vmem:[#allocation3] sm:$0xff] %vm260_vm2, %v1174_v19  ;;  %v1638_v56 = vrot.slane %v1637_v33, 2  ;;  %v1895_v61 = vmax.f32 %v1893_v11, %v1894_v48  ;;  %8396 = vst [vmem:[#allocation25_spill] sm:$0xff] %v6787_v57  ;;  %v1440_v7 = vsel %vm631_vm8, %v1417_v5, %v6717_v25  ;;  %v1905_v37 = vrot.slane %v1904_v62, 4  ;;  %v6798_v18 = vpop.f32.mrb[61].mxu1  ;;  %v6800_v48 = vpop.f32.mrb[62].mxu0 }
 0x16c   : > { %1876 = vst.msk [vmem:[#allocation2] sm:$0xff] %vm260_vm2, %v1860_v34  ;;  %v1565_v31 = vmul.f32 %v6484_v29, %v6633_v36  ;;  %v6796_v16 = vmul.f32 %v6493_v49, %v6733_v43  ;;  %8397 = vst [vmem:[#allocation26_spill] sm:$0xff] %v6798_v18  ;;  %v1441_v44 = vsel %vm633_vm9, %v1426_v32, %v1440_v7  ;;  %v1629_v25 = vrot.slane %v1628_v0, 2  ;;  %v6804_v19 = vpop.f32.mrb[62].mxu1  ;;  %v6806_v47 = vpop.f32.mrb[63].mxu0 }
 0x16d   : > { %8398 = vst [vmem:[#allocation27_spill] sm:$0xff] %v6800_v48  ;;  %1610 = vst.msk [vmem:[#allocation2 + $0x18] sm:$0xff] %vm260_vm2, %v1594_v63  ;;  %v1639_v55 = vmax.f32 %v1637_v33, %v1638_v56  ;;  %v1896_v54 = vrot.slane %v1895_v61, 4  ;;  %v1906_v5 = vmax.f32 %v1904_v62, %v1905_v37  ;;  %v6811_v11 = vpop.f32.mrb[63].mxu1  ;;  %v8403_v37 = vld [vmem:[#allocation8_spill] sm:$0xff] }
 0x16e   : > { %8399 = vst [vmem:[#allocation28_spill] sm:$0xff] %v6804_v19  ;;  %8400 = vst [vmem:[#allocation29_spill] sm:$0xff] %v6806_v47  ;;  %v1845_v29 = vld [vmem:[#allocation2 + $0x8] sm:$0xff]  ;;  %v1597_v49 = vmax.f32 %v1581_v39, %v1565_v31  ;;  %v1651_v28 = vsel %vm260_vm2, %v1565_v31, -inf  ;;  %v1920_v34 = vsel %vm260_vm2, %v6796_v16, -inf  ;;  %v1630_v63 = vmax.f32 %v1628_v0, %v1629_v25  ;;  %v8402_v19 = vld [vmem:[#allocation7_spill] sm:$0xff] }
 0x16f   : > { %8401 = vst [vmem:[#allocation30_spill] sm:$0xff] %v6811_v11  ;;  %v1640_v32 = vrot.slane %v1639_v55, 1  ;;  %v1861_v56 = vmax.f32 %v1845_v29, %v1829_v22  ;;  %v1897_v33 = vmax.f32 %v1895_v61, %v1896_v54  ;;  %v1907_v7 = vrot.slane %v1906_v5, 2  ;;  %v1579_v22 = vld [vmem:[#allocation2 + $0x20] sm:$0xff] }
 0x170   : > { %1613 = vst.msk [vmem:[#allocation2 + $0x30] sm:$0xff] %vm260_vm2, %v1597_v49  ;;  %v1563_v47 = vmul.f32 %v6633_v36, %v6495_v4  ;;  %v6818_v62 = vmul.f32 %v6733_v43, %v8402_v19  ;;  %v1566_v31 = vmul.f32 %v8403_v37, %v6680_v21  ;;  %v1631_v48 = vrot.slane %v1630_v63, 1  ;;  %v1582_v49 = vld [vmem:[#allocation2 + $0x38] sm:$0xff] }
 0x171   : > { %v1641_v39 = vmax.f32 %v1639_v55, %v1640_v32  ;;  %1877 = vst.msk [vmem:[#allocation2 + $0x8] sm:$0xff] %vm260_vm2, %v1861_v56  ;;  %v1898_v0 = vrot.slane %v1897_v33, 2  ;;  %v6825_v61 = vmul.f32 %v6507_v2, %v6722_v41  ;;  %v1908_v54 = vmax.f32 %v1906_v5, %v1907_v7  ;;  %v6830_v37 = vpop.f32.mrb[64].mxu0 }
 0x172   : > { %v1354_v25 = vld [vmem:[#allocation3] sm:$0xff]  ;;  %v1595_v4 = vmax.f32 %v1579_v22, %v1563_v47  ;;  %v1642_v29 = vsel %vm260_vm2, %v1563_v47, -inf  ;;  %v1911_v19 = vsel %vm260_vm2, %v6818_v62, -inf  ;;  %v1632_v32 = vmax.f32 %v1630_v63, %v1631_v48  ;;  %v6832_v18 = vpop.f32.mrb[65].mxu0  ;;  %v6834_v57 = vpop.f32.mrb[64].mxu1 }
 0x173   : > { %v1443_v55 = vadd.f32 %v1441_v44, %v1354_v25  ;;  %v1899_v56 = vmax.f32 %v1897_v33, %v1898_v0  ;;  %v1598_v11 = vmax.f32 %v1582_v49, %v1566_v31  ;;  %8404 = vst [vmem:[#allocation7_spill] sm:$0xff] %v6832_v18  ;;  %8405 = vst [vmem:[#allocation8_spill] sm:$0xff] %v6834_v57  ;;  %v1909_v2 = vrot.slane %v1908_v54, 1  ;;  %v6842_v22 = vpop.f32.mrb[66].mxu0  ;;  %v6844_v48 = vpop.f32.mrb[65].mxu1  ;;  %v1580_v0 = vld [vmem:[#allocation2 + $0x28] sm:$0xff] }
 0x174   : > { %1611 = vst.msk [vmem:[#allocation2 + $0x20] sm:$0xff] %vm260_vm2, %v1595_v4  ;;  %v1652_v5 = vsel %vm260_vm2, %v1566_v31, -inf  ;;  %v1921_v47 = vsel %vm260_vm2, %v6825_v61, -inf  ;;  %v1564_v7 = vmul.f32 %v6680_v21, %v6509_v59  ;;  %8406 = vst [vmem:[#allocation31_spill] sm:$0xff] %v6842_v22  ;;  %v6848_v44 = vsel %vm621_vm3, %v1641_v39, %v1632_v32  ;;  %v6851_v25 = vpop.f32.mrb[67].mxu0  ;;  %v6853_v4 = vpop.f32.mrb[66].mxu1 }
 0x175   : > { %8407 = vst [vmem:[#allocation32_spill] sm:$0xff] %v6844_v48  ;;  %1444 = vst.msk [vmem:[#allocation3] sm:$0xff] %vm260_vm2, %v1443_v55  ;;  %v1900_v63 = vrot.slane %v1899_v56, 1  ;;  %v1653_v33 = vmax.f32 %v1651_v28, %v1652_v5  ;;  %v1922_v31 = vmax.f32 %v1920_v34, %v1921_v47  ;;  %v1910_v59 = vmax.f32 %v1908_v54, %v1909_v2  ;;  %v6860_v39 = vpop.f32.mrb[67].mxu1 }
 0x176   : > { %1614 = vst.msk [vmem:[#allocation2 + $0x38] sm:$0xff] %vm260_vm2, %v1598_v11  ;;  %8408 = vst [vmem:[#allocation33_spill] sm:$0xff] %v6851_v25  ;;  %v1596_v49 = vmax.f32 %v1580_v0, %v1564_v7  ;;  %v1643_v57 = vsel %vm260_vm2, %v1564_v7, -inf  ;;  %v6858_v55 = vmul.f32 %v6722_v41, %v6515_v42  ;;  %v1569_v2 = vmul.f32 %v6529_v52, %v6633_v36  ;;  %v8411_v42 = vld [vmem:[#allocation9_spill] sm:$0xff] }
 0x177   : > { %8409 = vst [vmem:[#allocation34_spill] sm:$0xff] %v6853_v4  ;;  %8410 = vst [vmem:[#allocation35_spill] sm:$0xff] %v6860_v39  ;;  %v1901_v32 = vmax.f32 %v1899_v56, %v1900_v63  ;;  %v1850_v48 = vld [vmem:[#allocation2 + $0x30] sm:$0xff]  ;;  %v1654_v11 = vrot.slane %v1653_v33, 4  ;;  %v1923_v28 = vrot.slane %v1922_v31, 4  ;;  %v1644_v34 = vmax.f32 %v1642_v29, %v1643_v57 }
 0x178   : > { %v1866_v5 = vmax.f32 %v1850_v48, %v6796_v16  ;;  %1612 = vst.msk [vmem:[#allocation2 + $0x28] sm:$0xff] %vm260_vm2, %v1596_v49  ;;  %v1912_v54 = vsel %vm260_vm2, %v6858_v55, -inf  ;;  %v6870_v47 = vmul.f32 %v8411_v42, %v6733_v43  ;;  %v1585_v29 = vld [vmem:[#allocation2 + $0x50] sm:$0xff]  ;;  %v1669_v0 = vsel %vm260_vm2, %v1569_v2, -inf }
 0x179   : > { %v6873_v56 = vsel %vm621_vm3, %v1910_v59, %v1901_v32  ;;  %v1655_v7 = vmax.f32 %v1653_v33, %v1654_v11  ;;  %v1924_v63 = vmax.f32 %v1922_v31, %v1923_v28  ;;  %v1645_v57 = vrot.slane %v1644_v34, 4  ;;  %v6879_v49 = vpop.f32.mrb[68].mxu0  ;;  %v8413_v32 = vld [vmem:[#allocation10_spill] sm:$0xff] }
 0x17a   : > { %1882 = vst.msk [vmem:[#allocation2 + $0x30] sm:$0xff] %vm260_vm2, %v1866_v5  ;;  %v1913_v16 = vmax.f32 %v1911_v19, %v1912_v54  ;;  %v1601_v48 = vmax.f32 %v1585_v29, %v1569_v2  ;;  %v1938_v52 = vsel %vm260_vm2, %v6870_v47, -inf  ;;  %8412 = vst [vmem:[#allocation9_spill] sm:$0xff] %v6879_v49  ;;  %v1567_v33 = vmul.f32 %v6633_v36, %v8413_v32  ;;  %v6883_v31 = vpop.f32.mrb[68].mxu1  ;;  %v6885_v11 = vpop.f32.mrb[69].mxu0  ;;  %v8416_v54 = vld [vmem:[#allocation11_spill] sm:$0xff] }
 0x17b   : > { %v1848_v42 = vld [vmem:[#allocation2 + $0x20] sm:$0xff]  ;;  %v1656_v39 = vrot.slane %v1655_v7, 2  ;;  %v1925_v4 = vrot.slane %v1924_v63, 2  ;;  %v1646_v59 = vmax.f32 %v1644_v34, %v1645_v57  ;;  %8414 = vst [vmem:[#allocation10_spill] sm:$0xff] %v6883_v31  ;;  %8415 = vst [vmem:[#allocation36_spill] sm:$0xff] %v6885_v11  ;;  %v6891_v2 = vmul.f32 %v6733_v43, %v8416_v54  ;;  %v8417_v29 = vld [vmem:[#allocation12_spill] sm:$0xff] }
 0x17c   : > { %v1864_v19 = vmax.f32 %v1848_v42, %v6818_v62  ;;  %v1914_v5 = vrot.slane %v1913_v16, 4  ;;  %1617 = vst.msk [vmem:[#allocation2 + $0x50] sm:$0xff] %vm260_vm2, %v1601_v48  ;;  %v1570_v34 = vmul.f32 %v8417_v29, %v6680_v21  ;;  %v6895_v57 = vpop.f32.mrb[69].mxu1  ;;  %v6897_v32 = vpop.f32.mrb[70].mxu0  ;;  %v1583_v42 = vld [vmem:[#allocation2 + $0x40] sm:$0xff]  ;;  %v1660_v29 = vsel %vm260_vm2, %v1567_v33, -inf }
 0x17d   : > { %v1851_v28 = vld [vmem:[#allocation2 + $0x38] sm:$0xff]  ;;  %8418 = vst [vmem:[#allocation11_spill] sm:$0xff] %v6895_v57  ;;  %8419 = vst [vmem:[#allocation12_spill] sm:$0xff] %v6897_v32  ;;  %v1657_v31 = vmax.f32 %v1655_v7, %v1656_v39  ;;  %v1926_v49 = vmax.f32 %v1924_v63, %v1925_v4  ;;  %v1647_v62 = vrot.slane %v1646_v59, 2  ;;  %v6900_v25 = vpop.f32.mrb[70].mxu1  ;;  %v6902_v48 = vpop.f32.mrb[71].mxu0  ;;  %v1599_v22 = vmax.f32 %v1583_v42, %v1567_v33 }
 0x17e   : > { %v1867_v11 = vmax.f32 %v1851_v28, %v6825_v61  ;;  %8420 = vst [vmem:[#allocation37_spill] sm:$0xff] %v6900_v25  ;;  %8421 = vst [vmem:[#allocation38_spill] sm:$0xff] %v6902_v48  ;;  %v1915_v54 = vmax.f32 %v1913_v16, %v1914_v5  ;;  %v1929_v57 = vsel %vm260_vm2, %v6891_v2, -inf  ;;  %v1586_v32 = vld [vmem:[#allocation2 + $0x58] sm:$0xff]  ;;  %v6908_v39 = vpop.f32.mrb[71].mxu1  ;;  %v1670_v16 = vsel %vm260_vm2, %v1570_v34, -inf }
 0x17f   : > { %1880 = vst.msk [vmem:[#allocation2 + $0x20] sm:$0xff] %vm260_vm2, %v1864_v19  ;;  %8422 = vst [vmem:[#allocation39_spill] sm:$0xff] %v6908_v39  ;;  %v1658_v61 = vrot.slane %v1657_v31, 1  ;;  %v1927_v4 = vrot.slane %v1926_v49, 1  ;;  %v1648_v7 = vmax.f32 %v1646_v59, %v1647_v62  ;;  %v1849_v63 = vld [vmem:[#allocation2 + $0x28] sm:$0xff]  ;;  %v1602_v28 = vmax.f32 %v1586_v32, %v1570_v34  ;;  %v8423_v33 = vld [vmem:[#allocation13_spill] sm:$0xff] }
 0x180   : > { %1883 = vst.msk [vmem:[#allocation2 + $0x38] sm:$0xff] %vm260_vm2, %v1867_v11  ;;  %v1865_v48 = vmax.f32 %v1849_v63, %v6858_v55  ;;  %v1916_v19 = vrot.slane %v1915_v54, 2  ;;  %1615 = vst.msk [vmem:[#allocation2 + $0x40] sm:$0xff] %vm260_vm2, %v1599_v22  ;;  %v6916_v5 = vmul.f32 %v8423_v33, %v6722_v41  ;;  %v1671_v11 = vmax.f32 %v1669_v0, %v1670_v16  ;;  %v8424_v32 = vld [vmem:[#allocation14_spill] sm:$0xff]  ;;  %v8425_v34 = vld [vmem:[#allocation15_spill] sm:$0xff] }
 0x181   : > { %v1659_v42 = vmax.f32 %v1657_v31, %v1658_v61  ;;  %v1928_v39 = vmax.f32 %v1926_v49, %v1927_v4  ;;  %v1649_v25 = vrot.slane %v1648_v7, 1  ;;  %1618 = vst.msk [vmem:[#allocation2 + $0x58] sm:$0xff] %vm260_vm2, %v1602_v28  ;;  %v1568_v22 = vmul.f32 %v6680_v21, %v8424_v32  ;;  %v6928_v63 = vpop.f32.mrb[72].mxu0  ;;  %v1584_v0 = vld [vmem:[#allocation2 + $0x48] sm:$0xff] }
 0x182   : > { %1881 = vst.msk [vmem:[#allocation2 + $0x28] sm:$0xff] %vm260_vm2, %v1865_v48  ;;  %v1917_v59 = vmax.f32 %v1915_v54, %v1916_v19  ;;  %v1939_v55 = vsel %vm260_vm2, %v6916_v5, -inf  ;;  %v6926_v62 = vmul.f32 %v6722_v41, %v8425_v34  ;;  %8426 = vst [vmem:[#allocation13_spill] sm:$0xff] %v6928_v63  ;;  %v1672_v61 = vrot.slane %v1671_v11, 4  ;;  %v6932_v54 = vpop.f32.mrb[72].mxu1  ;;  %v6934_v28 = vpop.f32.mrb[73].mxu0 }
 0x183   : > { %v1650_v49 = vmax.f32 %v1648_v7, %v1649_v25  ;;  %v1854_v31 = vld [vmem:[#allocation2 + $0x50] sm:$0xff]  ;;  %v1940_v4 = vmax.f32 %v1938_v52, %v1939_v55  ;;  %v1573_v48 = vmul.f32 %v6576_v10, %v6633_v36  ;;  %8427 = vst [vmem:[#allocation14_spill] sm:$0xff] %v6932_v54  ;;  %8428 = vst [vmem:[#allocation15_spill] sm:$0xff] %v6934_v28  ;;  %v1661_v32 = vsel %vm260_vm2, %v1568_v22, -inf  ;;  %v6938_v34 = vpop.f32.mrb[73].mxu1  ;;  %v6940_v25 = vpop.f32.mrb[74].mxu0 }
 0x184   : > { %v1918_v19 = vrot.slane %v1917_v59, 1  ;;  %v1870_v16 = vmax.f32 %v1854_v31, %v6870_v47  ;;  %v1600_v33 = vmax.f32 %v1584_v0, %v1568_v22  ;;  %v1673_v7 = vmax.f32 %v1671_v11, %v1672_v61  ;;  %v1589_v63 = vld [vmem:[#allocation2 + $0x70] sm:$0xff]  ;;  %v6944_v54 = vpop.f32.mrb[74].mxu1  ;;  %v6946_v28 = vpop.f32.mrb[75].mxu0 }
 0x185   : > { %v1705_v52 = vsel %vm623_vm4, %v1650_v49, %v6848_v44  ;;  %v1941_v55 = vrot.slane %v1940_v4, 4  ;;  %v1662_v10 = vmax.f32 %v1660_v29, %v1661_v32  ;;  %v1930_v22 = vsel %vm260_vm2, %v6926_v62, -inf  ;;  %v6955_v11 = vpop.f32.mrb[75].mxu1 }
 0x186   : > { %v1919_v18 = vmax.f32 %v1917_v59, %v1918_v19  ;;  %1886 = vst.msk [vmem:[#allocation2 + $0x50] sm:$0xff] %vm260_vm2, %v1870_v16  ;;  %1616 = vst.msk [vmem:[#allocation2 + $0x48] sm:$0xff] %vm260_vm2, %v1600_v33  ;;  %v6951_v47 = vsel %vm625_vm5, %v1659_v42, %v1705_v52  ;;  %v1605_v44 = vmax.f32 %v1589_v63, %v1573_v48  ;;  %v1674_v49 = vrot.slane %v1673_v7, 2 }
 0x187   : > { %v1852_v29 = vld [vmem:[#allocation2 + $0x40] sm:$0xff]  ;;  %v1942_v31 = vmax.f32 %v1940_v4, %v1941_v55  ;;  %v1663_v61 = vrot.slane %v1662_v10, 4  ;;  %v1931_v0 = vmax.f32 %v1929_v57, %v1930_v22  ;;  %v1687_v42 = vsel %vm260_vm2, %v1573_v48, -inf }
 0x188   : > { %v1974_v59 = vsel %vm623_vm4, %v1919_v18, %v6873_v56  ;;  %v1868_v19 = vmax.f32 %v1852_v29, %v6891_v2  ;;  %v1855_v16 = vld [vmem:[#allocation2 + $0x58] sm:$0xff]  ;;  %1621 = vst.msk [vmem:[#allocation2 + $0x70] sm:$0xff] %vm260_vm2, %v1605_v44  ;;  %v1842_v63 = vmul.f32 %v6590_v6, %v6733_v43  ;;  %v1675_v33 = vmax.f32 %v1673_v7, %v1674_v49  ;;  %v1587_v7 = vld [vmem:[#allocation2 + $0x60] sm:$0xff] }
 0x189   : > { %v1871_v32 = vmax.f32 %v1855_v16, %v6916_v5  ;;  %v1943_v52 = vrot.slane %v1942_v31, 2  ;;  %v1664_v4 = vmax.f32 %v1662_v10, %v1663_v61  ;;  %v1932_v57 = vrot.slane %v1931_v0, 4  ;;  %v6972_v48 = vpop.f32.mrb[76].mxu0  ;;  %v1590_v16 = vld [vmem:[#allocation2 + $0x78] sm:$0xff] }
 0x18a   : > { %1884 = vst.msk [vmem:[#allocation2 + $0x40] sm:$0xff] %vm260_vm2, %v1868_v19  ;;  %v6967_v18 = vsel %vm625_vm5, %v1928_v39, %v1974_v59  ;;  %v1956_v56 = vsel %vm260_vm2, %v1842_v63, -inf  ;;  %v1571_v2 = vmul.f32 %v6633_v36, %v6592_v15  ;;  %v1676_v55 = vrot.slane %v1675_v33, 1  ;;  %v6979_v22 = vpop.f32.mrb[76].mxu1  ;;  %v6981_v39 = vpop.f32.mrb[77].mxu0 }
 0x18b   : > { %1887 = vst.msk [vmem:[#allocation2 + $0x58] sm:$0xff] %vm260_vm2, %v1871_v32  ;;  %v1944_v6 = vmax.f32 %v1942_v31, %v1943_v52  ;;  %v1665_v5 = vrot.slane %v1664_v4, 2  ;;  %v6977_v10 = vmul.f32 %v6733_v43, %v6595_v45  ;;  %v1933_v44 = vmax.f32 %v1931_v0, %v1932_v57  ;;  %v6986_v49 = vpop.f32.mrb[77].mxu1  ;;  %v6988_v31 = vpop.f32.mrb[78].mxu0 }
 0x18c   : > { %v1603_v29 = vmax.f32 %v1587_v7, %v1571_v2  ;;  %v1678_v15 = vsel %vm260_vm2, %v1571_v2, -inf  ;;  %v1574_v36 = vmul.f32 %v6597_v46, %v6680_v21  ;;  %8429 = vst [vmem:[#allocation40_spill] sm:$0xff] %v6986_v49  ;;  %8430 = vst [vmem:[#allocation41_spill] sm:$0xff] %v6988_v31  ;;  %v1677_v61 = vmax.f32 %v1675_v33, %v1676_v55  ;;  %v6992_v32 = vpop.f32.mrb[78].mxu1  ;;  %v6994_v0 = vpop.f32.mrb[79].mxu0  ;;  %v8432_v31 = vld [vmem:[#allocation16_spill] sm:$0xff] }
 0x18d   : > { %v1945_v59 = vrot.slane %v1944_v6, 1  ;;  %v1666_v19 = vmax.f32 %v1664_v4, %v1665_v5  ;;  %v1853_v45 = vld [vmem:[#allocation2 + $0x48] sm:$0xff]  ;;  %v1947_v43 = vsel %vm260_vm2, %v6977_v10, -inf  ;;  %8431 = vst [vmem:[#allocation42_spill] sm:$0xff] %v6994_v0  ;;  %v1934_v57 = vrot.slane %v1933_v44, 2  ;;  %v6999_v33 = vpop.f32.mrb[79].mxu1 }
 0x18e   : > { %v1869_v52 = vmax.f32 %v1853_v45, %v6926_v62  ;;  %1619 = vst.msk [vmem:[#allocation2 + $0x60] sm:$0xff] %vm260_vm2, %v1603_v29  ;;  %v1606_v46 = vmax.f32 %v1590_v16, %v1574_v36  ;;  %v1688_v2 = vsel %vm260_vm2, %v1574_v36, -inf  ;;  %v7003_v49 = vmul.f32 %v8432_v31, %v6722_v41  ;;  %v8433_v29 = vld [vmem:[#allocation17_spill] sm:$0xff]  ;;  %v1588_v31 = vld [vmem:[#allocation2 + $0x68] sm:$0xff] }
 0x18f   : > { %v1946_v4 = vmax.f32 %v1944_v6, %v1945_v59  ;;  %v1667_v55 = vrot.slane %v1666_v19, 1  ;;  %v1858_v5 = vld [vmem:[#allocation2 + $0x70] sm:$0xff]  ;;  %v1689_v7 = vmax.f32 %v1687_v42, %v1688_v2  ;;  %v1935_v0 = vmax.f32 %v1933_v44, %v1934_v57 }
 0x190   : > { %1885 = vst.msk [vmem:[#allocation2 + $0x48] sm:$0xff] %vm260_vm2, %v1869_v52  ;;  %v1874_v62 = vmax.f32 %v1858_v5, %v1842_v63  ;;  %1622 = vst.msk [vmem:[#allocation2 + $0x78] sm:$0xff] %vm260_vm2, %v1606_v46  ;;  %v1572_v45 = vmul.f32 %v6680_v21, %v8433_v29  ;;  %v7011_v36 = vmul.f32 %v6722_v41, %v6612_v50  ;;  %v1957_v42 = vsel %vm260_vm2, %v7003_v49, -inf  ;;  %v7017_v21 = vpop.permute.xlu1 %2090  ;;  %v1846_v50 = vld [vmem:[#allocation2 + $0x10] sm:$0xff] }
 0x191   : > { %v1668_v6 = vmax.f32 %v1666_v19, %v1667_v55  ;;  %v1690_v59 = vrot.slane %v1689_v7, 4  ;;  %v1936_v16 = vrot.slane %v1935_v0, 1  ;;  %v1958_v63 = vmax.f32 %v1956_v56, %v1957_v42  ;;  %v7024_v55 = vld [vmem:[%s5745_s29 + $0x8] sm:$0xff]  ;;  %v7028_v56 = vld [vmem:[%s5745_s29] sm:$0xff] }
 0x192   : > { %1890 = vst.msk [vmem:[#allocation2 + $0x70] sm:$0xff] %vm260_vm2, %v1874_v62  ;;  %v1604_v44 = vmax.f32 %v1588_v31, %v1572_v45  ;;  %v1679_v52 = vsel %vm260_vm2, %v1572_v45, -inf  ;;  %v5690_v57 = vmov 14   ;;  %v1948_v2 = vsel %vm260_vm2, %v7011_v36, -inf }
 0x193   : > { %5590 = vset.pattern.permute.xlu1 %v5690_v57  ;;  %5589 = vset.pattern.permute.xlu0 %v5690_v57  ;;  %v1707_v41 = vsel %vm627_vm6, %v1668_v6, %v6951_v47  ;;  %v1691_v19 = vmax.f32 %v1689_v7, %v1690_v59  ;;  %v1680_v46 = vmax.f32 %v1678_v15, %v1679_v52  ;;  %v1959_v62 = vrot.slane %v1958_v63, 4 }
 0x194   : > { %4246 = vperm.xlu1 %5590, %v7024_v55   ;;  %4242 = vperm.xlu0 %5589, %v7028_v56   ;;  %v1937_v5 = vmax.f32 %v1935_v0, %v1936_v16  ;;  %1620 = vst.msk [vmem:[#allocation2 + $0x68] sm:$0xff] %vm260_vm2, %v1604_v44  ;;  %v7033_v29 = vsel %vm629_vm7, %v1677_v61, %v1707_v41  ;;  %v7043_v44 = vpop.permute.xlu0 %2094  ;;  %v1847_v61 = vld [vmem:[#allocation2 + $0x18] sm:$0xff] }
 0x195   : > { %v1949_v47 = vmax.f32 %v1947_v43, %v1948_v2  ;;  %v1856_v15 = vld [vmem:[#allocation2 + $0x60] sm:$0xff]  ;;  %v1692_v7 = vrot.slane %v1691_v19, 2  ;;  %v1681_v45 = vrot.slane %v1680_v46, 4  ;;  %v1862_v6 = vmax.f32 %v1846_v50, %v6766_v23 }
 0x196   : > { %v7038_v59 = vmul.f32 %v6635_v1, %v7017_v21  ;;  %v1976_v42 = vsel %vm627_vm6, %v1937_v5, %v6967_v18  ;;  %v1872_v0 = vmax.f32 %v1856_v15, %v6977_v10  ;;  %v1960_v31 = vmax.f32 %v1958_v63, %v1959_v62  ;;  %v7053_v63 = vpop.permute.xlu1 %2359  ;;  %v2113_v2 = vld [vmem:[#allocation2] sm:$0xff] }
 0x197   : > { %v1950_v16 = vrot.slane %v1949_v47, 4  ;;  %v1693_v43 = vmax.f32 %v1691_v19, %v1692_v7  ;;  %v1859_v52 = vld [vmem:[#allocation2 + $0x78] sm:$0xff]  ;;  %v1682_v57 = vmax.f32 %v1680_v46, %v1681_v45  ;;  %v7046_v41 = vsel %vm629_vm7, %v1946_v4, %v1976_v42  ;;  %1878 = vst.msk [vmem:[#allocation2 + $0x10] sm:$0xff] %vm260_vm2, %v1862_v6  ;;  %v7057_v19 = vpop.f32.mrb[80].mxu0 }
 0x198   : > { %v2171_v1 = vsel %vm260_vm2, %v7038_v59, -inf  ;;  %1888 = vst.msk [vmem:[#allocation2 + $0x60] sm:$0xff] %vm260_vm2, %v1872_v0  ;;  %v1875_v23 = vmax.f32 %v1859_v52, %v7003_v49  ;;  %v1961_v18 = vrot.slane %v1960_v31, 2  ;;  %v2097_v50 = vmul.f32 %v7017_v21, %v6639_v14  ;;  %v7064_v15 = vpop.f32.mrb[81].mxu0  ;;  %v7066_v49 = vpop.f32.mrb[80].mxu1 }
 0x199   : > { %v1951_v10 = vmax.f32 %v1949_v47, %v1950_v16  ;;  %v1694_v4 = vrot.slane %v1693_v43, 1  ;;  %v1683_v46 = vrot.slane %v1682_v57, 2  ;;  %v1863_v5 = vmax.f32 %v1847_v61, %v6742_v8  ;;  %8434 = vst [vmem:[#allocation16_spill] sm:$0xff] %v7066_v49  ;;  %v7070_v6 = vpop.f32.mrb[82].mxu0  ;;  %v7072_v42 = vpop.f32.mrb[81].mxu1  ;;  %v8437_v61 = vld [vmem:[#allocation18_spill] sm:$0xff] }
 0x19a   : > { %v7062_v62 = vmul.f32 %v6649_v60, %v7043_v44  ;;  %1891 = vst.msk [vmem:[#allocation2 + $0x78] sm:$0xff] %vm260_vm2, %v1875_v23  ;;  %v1962_v47 = vmax.f32 %v1960_v31, %v1961_v18  ;;  %v2129_v14 = vmax.f32 %v2113_v2, %v2097_v50  ;;  %v2162_v45 = vsel %vm260_vm2, %v2097_v50, -inf  ;;  %8435 = vst [vmem:[#allocation17_spill] sm:$0xff] %v7070_v6  ;;  %v7081_v31 = vpop.f32.mrb[83].mxu0  ;;  %v7083_v23 = vpop.f32.mrb[82].mxu1 }
 0x19b   : > { %v1952_v7 = vrot.slane %v1951_v10, 2  ;;  %8436 = vst [vmem:[#allocation43_spill] sm:$0xff] %v7072_v42  ;;  %v1695_v8 = vmax.f32 %v1693_v43, %v1694_v4  ;;  %v1684_v0 = vmax.f32 %v1682_v57, %v1683_v46  ;;  %v1857_v16 = vld [vmem:[#allocation2 + $0x68] sm:$0xff]  ;;  %1879 = vst.msk [vmem:[#allocation2 + $0x18] sm:$0xff] %vm260_vm2, %v1863_v5  ;;  %v7079_v52 = vmul.f32 %v8437_v61, %v7053_v63  ;;  %v8440_v46 = vld [vmem:[#allocation20_spill] sm:$0xff]  ;;  %v7093_v49 = vpop.f32.mrb[83].mxu1 }
 0x19c   : > { %v2172_v60 = vsel %vm260_vm2, %v7062_v62, -inf  ;;  %8438 = vst [vmem:[#allocation18_spill] sm:$0xff] %v7081_v31  ;;  %8439 = vst [vmem:[#allocation44_spill] sm:$0xff] %v7083_v23  ;;  %v1963_v18 = vrot.slane %v1962_v47, 1  ;;  %v1873_v50 = vmax.f32 %v1857_v16, %v7011_v36  ;;  %v2098_v5 = vmul.f32 %v7043_v44, %v8440_v46  ;;  %v8441_v61 = vld [vmem:[#allocation19_spill] sm:$0xff] }
 0x19d   : > { %v1953_v2 = vmax.f32 %v1951_v10, %v1952_v7  ;;  %2145 = vst.msk [vmem:[#allocation2] sm:$0xff] %vm260_vm2, %v2129_v14  ;;  %v2173_v43 = vmax.f32 %v2171_v1, %v2172_v60  ;;  %v1685_v57 = vrot.slane %v1684_v0, 1  ;;  %v2440_v4 = vsel %vm260_vm2, %v7079_v52, -inf  ;;  %8442 = vst [vmem:[#allocation20_spill] sm:$0xff] %v7093_v49  ;;  %v2114_v14 = vld [vmem:[#allocation2 + $0x8] sm:$0xff]  ;;  %v7096_v1 = vpop.permute.xlu1 %2363 }
 0x19e   : > { %v2366_v42 = vmul.f32 %v7053_v63, %v8441_v61  ;;  %v1964_v23 = vmax.f32 %v1962_v47, %v1963_v18  ;;  %1889 = vst.msk [vmem:[#allocation2 + $0x68] sm:$0xff] %vm260_vm2, %v1873_v50  ;;  %v2115_v10 = vld [vmem:[#allocation2 + $0x10] sm:$0xff]  ;;  %v2130_v31 = vmax.f32 %v2114_v14, %v2098_v5  ;;  %v2163_v46 = vsel %vm260_vm2, %v2098_v5, -inf  ;;  %v7103_v50 = vpop.f32.mrb[84].mxu0 }
 0x19f   : > { %v1954_v36 = vrot.slane %v1953_v2, 1  ;;  %v2174_v7 = vrot.slane %v2173_v43, 4  ;;  %v1686_v16 = vmax.f32 %v1684_v0, %v1685_v57  ;;  %v2131_v60 = vmax.f32 %v2115_v10, %v7038_v59  ;;  %v7105_v0 = vpop.f32.mrb[84].mxu1 }
 0x1a0   : > { %v5691_v6 = vmov 15   ;;  %v2164_v47 = vmax.f32 %v2162_v45, %v2163_v46  ;;  %v2431_v18 = vsel %vm260_vm2, %v2366_v42, -inf  ;;  %2146 = vst.msk [vmem:[#allocation2 + $0x8] sm:$0xff] %vm260_vm2, %v2130_v31 }
 0x1a1   : > { %5591 = vset.pattern.permute.xlu1 %v5691_v6  ;;  %5592 = vset.pattern.permute.xlu0 %v5691_v6  ;;  %v1955_v61 = vmax.f32 %v1953_v2, %v1954_v36  ;;  %v2175_v49 = vmax.f32 %v2173_v43, %v2174_v7  ;;  %v1709_v59 = vsel %vm631_vm8, %v1686_v16, %v7033_v29  ;;  %v8443_v6 = vld [vmem:[#allocation21_spill] sm:$0xff]  ;;  %v7121_v2 = vpop.f32.mrb[85].mxu0  ;;  %v7123_v43 = vpop.f32.mrb[85].mxu1 }
 0x1a2   : > { %4511 = vperm.xlu1 %5591, %v7028_v56   ;;  %4515 = vperm.xlu0 %5592, %v7024_v55   ;;  %2147 = vst.msk [vmem:[#allocation2 + $0x10] sm:$0xff] %vm260_vm2, %v2131_v60  ;;  %v7113_v45 = vmul.f32 %v8443_v6, %v7096_v1  ;;  %v7117_v56 = vmul.f32 %v7096_v1, %v6665_v27  ;;  %8444 = vst [vmem:[#allocation19_spill] sm:$0xff] %v7123_v43  ;;  %v1623_v29 = vld [vmem:[#allocation3] sm:$0xff]  ;;  %v2116_v5 = vld [vmem:[#allocation2 + $0x18] sm:$0xff]  ;;  %v2165_v10 = vrot.slane %v2164_v47, 4  ;;  %v7128_v7 = vpop.f32.mrb[86].mxu0 }
 0x1a3   : > { %v2103_v55 = vmul.f32 %v6682_v40, %v7017_v21  ;;  %v1710_v57 = vsel %vm633_vm9, %v1695_v8, %v1709_v59  ;;  %v1978_v31 = vsel %vm631_vm8, %v1955_v61, %v7046_v41  ;;  %v2176_v36 = vrot.slane %v2175_v49, 2  ;;  %8445 = vst [vmem:[#allocation21_spill] sm:$0xff] %v7128_v7  ;;  %v7130_v27 = vpop.f32.mrb[86].mxu1  ;;  %v7138_v46 = vpop.f32.mrb[87].mxu0  ;;  %v2119_v43 = vld [vmem:[#allocation2 + $0x30] sm:$0xff] }
 0x1a4   : > { %v1712_v14 = vadd.f32 %v1710_v57, %v1623_v29  ;;  %v7133_v40 = vsel %vm633_vm9, %v1964_v23, %v1978_v31  ;;  %v2132_v16 = vmax.f32 %v2116_v5, %v7062_v62  ;;  %v2382_v60 = vld [vmem:[#allocation2] sm:$0xff]  ;;  %v2441_v8 = vsel %vm260_vm2, %v7113_v45, -inf  ;;  %v7140_v41 = vpop.f32.mrb[87].mxu1 }
 0x1a5   : > { %8446 = vst [vmem:[#allocation45_spill] sm:$0xff] %v7140_v41  ;;  %v2177_v61 = vmax.f32 %v2175_v49, %v2176_v36  ;;  %v2166_v59 = vmax.f32 %v2164_v47, %v2165_v10  ;;  %v2398_v6 = vmax.f32 %v2382_v60, %v2366_v42  ;;  %v2442_v7 = vmax.f32 %v2440_v4, %v2441_v8  ;;  %v2117_v60 = vld [vmem:[#allocation2 + $0x20] sm:$0xff]  ;;  %v7163_v8 = vpop.f32.mrb[88].mxu0 }
 0x1a6   : > { %1713 = vst.msk [vmem:[#allocation3] sm:$0xff] %vm260_vm2, %v1712_v14  ;;  %2148 = vst.msk [vmem:[#allocation2 + $0x18] sm:$0xff] %vm260_vm2, %v2132_v16  ;;  %v2432_v62 = vsel %vm260_vm2, %v7117_v56, -inf  ;;  %v2135_v23 = vmax.f32 %v2119_v43, %v2103_v55  ;;  %v2189_v29 = vsel %vm260_vm2, %v2103_v55, -inf  ;;  %v7149_v57 = vmul.f32 %v6684_v20, %v7053_v63  ;;  %v7170_v41 = vpop.f32.mrb[89].mxu0 }
 0x1a7   : > { %v2178_v31 = vrot.slane %v2177_v61, 1  ;;  %v2167_v49 = vrot.slane %v2166_v59, 2  ;;  %2414 = vst.msk [vmem:[#allocation2] sm:$0xff] %vm260_vm2, %v2398_v6  ;;  %v2433_v42 = vmax.f32 %v2431_v18, %v2432_v62  ;;  %v2443_v4 = vrot.slane %v2442_v7, 4  ;;  %v2383_v18 = vld [vmem:[#allocation2 + $0x8] sm:$0xff]  ;;  %v7165_v6 = vpop.f32.mrb[88].mxu1 }
 0x1a8   : > { %2151 = vst.msk [vmem:[#allocation2 + $0x30] sm:$0xff] %vm260_vm2, %v2135_v23  ;;  %v2458_v47 = vsel %vm260_vm2, %v7149_v57, -inf  ;;  %v2101_v43 = vmul.f32 %v7017_v21, %v6686_v13  ;;  %v7159_v55 = vmul.f32 %v7053_v63, %v6698_v9  ;;  %v2104_v20 = vmul.f32 %v6700_v26, %v7043_v44  ;;  %8447 = vst [vmem:[#allocation46_spill] sm:$0xff] %v7165_v6  ;;  %v7172_v26 = vpop.f32.mrb[89].mxu1 }
 0x1a9   : > { %v2179_v5 = vmax.f32 %v2177_v61, %v2178_v31  ;;  %v2384_v36 = vld [vmem:[#allocation2 + $0x10] sm:$0xff]  ;;  %v2168_v10 = vmax.f32 %v2166_v59, %v2167_v49  ;;  %v2434_v14 = vrot.slane %v2433_v42, 4  ;;  %v2444_v16 = vmax.f32 %v2442_v7, %v2443_v4  ;;  %v2120_v49 = vld [vmem:[#allocation2 + $0x38] sm:$0xff]  ;;  %v7176_v4 = vpop.f32.mrb[90].mxu0  ;;  %v7178_v6 = vpop.f32.mrb[90].mxu1 }
 0x1aa   : > { %v2400_v13 = vmax.f32 %v2384_v36, %v7079_v52  ;;  %v2399_v62 = vmax.f32 %v2383_v18, %v7117_v56  ;;  %v2133_v9 = vmax.f32 %v2117_v60, %v2101_v43  ;;  %v2180_v23 = vsel %vm260_vm2, %v2101_v43, -inf  ;;  %8448 = vst [vmem:[#allocation47_spill] sm:$0xff] %v7176_v4  ;;  %8449 = vst [vmem:[#allocation48_spill] sm:$0xff] %v7178_v6  ;;  %v7190_v36 = vpop.f32.mrb[91].mxu0  ;;  %v7192_v18 = vpop.f32.mrb[91].mxu1 }
 0x1ab   : > { %v2169_v61 = vrot.slane %v2168_v10, 1  ;;  %v2435_v59 = vmax.f32 %v2433_v42, %v2434_v14  ;;  %v2445_v31 = vrot.slane %v2444_v16, 2  ;;  %v2449_v7 = vsel %vm260_vm2, %v7159_v55, -inf  ;;  %8450 = vst [vmem:[#allocation49_spill] sm:$0xff] %v7190_v36  ;;  %8451 = vst [vmem:[#allocation50_spill] sm:$0xff] %v7192_v18 }
 0x1ac   : > { %2416 = vst.msk [vmem:[#allocation2 + $0x10] sm:$0xff] %vm260_vm2, %v2400_v13  ;;  %2415 = vst.msk [vmem:[#allocation2 + $0x8] sm:$0xff] %vm260_vm2, %v2399_v62  ;;  %v2136_v52 = vmax.f32 %v2120_v49, %v2104_v20  ;;  %v2190_v56 = vsel %vm260_vm2, %v2104_v20, -inf  ;;  %v7186_v42 = vmul.f32 %v6706_v30, %v7096_v1  ;;  %v2102_v43 = vmul.f32 %v7043_v44, %v6708_v51 }
 0x1ad   : > { %2149 = vst.msk [vmem:[#allocation2 + $0x20] sm:$0xff] %vm260_vm2, %v2133_v9  ;;  %v1892_v14 = vld [vmem:[#allocation3] sm:$0xff]  ;;  %v2170_v60 = vmax.f32 %v2168_v10, %v2169_v61  ;;  %v2436_v13 = vrot.slane %v2435_v59, 2  ;;  %v2446_v62 = vmax.f32 %v2444_v16, %v2445_v31  ;;  %v2191_v6 = vmax.f32 %v2189_v29, %v2190_v56  ;;  %v2118_v9 = vld [vmem:[#allocation2 + $0x28] sm:$0xff] }
 0x1ae   : > { %v1981_v49 = vadd.f32 %v7133_v40, %v1892_v14  ;;  %2152 = vst.msk [vmem:[#allocation2 + $0x38] sm:$0xff] %vm260_vm2, %v2136_v52  ;;  %v2459_v30 = vsel %vm260_vm2, %v7186_v42, -inf  ;;  %v2134_v20 = vmax.f32 %v2118_v9, %v2102_v43  ;;  %v2181_v51 = vsel %vm260_vm2, %v2102_v43, -inf }
 0x1af   : > { %v7200_v36 = vsel %vm621_vm3, %v2179_v5, %v2170_v60  ;;  %v2437_v18 = vmax.f32 %v2435_v59, %v2436_v13  ;;  %v2447_v4 = vrot.slane %v2446_v62, 1  ;;  %v2388_v10 = vld [vmem:[#allocation2 + $0x30] sm:$0xff]  ;;  %v2192_v61 = vrot.slane %v2191_v6, 4 }
 0x1b0   : > { %1982 = vst.msk [vmem:[#allocation3] sm:$0xff] %vm260_vm2, %v1981_v49  ;;  %v2404_v29 = vmax.f32 %v2388_v10, %v7149_v57  ;;  %v2460_v40 = vmax.f32 %v2458_v47, %v2459_v30  ;;  %2150 = vst.msk [vmem:[#allocation2 + $0x28] sm:$0xff] %vm260_vm2, %v2134_v20  ;;  %v2182_v16 = vmax.f32 %v2180_v23, %v2181_v51  ;;  %v2123_v57 = vld [vmem:[#allocation2 + $0x50] sm:$0xff]  ;;  %v7215_v23 = vpop.f32.mrb[92].mxu0 }
 0x1b1   : > { %v2371_v31 = vmul.f32 %v7096_v1, %v6713_v53  ;;  %v2438_v52 = vrot.slane %v2437_v18, 1  ;;  %v2448_v56 = vmax.f32 %v2446_v62, %v2447_v4  ;;  %v2193_v43 = vmax.f32 %v2191_v6, %v2192_v61  ;;  %v7217_v53 = vpop.f32.mrb[92].mxu1  ;;  %v7219_v9 = vpop.f32.mrb[93].mxu0 }
 0x1b2   : > { %v2107_v5 = vmul.f32 %v6735_v12, %v7017_v21  ;;  %2420 = vst.msk [vmem:[#allocation2 + $0x30] sm:$0xff] %vm260_vm2, %v2404_v29  ;;  %v2461_v59 = vrot.slane %v2460_v40, 4  ;;  %v2183_v14 = vrot.slane %v2182_v16, 4  ;;  %v7213_v47 = vmul.f32 %v6744_v58, %v7053_v63  ;;  %v7221_v49 = vpop.f32.mrb[93].mxu1  ;;  %v7225_v10 = vpop.f32.mrb[94].mxu0 }
 0x1b3   : > { %v2450_v60 = vsel %vm260_vm2, %v2371_v31, -inf  ;;  %v2439_v4 = vmax.f32 %v2437_v18, %v2438_v52  ;;  %v2194_v13 = vrot.slane %v2193_v43, 2  ;;  %8452 = vst [vmem:[#allocation51_spill] sm:$0xff] %v7225_v10 }
 0x1b4   : > { %v2386_v6 = vld [vmem:[#allocation2 + $0x20] sm:$0xff]  ;;  %v2451_v62 = vmax.f32 %v2449_v7, %v2450_v60  ;;  %v2139_v12 = vmax.f32 %v2123_v57, %v2107_v5  ;;  %v2462_v20 = vmax.f32 %v2460_v40, %v2461_v59  ;;  %v2184_v51 = vmax.f32 %v2182_v16, %v2183_v14  ;;  %v7233_v60 = vpop.f32.mrb[94].mxu1 }
 0x1b5   : > { %v2402_v30 = vmax.f32 %v2386_v6, %v7159_v55  ;;  %v2207_v58 = vsel %vm260_vm2, %v2107_v5, -inf  ;;  %v7228_v61 = vsel %vm621_vm3, %v2448_v56, %v2439_v4  ;;  %v2195_v18 = vmax.f32 %v2193_v43, %v2194_v13  ;;  %v2389_v29 = vld [vmem:[#allocation2 + $0x38] sm:$0xff]  ;;  %8453 = vst [vmem:[#allocation52_spill] sm:$0xff] %v7233_v60  ;;  %v7239_v5 = vpop.f32.mrb[95].mxu0  ;;  %v2121_v57 = vld [vmem:[#allocation2 + $0x40] sm:$0xff] }
 0x1b6   : > { %v2452_v52 = vrot.slane %v2451_v62, 4  ;;  %2155 = vst.msk [vmem:[#allocation2 + $0x50] sm:$0xff] %vm260_vm2, %v2139_v12  ;;  %v2476_v7 = vsel %vm260_vm2, %v7213_v47, -inf  ;;  %v2405_v55 = vmax.f32 %v2389_v29, %v7186_v42  ;;  %v2463_v40 = vrot.slane %v2462_v20, 2  ;;  %8454 = vst [vmem:[#allocation53_spill] sm:$0xff] %v7239_v5 }
 0x1b7   : > { %2418 = vst.msk [vmem:[#allocation2 + $0x20] sm:$0xff] %vm260_vm2, %v2402_v30  ;;  %v2185_v16 = vrot.slane %v2184_v51, 2  ;;  %v2105_v56 = vmul.f32 %v7017_v21, %v6746_v17  ;;  %v2196_v43 = vrot.slane %v2195_v18, 1  ;;  %v2387_v59 = vld [vmem:[#allocation2 + $0x28] sm:$0xff]  ;;  %v7243_v4 = vmul.f32 %v7053_v63, %v6752_v3  ;;  %v7248_v17 = vpop.f32.mrb[95].mxu1  ;;  %v2124_v3 = vld [vmem:[#allocation2 + $0x58] sm:$0xff] }
 0x1b8   : > { %v2453_v14 = vmax.f32 %v2451_v62, %v2452_v52  ;;  %v2108_v6 = vmul.f32 %v6754_v35, %v7043_v44  ;;  %2421 = vst.msk [vmem:[#allocation2 + $0x38] sm:$0xff] %vm260_vm2, %v2405_v55  ;;  %v2464_v42 = vmax.f32 %v2462_v20, %v2463_v40  ;;  %v2403_v12 = vmax.f32 %v2387_v59, %v2371_v31  ;;  %v8456_v40 = vld [vmem:[#allocation23_spill] sm:$0xff] }
 0x1b9   : > { %v2186_v13 = vmax.f32 %v2184_v51, %v2185_v16  ;;  %v2137_v30 = vmax.f32 %v2121_v57, %v2105_v56  ;;  %v2197_v29 = vmax.f32 %v2195_v18, %v2196_v43  ;;  %v2198_v62 = vsel %vm260_vm2, %v2105_v56, -inf  ;;  %v8455_v18 = vld [vmem:[#allocation22_spill] sm:$0xff]  ;;  %v8457_v57 = vld [vmem:[#allocation24_spill] sm:$0xff] }
 0x1ba   : > { %v2454_v5 = vrot.slane %v2453_v14, 2  ;;  %v2467_v52 = vsel %vm260_vm2, %v7243_v4, -inf  ;;  %v2465_v60 = vrot.slane %v2464_v42, 1  ;;  %2419 = vst.msk [vmem:[#allocation2 + $0x28] sm:$0xff] %vm260_vm2, %v2403_v12  ;;  %v2140_v35 = vmax.f32 %v2124_v3, %v2108_v6  ;;  %v2122_v3 = vld [vmem:[#allocation2 + $0x48] sm:$0xff] }
 0x1bb   : > { %v2187_v10 = vrot.slane %v2186_v13, 1  ;;  %2153 = vst.msk [vmem:[#allocation2 + $0x40] sm:$0xff] %vm260_vm2, %v2137_v30  ;;  %v2208_v31 = vsel %vm260_vm2, %v2108_v6, -inf  ;;  %v2377_v55 = vmul.f32 %v8455_v18, %v7096_v1  ;;  %v2106_v16 = vmul.f32 %v7043_v44, %v8456_v40 }
 0x1bc   : > { %v2455_v20 = vmax.f32 %v2453_v14, %v2454_v5  ;;  %v2209_v51 = vmax.f32 %v2207_v58, %v2208_v31  ;;  %v2466_v56 = vmax.f32 %v2464_v42, %v2465_v60  ;;  %2156 = vst.msk [vmem:[#allocation2 + $0x58] sm:$0xff] %vm260_vm2, %v2140_v35  ;;  %v7263_v12 = vmul.f32 %v7096_v1, %v8457_v57 }
 0x1bd   : > { %v2188_v43 = vmax.f32 %v2186_v13, %v2187_v10  ;;  %v2392_v59 = vld [vmem:[#allocation2 + $0x50] sm:$0xff]  ;;  %v2111_v6 = vmul.f32 %v6781_v24, %v7017_v21  ;;  %v2477_v30 = vsel %vm260_vm2, %v2377_v55, -inf  ;;  %v2138_v42 = vmax.f32 %v2122_v3, %v2106_v16 }
 0x1be   : > { %v2456_v5 = vrot.slane %v2455_v20, 1  ;;  %v2408_v58 = vmax.f32 %v2392_v59, %v7213_v47  ;;  %v2210_v14 = vrot.slane %v2209_v51, 4  ;;  %v2478_v60 = vmax.f32 %v2476_v7, %v2477_v30  ;;  %v2127_v47 = vld [vmem:[#allocation2 + $0x70] sm:$0xff] }
 0x1bf   : > { %v2243_v10 = vsel %vm623_vm4, %v2188_v43, %v7200_v36  ;;  %v2199_v13 = vsel %vm260_vm2, %v2106_v16, -inf  ;;  %2154 = vst.msk [vmem:[#allocation2 + $0x48] sm:$0xff] %vm260_vm2, %v2138_v42  ;;  %v2468_v59 = vsel %vm260_vm2, %v7263_v12, -inf  ;;  %v2143_v36 = vmax.f32 %v2127_v47, %v2111_v6  ;;  %v8459_v42 = vld [vmem:[#allocation26_spill] sm:$0xff] }
 0x1c0   : > { %v2457_v35 = vmax.f32 %v2455_v20, %v2456_v5  ;;  %2424 = vst.msk [vmem:[#allocation2 + $0x50] sm:$0xff] %vm260_vm2, %v2408_v58  ;;  %v2211_v31 = vmax.f32 %v2209_v51, %v2210_v14  ;;  %v2200_v18 = vmax.f32 %v2198_v62, %v2199_v13  ;;  %v7274_v24 = vsel %vm625_vm5, %v2197_v29, %v2243_v10 }
 0x1c1   : > { %v2479_v40 = vrot.slane %v2478_v60, 4  ;;  %v2225_v7 = vsel %vm260_vm2, %v2111_v6, -inf  ;;  %v2469_v62 = vmax.f32 %v2467_v52, %v2468_v59  ;;  %2159 = vst.msk [vmem:[#allocation2 + $0x70] sm:$0xff] %vm260_vm2, %v2143_v36  ;;  %v2380_v58 = vmul.f32 %v6785_v38, %v7053_v63 }
 0x1c2   : > { %v2512_v20 = vsel %vm623_vm4, %v2457_v35, %v7228_v61  ;;  %v2390_v16 = vld [vmem:[#allocation2 + $0x40] sm:$0xff]  ;;  %v2212_v43 = vrot.slane %v2211_v31, 2  ;;  %v2201_v51 = vrot.slane %v2200_v18, 4  ;;  %v7295_v13 = vmul.f32 %v7053_v63, %v8459_v42 }
 0x1c3   : > { %v2406_v29 = vmax.f32 %v2390_v16, %v7243_v4  ;;  %v2480_v57 = vmax.f32 %v2478_v60, %v2479_v40  ;;  %v7284_v5 = vsel %vm625_vm5, %v2466_v56, %v2512_v20  ;;  %v2393_v6 = vld [vmem:[#allocation2 + $0x58] sm:$0xff]  ;;  %v2470_v3 = vrot.slane %v2469_v62, 4  ;;  %v8458_v61 = vld [vmem:[#allocation25_spill] sm:$0xff]  ;;  %v8460_v40 = vld [vmem:[#allocation27_spill] sm:$0xff] }
 0x1c4   : > { %v2213_v14 = vmax.f32 %v2211_v31, %v2212_v43  ;;  %v2202_v30 = vmax.f32 %v2200_v18, %v2201_v51  ;;  %v2109_v10 = vmul.f32 %v7017_v21, %v8458_v61  ;;  %v2409_v52 = vmax.f32 %v2393_v6, %v2377_v55  ;;  %v2125_v56 = vld [vmem:[#allocation2 + $0x60] sm:$0xff]  ;;  %v2128_v43 = vld [vmem:[#allocation2 + $0x78] sm:$0xff] }
 0x1c5   : > { %2422 = vst.msk [vmem:[#allocation2 + $0x40] sm:$0xff] %vm260_vm2, %v2406_v29  ;;  %v2481_v4 = vrot.slane %v2480_v57, 2  ;;  %v2494_v60 = vsel %vm260_vm2, %v2380_v58, -inf  ;;  %v2471_v31 = vmax.f32 %v2469_v62, %v2470_v3  ;;  %v2485_v55 = vsel %vm260_vm2, %v7295_v13, -inf  ;;  %v8461_v51 = vld [vmem:[#allocation28_spill] sm:$0xff] }
 0x1c6   : > { %v2214_v35 = vrot.slane %v2213_v14, 1  ;;  %v2203_v38 = vrot.slane %v2202_v30, 2  ;;  %v2141_v47 = vmax.f32 %v2125_v56, %v2109_v10  ;;  %2425 = vst.msk [vmem:[#allocation2 + $0x58] sm:$0xff] %vm260_vm2, %v2409_v52  ;;  %v2216_v21 = vsel %vm260_vm2, %v2109_v10, -inf  ;;  %v2391_v16 = vld [vmem:[#allocation2 + $0x48] sm:$0xff] }
 0x1c7   : > { %v2482_v18 = vmax.f32 %v2480_v57, %v2481_v4  ;;  %v2112_v59 = vmul.f32 %v8460_v40, %v7043_v44  ;;  %v2472_v63 = vrot.slane %v2471_v31, 2  ;;  %v7306_v62 = vmul.f32 %v8461_v51, %v7096_v1  ;;  %v7312_v4 = vpop.permute.xlu0 %2628 }
 0x1c8   : > { %v2215_v36 = vmax.f32 %v2213_v14, %v2214_v35  ;;  %v2204_v20 = vmax.f32 %v2202_v30, %v2203_v38  ;;  %2157 = vst.msk [vmem:[#allocation2 + $0x60] sm:$0xff] %vm260_vm2, %v2141_v47  ;;  %v2407_v57 = vmax.f32 %v2391_v16, %v7263_v12  ;;  %v2396_v52 = vld [vmem:[#allocation2 + $0x70] sm:$0xff]  ;;  %v8462_v12 = vld [vmem:[#allocation29_spill] sm:$0xff] }
 0x1c9   : > { %v2483_v29 = vrot.slane %v2482_v18, 1  ;;  %v2144_v6 = vmax.f32 %v2128_v43, %v2112_v59  ;;  %v2226_v3 = vsel %vm260_vm2, %v2112_v59, -inf  ;;  %v2473_v10 = vmax.f32 %v2471_v31, %v2472_v63  ;;  %v2126_v59 = vld [vmem:[#allocation2 + $0x68] sm:$0xff]  ;;  %v7326_v43 = vpop.permute.xlu1 %2632 }
 0x1ca   : > { %v2205_v61 = vrot.slane %v2204_v20, 1  ;;  %v2227_v14 = vmax.f32 %v2225_v7, %v2226_v3  ;;  %v2495_v30 = vsel %vm260_vm2, %v7306_v62, -inf  ;;  %2423 = vst.msk [vmem:[#allocation2 + $0x48] sm:$0xff] %vm260_vm2, %v2407_v57  ;;  %v2412_v42 = vmax.f32 %v2396_v52, %v2380_v58  ;;  %v8463_v7 = vld [vmem:[#allocation30_spill] sm:$0xff]  ;;  %v2653_v57 = vld [vmem:[#allocation2 + $0x10] sm:$0xff]  ;;  %v2385_v52 = vld [vmem:[#allocation2 + $0x18] sm:$0xff] }
 0x1cb   : > { %v2484_v56 = vmax.f32 %v2482_v18, %v2483_v29  ;;  %2160 = vst.msk [vmem:[#allocation2 + $0x78] sm:$0xff] %vm260_vm2, %v2144_v6  ;;  %v2496_v35 = vmax.f32 %v2494_v60, %v2495_v30  ;;  %v2110_v38 = vmul.f32 %v7043_v44, %v8462_v12  ;;  %v2474_v40 = vrot.slane %v2473_v10, 1 }
 0x1cc   : > { %v2206_v47 = vmax.f32 %v2204_v20, %v2205_v61  ;;  %v2228_v31 = vrot.slane %v2227_v14, 4  ;;  %v7320_v16 = vmul.f32 %v7096_v1, %v8463_v7  ;;  %2428 = vst.msk [vmem:[#allocation2 + $0x70] sm:$0xff] %vm260_vm2, %v2412_v42  ;;  %v2637_v60 = vmul.f32 %v6830_v37, %v7312_v4 }
 0x1cd   : > { %v2497_v18 = vrot.slane %v2496_v35, 4  ;;  %v2142_v63 = vmax.f32 %v2126_v59, %v2110_v38  ;;  %v2217_v58 = vsel %vm260_vm2, %v2110_v38, -inf  ;;  %v2475_v20 = vmax.f32 %v2473_v10, %v2474_v40  ;;  %v8465_v40 = vld [vmem:[#allocation7_spill] sm:$0xff] }
 0x1ce   : > { %v2245_v44 = vsel %vm627_vm6, %v2206_v47, %v7274_v24  ;;  %v2229_v51 = vmax.f32 %v2227_v14, %v2228_v31  ;;  %v2218_v29 = vmax.f32 %v2216_v21, %v2217_v58  ;;  %v2486_v61 = vsel %vm260_vm2, %v7320_v16, -inf  ;;  %v7339_v14 = vpop.f32.mrb[96].mxu0 }
 0x1cf   : > { %v2394_v1 = vld [vmem:[#allocation2 + $0x60] sm:$0xff]  ;;  %v2498_v6 = vmax.f32 %v2496_v35, %v2497_v18  ;;  %2158 = vst.msk [vmem:[#allocation2 + $0x68] sm:$0xff] %vm260_vm2, %v2142_v63  ;;  %v7332_v3 = vsel %vm629_vm7, %v2215_v36, %v2245_v44  ;;  %v2669_v37 = vmax.f32 %v2653_v57, %v2637_v60  ;;  %v2514_v30 = vsel %vm627_vm6, %v2475_v20, %v7284_v5  ;;  %v7346_v38 = vpop.f32.mrb[97].mxu0  ;;  %v8466_v63 = vld [vmem:[#allocation31_spill] sm:$0xff]  ;;  %v7361_v57 = vpop.permute.xlu0 %2901 }
 0x1d0   : > { %v2410_v24 = vmax.f32 %v2394_v1, %v7295_v13  ;;  %v2230_v10 = vrot.slane %v2229_v51, 2  ;;  %v2219_v21 = vrot.slane %v2218_v29, 4  ;;  %v2487_v35 = vmax.f32 %v2485_v55, %v2486_v61  ;;  %8464 = vst [vmem:[#allocation22_spill] sm:$0xff] %v7346_v38  ;;  %v2651_v18 = vld [vmem:[#allocation2] sm:$0xff] }
 0x1d1   : > { %v2499_v42 = vrot.slane %v2498_v6, 2  ;;  %v7342_v12 = vsel %vm629_vm7, %v2484_v56, %v2514_v30  ;;  %2685 = vst.msk [vmem:[#allocation2 + $0x10] sm:$0xff] %vm260_vm2, %v2669_v37  ;;  %v2709_v36 = vsel %vm260_vm2, %v2637_v60, -inf  ;;  %v2635_v31 = vmul.f32 %v7312_v4, %v8465_v40  ;;  %v7357_v60 = vpop.permute.xlu1 %2897  ;;  %v8468_v61 = vld [vmem:[#allocation33_spill] sm:$0xff]  ;;  %v8471_v40 = vld [vmem:[#allocation8_spill] sm:$0xff] }
 0x1d2   : > { %2426 = vst.msk [vmem:[#allocation2 + $0x60] sm:$0xff] %vm260_vm2, %v2410_v24  ;;  %v2231_v5 = vmax.f32 %v2229_v51, %v2230_v10  ;;  %v2397_v47 = vld [vmem:[#allocation2 + $0x78] sm:$0xff]  ;;  %v2220_v13 = vmax.f32 %v2218_v29, %v2219_v21  ;;  %v2401_v59 = vmax.f32 %v2385_v52, %v7113_v45  ;;  %v2488_v7 = vrot.slane %v2487_v35, 4  ;;  %v7363_v45 = vpop.f32.mrb[96].mxu1  ;;  %v7370_v52 = vpop.f32.mrb[98].mxu0 }
 0x1d3   : > { %v2413_v55 = vmax.f32 %v2397_v47, %v7306_v62  ;;  %v2500_v56 = vmax.f32 %v2498_v6, %v2499_v42  ;;  %v7355_v58 = vmul.f32 %v8466_v63, %v7326_v43  ;;  %v2667_v51 = vmax.f32 %v2651_v18, %v2635_v31  ;;  %8467 = vst [vmem:[#allocation23_spill] sm:$0xff] %v7363_v45  ;;  %v7372_v30 = vpop.f32.mrb[97].mxu1  ;;  %v2652_v47 = vld [vmem:[#allocation2 + $0x8] sm:$0xff] }
 0x1d4   : > { %v2232_v44 = vrot.slane %v2231_v5, 1  ;;  %v2221_v20 = vrot.slane %v2220_v13, 2  ;;  %v2700_v29 = vsel %vm260_vm2, %v2635_v31, -inf  ;;  %2417 = vst.msk [vmem:[#allocation2 + $0x18] sm:$0xff] %vm260_vm2, %v2401_v59  ;;  %v2489_v1 = vmax.f32 %v2487_v35, %v2488_v7  ;;  %8469 = vst [vmem:[#allocation24_spill] sm:$0xff] %v7370_v52  ;;  %v7379_v31 = vpop.f32.mrb[99].mxu0 }
 0x1d5   : > { %2429 = vst.msk [vmem:[#allocation2 + $0x78] sm:$0xff] %vm260_vm2, %v2413_v55  ;;  %v2501_v62 = vrot.slane %v2500_v56, 1  ;;  %v2710_v6 = vsel %vm260_vm2, %v7355_v58, -inf  ;;  %v2636_v37 = vmul.f32 %v7326_v43, %v8468_v61  ;;  %8470 = vst [vmem:[#allocation25_spill] sm:$0xff] %v7372_v30  ;;  %v7377_v35 = vmul.f32 %v8471_v40, %v7357_v60  ;;  %v7381_v59 = vpop.f32.mrb[98].mxu1  ;;  %v8477_v40 = vld [vmem:[#allocation35_spill] sm:$0xff] }
 0x1d6   : > { %v2233_v24 = vmax.f32 %v2231_v5, %v2232_v44  ;;  %v2222_v10 = vmax.f32 %v2220_v13, %v2221_v20  ;;  %v2395_v21 = vld [vmem:[#allocation2 + $0x68] sm:$0xff]  ;;  %2683 = vst.msk [vmem:[#allocation2] sm:$0xff] %vm260_vm2, %v2667_v51  ;;  %v2711_v42 = vmax.f32 %v2709_v36, %v2710_v6  ;;  %8472 = vst [vmem:[#allocation26_spill] sm:$0xff] %v7379_v31  ;;  %v2490_v18 = vrot.slane %v2489_v1, 2  ;;  %v7384_v5 = vpop.f32.mrb[99].mxu1 }
 0x1d7   : > { %8473 = vst [vmem:[#allocation27_spill] sm:$0xff] %v7381_v59  ;;  %v2502_v55 = vmax.f32 %v2500_v56, %v2501_v62  ;;  %v2411_v7 = vmax.f32 %v2395_v21, %v7320_v16  ;;  %v2668_v63 = vmax.f32 %v2652_v47, %v2636_v37  ;;  %8474 = vst [vmem:[#allocation28_spill] sm:$0xff] %v7384_v5  ;;  %v2701_v36 = vsel %vm260_vm2, %v2636_v37, -inf  ;;  %v8475_v56 = vld [vmem:[#allocation34_spill] sm:$0xff]  ;;  %v8476_v62 = vld [vmem:[#allocation32_spill] sm:$0xff] }
 0x1d8   : > { %v2223_v13 = vrot.slane %v2222_v10, 1  ;;  %v2712_v44 = vrot.slane %v2711_v42, 4  ;;  %v2978_v20 = vsel %vm260_vm2, %v7377_v35, -inf  ;;  %v2491_v51 = vmax.f32 %v2489_v1, %v2490_v18  ;;  %v8478_v5 = vld [vmem:[#allocation9_spill] sm:$0xff] }
 0x1d9   : > { %2427 = vst.msk [vmem:[#allocation2 + $0x68] sm:$0xff] %vm260_vm2, %v2411_v7  ;;  %2684 = vst.msk [vmem:[#allocation2 + $0x8] sm:$0xff] %vm260_vm2, %v2668_v63  ;;  %v2702_v6 = vmax.f32 %v2700_v29, %v2701_v36  ;;  %v7393_v16 = vmul.f32 %v8475_v56, %v7361_v57  ;;  %v2904_v61 = vmul.f32 %v7357_v60, %v8476_v62  ;;  %v7404_v36 = vpop.f32.mrb[100].mxu0  ;;  %v7409_v56 = vpop.f32.mrb[100].mxu1  ;;  %v2161_v62 = vld [vmem:[#allocation3] sm:$0xff] }
 0x1da   : > { %v2224_v21 = vmax.f32 %v2222_v10, %v2223_v13  ;;  %v2713_v47 = vmax.f32 %v2711_v42, %v2712_v44  ;;  %v2905_v37 = vmul.f32 %v7361_v57, %v8477_v40  ;;  %v2641_v59 = vmul.f32 %v8478_v5, %v7312_v4  ;;  %8479 = vst [vmem:[#allocation29_spill] sm:$0xff] %v7404_v36  ;;  %v7411_v5 = vpop.f32.mrb[101].mxu0  ;;  %v7415_v36 = vpop.f32.mrb[101].mxu1 }
 0x1db   : > { %v2492_v7 = vrot.slane %v2491_v51, 1  ;;  %v2654_v1 = vld [vmem:[#allocation2 + $0x18] sm:$0xff]  ;;  %v2703_v18 = vrot.slane %v2702_v6, 4  ;;  %v2979_v29 = vsel %vm260_vm2, %v7393_v16, -inf  ;;  %v2969_v63 = vsel %vm260_vm2, %v2904_v61, -inf  ;;  %8480 = vst [vmem:[#allocation30_spill] sm:$0xff] %v7411_v5 }
 0x1dc   : > { %v2247_v10 = vsel %vm631_vm8, %v2224_v21, %v7332_v3  ;;  %v2670_v42 = vmax.f32 %v2654_v1, %v7355_v58  ;;  %v2714_v13 = vrot.slane %v2713_v47, 2  ;;  %v2980_v44 = vmax.f32 %v2978_v20, %v2979_v29  ;;  %8481 = vst [vmem:[#allocation7_spill] sm:$0xff] %v7415_v36  ;;  %v7417_v38 = vpop.f32.mrb[102].mxu0  ;;  %v2657_v1 = vld [vmem:[#allocation2 + $0x30] sm:$0xff]  ;;  %v7420_v29 = vpop.f32.mrb[102].mxu1 }
 0x1dd   : > { %v2248_v40 = vsel %vm633_vm9, %v2233_v24, %v2247_v10  ;;  %v2493_v30 = vmax.f32 %v2491_v51, %v2492_v7  ;;  %v2704_v31 = vmax.f32 %v2702_v6, %v2703_v18  ;;  %v2920_v45 = vld [vmem:[#allocation2] sm:$0xff]  ;;  %v2970_v52 = vsel %vm260_vm2, %v2905_v37, -inf  ;;  %8482 = vst [vmem:[#allocation31_spill] sm:$0xff] %v7417_v38  ;;  %8483 = vst [vmem:[#allocation33_spill] sm:$0xff] %v7420_v29  ;;  %v7422_v5 = vpop.f32.mrb[103].mxu0  ;;  %v7426_v18 = vpop.f32.mrb[103].mxu1 }
 0x1de   : > { %v2250_v3 = vadd.f32 %v2248_v40, %v2161_v62  ;;  %2686 = vst.msk [vmem:[#allocation2 + $0x18] sm:$0xff] %vm260_vm2, %v2670_v42  ;;  %v2715_v58 = vmax.f32 %v2713_v47, %v2714_v13  ;;  %v2936_v20 = vmax.f32 %v2920_v45, %v2904_v61  ;;  %v2971_v21 = vmax.f32 %v2969_v63, %v2970_v52 }
 0x1df   : > { %8484 = vst [vmem:[#allocation8_spill] sm:$0xff] %v7422_v5  ;;  %v2516_v24 = vsel %vm631_vm8, %v2493_v30, %v7342_v12  ;;  %v2705_v51 = vrot.slane %v2704_v31, 2  ;;  %v2981_v6 = vrot.slane %v2980_v44, 4  ;;  %v2673_v7 = vmax.f32 %v2657_v1, %v2641_v59  ;;  %8485 = vst [vmem:[#allocation34_spill] sm:$0xff] %v7426_v18  ;;  %v8486_v12 = vld [vmem:[#allocation10_spill] sm:$0xff]  ;;  %v8488_v1 = vld [vmem:[#allocation11_spill] sm:$0xff] }
 0x1e0   : > { %2251 = vst.msk [vmem:[#allocation3] sm:$0xff] %vm260_vm2, %v2250_v3  ;;  %v2517_v10 = vsel %vm633_vm9, %v2502_v55, %v2516_v24  ;;  %v2716_v47 = vrot.slane %v2715_v58, 1  ;;  %v2921_v45 = vld [vmem:[#allocation2 + $0x8] sm:$0xff]  ;;  %v2972_v52 = vrot.slane %v2971_v21, 4  ;;  %2952 = vst.msk [vmem:[#allocation2] sm:$0xff] %vm260_vm2, %v2936_v20  ;;  %v2727_v61 = vsel %vm260_vm2, %v2641_v59, -inf }
 0x1e1   : > { %v2706_v63 = vmax.f32 %v2704_v31, %v2705_v51  ;;  %v2937_v42 = vmax.f32 %v2921_v45, %v2905_v37  ;;  %v2982_v13 = vmax.f32 %v2980_v44, %v2981_v6  ;;  %2689 = vst.msk [vmem:[#allocation2 + $0x30] sm:$0xff] %vm260_vm2, %v2673_v7  ;;  %v2910_v30 = vmul.f32 %v8486_v12, %v7357_v60  ;;  %v8487_v3 = vld [vmem:[#allocation36_spill] sm:$0xff]  ;;  %v2655_v37 = vld [vmem:[#allocation2 + $0x20] sm:$0xff]  ;;  %v7445_v6 = vpop.f32.mrb[104].mxu0 }
 0x1e2   : > { %v2717_v62 = vmax.f32 %v2715_v58, %v2716_v47  ;;  %v2973_v40 = vmax.f32 %v2971_v21, %v2972_v52  ;;  %v2639_v55 = vmul.f32 %v7312_v4, %v8487_v3  ;;  %v7439_v24 = vmul.f32 %v7357_v60, %v8488_v1  ;;  %v8489_v44 = vld [vmem:[#allocation12_spill] sm:$0xff]  ;;  %8490 = vst [vmem:[#allocation32_spill] sm:$0xff] %v7445_v6  ;;  %v7447_v58 = vpop.f32.mrb[104].mxu1  ;;  %v8496_v5 = vld [vmem:[#allocation37_spill] sm:$0xff] }
 0x1e3   : > { %v2707_v20 = vrot.slane %v2706_v63, 1  ;;  %2953 = vst.msk [vmem:[#allocation2 + $0x8] sm:$0xff] %vm260_vm2, %v2937_v42  ;;  %v2983_v31 = vrot.slane %v2982_v13, 2  ;;  %v2996_v59 = vsel %vm260_vm2, %v2910_v30, -inf  ;;  %v2642_v51 = vmul.f32 %v8489_v44, %v7326_v43  ;;  %8491 = vst [vmem:[#allocation35_spill] sm:$0xff] %v7447_v58  ;;  %v2658_v52 = vld [vmem:[#allocation2 + $0x38] sm:$0xff] }
 0x1e4   : > { %v2974_v21 = vrot.slane %v2973_v40, 2  ;;  %v2671_v7 = vmax.f32 %v2655_v37, %v2639_v55  ;;  %v2718_v47 = vsel %vm260_vm2, %v2639_v55, -inf  ;;  %v2987_v45 = vsel %vm260_vm2, %v7439_v24, -inf  ;;  %v7452_v42 = vpop.f32.mrb[105].mxu0  ;;  %v7454_v12 = vpop.f32.mrb[105].mxu1 }
 0x1e5   : > { %8492 = vst [vmem:[#allocation9_spill] sm:$0xff] %v7452_v42  ;;  %8493 = vst [vmem:[#allocation10_spill] sm:$0xff] %v7454_v12  ;;  %v2708_v3 = vmax.f32 %v2706_v63, %v2707_v20  ;;  %v2984_v1 = vmax.f32 %v2982_v13, %v2983_v31  ;;  %v2674_v18 = vmax.f32 %v2658_v52, %v2642_v51  ;;  %v2728_v44 = vsel %vm260_vm2, %v2642_v51, -inf  ;;  %v7457_v6 = vpop.f32.mrb[106].mxu0  ;;  %v7459_v58 = vpop.f32.mrb[106].mxu1  ;;  %v8497_v42 = vld [vmem:[#allocation38_spill] sm:$0xff] }
 0x1e6   : > { %8494 = vst [vmem:[#allocation36_spill] sm:$0xff] %v7457_v6  ;;  %8495 = vst [vmem:[#allocation11_spill] sm:$0xff] %v7459_v58  ;;  %v2975_v37 = vmax.f32 %v2973_v40, %v2974_v21  ;;  %v2729_v55 = vmax.f32 %v2727_v61, %v2728_v44  ;;  %v7464_v29 = vmul.f32 %v8496_v5, %v7361_v57  ;;  %v7468_v63 = vpop.f32.mrb[107].mxu0  ;;  %v7470_v13 = vpop.f32.mrb[107].mxu1  ;;  %v8500_v40 = vld [vmem:[#allocation39_spill] sm:$0xff]  ;;  %v8501_v5 = vld [vmem:[#allocation13_spill] sm:$0xff] }
 0x1e7   : > { %2687 = vst.msk [vmem:[#allocation2 + $0x20] sm:$0xff] %vm260_vm2, %v2671_v7  ;;  %v2640_v12 = vmul.f32 %v7326_v43, %v8497_v42  ;;  %8498 = vst [vmem:[#allocation12_spill] sm:$0xff] %v7468_v63  ;;  %v2430_v20 = vld [vmem:[#allocation3] sm:$0xff]  ;;  %v7473_v31 = vsel %vm621_vm3, %v2717_v62, %v2708_v3  ;;  %v2985_v51 = vrot.slane %v2984_v1, 1  ;;  %v7478_v61 = vmul.f32 %v7361_v57, %v8500_v40  ;;  %v2656_v63 = vld [vmem:[#allocation2 + $0x28] sm:$0xff] }
 0x1e8   : > { %8499 = vst [vmem:[#allocation37_spill] sm:$0xff] %v7470_v13  ;;  %2690 = vst.msk [vmem:[#allocation2 + $0x38] sm:$0xff] %vm260_vm2, %v2674_v18  ;;  %v2645_v21 = vmul.f32 %v8501_v5, %v7312_v4  ;;  %v2519_v7 = vadd.f32 %v2517_v10, %v2430_v20  ;;  %v2976_v52 = vrot.slane %v2975_v37, 1  ;;  %v2926_v42 = vld [vmem:[#allocation2 + $0x30] sm:$0xff]  ;;  %v2730_v44 = vrot.slane %v2729_v55, 4 }
 0x1e9   : > { %v2997_v13 = vsel %vm260_vm2, %v7464_v29, -inf  ;;  %v2986_v62 = vmax.f32 %v2984_v1, %v2985_v51  ;;  %v2942_v3 = vmax.f32 %v2926_v42, %v2910_v30  ;;  %v2672_v6 = vmax.f32 %v2656_v63, %v2640_v12  ;;  %v2661_v20 = vld [vmem:[#allocation2 + $0x50] sm:$0xff]  ;;  %v7492_v63 = vpop.f32.mrb[108].mxu1 }
 0x1ea   : > { %v2998_v58 = vmax.f32 %v2996_v59, %v2997_v13  ;;  %2520 = vst.msk [vmem:[#allocation3] sm:$0xff] %vm260_vm2, %v2519_v7  ;;  %v2977_v18 = vmax.f32 %v2975_v37, %v2976_v52  ;;  %v2731_v40 = vmax.f32 %v2729_v55, %v2730_v44  ;;  %v2719_v38 = vsel %vm260_vm2, %v2640_v12, -inf  ;;  %v7490_v59 = vpop.f32.mrb[108].mxu0  ;;  %v8502_v13 = vld [vmem:[#allocation14_spill] sm:$0xff]  ;;  %v8505_v42 = vld [vmem:[#allocation15_spill] sm:$0xff] }
 0x1eb   : > { %v2988_v10 = vsel %vm260_vm2, %v7478_v61, -inf  ;;  %2958 = vst.msk [vmem:[#allocation2 + $0x30] sm:$0xff] %vm260_vm2, %v2942_v3  ;;  %2688 = vst.msk [vmem:[#allocation2 + $0x28] sm:$0xff] %vm260_vm2, %v2672_v6  ;;  %v2720_v36 = vmax.f32 %v2718_v47, %v2719_v38  ;;  %v2677_v30 = vmax.f32 %v2661_v20, %v2645_v21  ;;  %v2745_v55 = vsel %vm260_vm2, %v2645_v21, -inf  ;;  %v7502_v7 = vpop.f32.mrb[109].mxu0  ;;  %v7504_v6 = vpop.f32.mrb[109].mxu1 }
 0x1ec   : > { %v2999_v5 = vrot.slane %v2998_v58, 4  ;;  %v2989_v1 = vmax.f32 %v2987_v45, %v2988_v10  ;;  %v7495_v37 = vsel %vm621_vm3, %v2986_v62, %v2977_v18  ;;  %v2732_v12 = vrot.slane %v2731_v40, 2  ;;  %8503 = vst [vmem:[#allocation38_spill] sm:$0xff] %v7502_v7  ;;  %8504 = vst [vmem:[#allocation39_spill] sm:$0xff] %v7504_v6  ;;  %v7509_v62 = vpop.f32.mrb[110].mxu0  ;;  %v2659_v6 = vld [vmem:[#allocation2 + $0x40] sm:$0xff] }
 0x1ed   : > { %v7500_v51 = vmul.f32 %v8502_v13, %v7357_v60  ;;  %v2721_v45 = vrot.slane %v2720_v36, 4  ;;  %2693 = vst.msk [vmem:[#allocation2 + $0x50] sm:$0xff] %vm260_vm2, %v2677_v30  ;;  %v2643_v44 = vmul.f32 %v7312_v4, %v8505_v42  ;;  %8506 = vst [vmem:[#allocation13_spill] sm:$0xff] %v7509_v62  ;;  %v7516_v20 = vmul.f32 %v7357_v60, %v6938_v34  ;;  %v7525_v62 = vpop.f32.mrb[111].mxu0 }
 0x1ee   : > { %v2924_v38 = vld [vmem:[#allocation2 + $0x20] sm:$0xff]  ;;  %v3000_v47 = vmax.f32 %v2998_v58, %v2999_v5  ;;  %v2990_v52 = vrot.slane %v2989_v1, 4  ;;  %v2733_v3 = vmax.f32 %v2731_v40, %v2732_v12  ;;  %v7518_v58 = vpop.f32.mrb[110].mxu1  ;;  %8508 = vst [vmem:[#allocation15_spill] sm:$0xff] %v7525_v62 }
 0x1ef   : > { %v2940_v21 = vmax.f32 %v2924_v38, %v7439_v24  ;;  %v2927_v18 = vld [vmem:[#allocation2 + $0x38] sm:$0xff]  ;;  %v3014_v10 = vsel %vm260_vm2, %v7500_v51, -inf  ;;  %8507 = vst [vmem:[#allocation14_spill] sm:$0xff] %v7518_v58  ;;  %v2722_v13 = vmax.f32 %v2720_v36, %v2721_v45  ;;  %v2675_v40 = vmax.f32 %v2659_v6, %v2643_v44 }
 0x1f0   : > { %v2943_v5 = vmax.f32 %v2927_v18, %v7464_v29  ;;  %v3001_v30 = vrot.slane %v3000_v47, 2  ;;  %v2991_v42 = vmax.f32 %v2989_v1, %v2990_v52  ;;  %v2734_v24 = vrot.slane %v2733_v3, 1 }
 0x1f1   : > { %2956 = vst.msk [vmem:[#allocation2 + $0x20] sm:$0xff] %vm260_vm2, %v2940_v21  ;;  %v2736_v12 = vsel %vm260_vm2, %v2643_v44, -inf  ;;  %v3005_v38 = vsel %vm260_vm2, %v7516_v20, -inf  ;;  %v2723_v58 = vrot.slane %v2722_v13, 2  ;;  %v2646_v36 = vmul.f32 %v6940_v25, %v7326_v43  ;;  %2691 = vst.msk [vmem:[#allocation2 + $0x40] sm:$0xff] %vm260_vm2, %v2675_v40 }
 0x1f2   : > { %2959 = vst.msk [vmem:[#allocation2 + $0x38] sm:$0xff] %vm260_vm2, %v2943_v5  ;;  %v3002_v34 = vmax.f32 %v3000_v47, %v3001_v30  ;;  %v2992_v29 = vrot.slane %v2991_v42, 2  ;;  %v2735_v1 = vmax.f32 %v2733_v3, %v2734_v24  ;;  %v2925_v45 = vld [vmem:[#allocation2 + $0x28] sm:$0xff]  ;;  %v7533_v6 = vmul.f32 %v6944_v54, %v7361_v57  ;;  %v7541_v47 = vpop.f32.mrb[111].mxu1  ;;  %v2662_v5 = vld [vmem:[#allocation2 + $0x58] sm:$0xff] }
 0x1f3   : > { %v2644_v52 = vmul.f32 %v7326_v43, %v6946_v28  ;;  %v7539_v44 = vmul.f32 %v7361_v57, %v6955_v11  ;;  %8509 = vst [vmem:[#allocation54_spill] sm:$0xff] %v7541_v47  ;;  %v2724_v18 = vmax.f32 %v2722_v13, %v2723_v58  ;;  %v2941_v25 = vmax.f32 %v2925_v45, %v7478_v61  ;;  %v2660_v30 = vld [vmem:[#allocation2 + $0x48] sm:$0xff] }
 0x1f4   : > { %v3003_v21 = vrot.slane %v3002_v34, 1  ;;  %v2993_v3 = vmax.f32 %v2991_v42, %v2992_v29  ;;  %v2930_v24 = vld [vmem:[#allocation2 + $0x50] sm:$0xff]  ;;  %v2678_v40 = vmax.f32 %v2662_v5, %v2646_v36  ;;  %v2746_v54 = vsel %vm260_vm2, %v2646_v36, -inf }
 0x1f5   : > { %v3015_v28 = vsel %vm260_vm2, %v7533_v6, -inf  ;;  %v2676_v62 = vmax.f32 %v2660_v30, %v2644_v52  ;;  %v2725_v11 = vrot.slane %v2724_v18, 1  ;;  %2957 = vst.msk [vmem:[#allocation2 + $0x28] sm:$0xff] %vm260_vm2, %v2941_v25  ;;  %v2946_v58 = vmax.f32 %v2930_v24, %v7500_v51  ;;  %v2665_v24 = vld [vmem:[#allocation2 + $0x70] sm:$0xff] }
 0x1f6   : > { %v3004_v7 = vmax.f32 %v3002_v34, %v3003_v21  ;;  %v2994_v47 = vrot.slane %v2993_v3, 1  ;;  %2694 = vst.msk [vmem:[#allocation2 + $0x58] sm:$0xff] %vm260_vm2, %v2678_v40  ;;  %v2747_v61 = vmax.f32 %v2745_v55, %v2746_v54  ;;  %v3016_v13 = vmax.f32 %v3014_v10, %v3015_v28 }
 0x1f7   : > { %2692 = vst.msk [vmem:[#allocation2 + $0x48] sm:$0xff] %vm260_vm2, %v2676_v62  ;;  %v2737_v42 = vsel %vm260_vm2, %v2644_v52, -inf  ;;  %v3006_v29 = vsel %vm260_vm2, %v7539_v44, -inf  ;;  %v2726_v36 = vmax.f32 %v2724_v18, %v2725_v11  ;;  %2962 = vst.msk [vmem:[#allocation2 + $0x50] sm:$0xff] %vm260_vm2, %v2946_v58  ;;  %v2649_v51 = vmul.f32 %v6972_v48, %v7312_v4  ;;  %v7561_v62 = vpop.f32.mrb[112].mxu0 }
 0x1f8   : > { %v2995_v45 = vmax.f32 %v2993_v3, %v2994_v47  ;;  %v2738_v34 = vmax.f32 %v2736_v12, %v2737_v42  ;;  %v3007_v21 = vmax.f32 %v3005_v38, %v3006_v29  ;;  %v2748_v25 = vrot.slane %v2747_v61, 4  ;;  %v2928_v47 = vld [vmem:[#allocation2 + $0x40] sm:$0xff]  ;;  %v7567_v18 = vpop.f32.mrb[113].mxu0 }
 0x1f9   : > { %v3017_v5 = vrot.slane %v3016_v13, 4  ;;  %v7559_v55 = vmul.f32 %v6979_v22, %v7357_v60  ;;  %v2781_v10 = vsel %vm623_vm4, %v2726_v36, %v7473_v31  ;;  %v2944_v3 = vmax.f32 %v2928_v47, %v7516_v20 }
 0x1fa   : > { %v3050_v52 = vsel %vm623_vm4, %v2995_v45, %v7495_v37  ;;  %v2739_v12 = vrot.slane %v2738_v34, 4  ;;  %v3008_v38 = vrot.slane %v3007_v21, 4  ;;  %v2749_v48 = vmax.f32 %v2747_v61, %v2748_v25 }
 0x1fb   : > { %v3018_v30 = vmax.f32 %v3016_v13, %v3017_v5  ;;  %v2782_v22 = vsel %vm625_vm5, %v2735_v1, %v2781_v10  ;;  %v3051_v28 = vsel %vm625_vm5, %v3004_v7, %v3050_v52  ;;  %v2681_v31 = vmax.f32 %v2665_v24, %v2649_v51  ;;  %2960 = vst.msk [vmem:[#allocation2 + $0x40] sm:$0xff] %vm260_vm2, %v2944_v3  ;;  %v8510_v7 = vld [vmem:[#allocation40_spill] sm:$0xff]  ;;  %v2663_v5 = vld [vmem:[#allocation2 + $0x60] sm:$0xff]  ;;  %v8512_v24 = vld [vmem:[#allocation42_spill] sm:$0xff] }
 0x1fc   : > { %v2740_v40 = vmax.f32 %v2738_v34, %v2739_v12  ;;  %v3009_v54 = vmax.f32 %v3007_v21, %v3008_v38  ;;  %v2750_v37 = vrot.slane %v2749_v48, 2  ;;  %v2763_v58 = vsel %vm260_vm2, %v2649_v51, -inf  ;;  %v7585_v51 = vpop.permute.xlu1 %3166 }
 0x1fd   : > { %v3019_v11 = vrot.slane %v3018_v30, 2  ;;  %v3032_v42 = vsel %vm260_vm2, %v7559_v55, -inf  ;;  %v2931_v20 = vld [vmem:[#allocation2 + $0x58] sm:$0xff]  ;;  %2697 = vst.msk [vmem:[#allocation2 + $0x70] sm:$0xff] %vm260_vm2, %v2681_v31  ;;  %v2647_v1 = vmul.f32 %v7312_v4, %v6981_v39  ;;  %v7581_v36 = vmul.f32 %v7357_v60, %v8510_v7  ;;  %v8511_v60 = vld [vmem:[#allocation41_spill] sm:$0xff] }
 0x1fe   : > { %v2741_v61 = vrot.slane %v2740_v40, 2  ;;  %v2929_v13 = vld [vmem:[#allocation2 + $0x48] sm:$0xff]  ;;  %v3010_v29 = vrot.slane %v3009_v54, 2  ;;  %v2751_v45 = vmax.f32 %v2749_v48, %v2750_v37  ;;  %v2947_v34 = vmax.f32 %v2931_v20, %v7533_v6  ;;  %v2666_v48 = vld [vmem:[#allocation2 + $0x78] sm:$0xff] }
 0x1ff   : > { %v3020_v21 = vmax.f32 %v3018_v30, %v3019_v11  ;;  %v2945_v25 = vmax.f32 %v2929_v13, %v7539_v44  ;;  %v2679_v47 = vmax.f32 %v2663_v5, %v2647_v1  ;;  %v2754_v12 = vsel %vm260_vm2, %v2647_v1, -inf  ;;  %v2664_v1 = vld [vmem:[#allocation2 + $0x68] sm:$0xff] }
 0x200   : > { %v2742_v10 = vmax.f32 %v2740_v40, %v2741_v61  ;;  %v3011_v52 = vmax.f32 %v3009_v54, %v3010_v29  ;;  %v2752_v38 = vrot.slane %v2751_v45, 1  ;;  %2963 = vst.msk [vmem:[#allocation2 + $0x58] sm:$0xff] %vm260_vm2, %v2947_v34  ;;  %v3023_v4 = vsel %vm260_vm2, %v7581_v36, -inf }
 0x201   : > { %v3021_v39 = vrot.slane %v3020_v21, 1  ;;  %2961 = vst.msk [vmem:[#allocation2 + $0x48] sm:$0xff] %vm260_vm2, %v2945_v25  ;;  %v2650_v6 = vmul.f32 %v8511_v60, %v7326_v43  ;;  %2695 = vst.msk [vmem:[#allocation2 + $0x60] sm:$0xff] %vm260_vm2, %v2679_v47  ;;  %v7597_v30 = vmul.f32 %v6992_v32, %v7361_v57  ;;  %v2648_v40 = vmul.f32 %v7326_v43, %v8512_v24 }
 0x202   : > { %v2743_v44 = vrot.slane %v2742_v10, 1  ;;  %v3012_v3 = vrot.slane %v3011_v52, 1  ;;  %v2753_v54 = vmax.f32 %v2751_v45, %v2752_v38  ;;  %v7608_v43 = vmul.f32 %v7361_v57, %v6999_v33  ;;  %v2922_v45 = vld [vmem:[#allocation2 + $0x10] sm:$0xff]  ;;  %v2923_v57 = vld [vmem:[#allocation2 + $0x18] sm:$0xff] }
 0x203   : > { %v3022_v31 = vmax.f32 %v3020_v21, %v3021_v39  ;;  %v2682_v37 = vmax.f32 %v2666_v48, %v2650_v6  ;;  %v2764_v11 = vsel %vm260_vm2, %v2650_v6, -inf  ;;  %v3033_v29 = vsel %vm260_vm2, %v7597_v30, -inf  ;;  %v7610_v21 = vpop.permute.xlu1 %3170 }
 0x204   : > { %v2744_v20 = vmax.f32 %v2742_v10, %v2743_v44  ;;  %v3013_v61 = vmax.f32 %v3011_v52, %v3012_v3  ;;  %v2765_v13 = vmax.f32 %v2763_v58, %v2764_v11  ;;  %v2934_v7 = vld [vmem:[#allocation2 + $0x70] sm:$0xff]  ;;  %v3034_v32 = vmax.f32 %v3032_v42, %v3033_v29 }
 0x205   : > { %2698 = vst.msk [vmem:[#allocation2 + $0x78] sm:$0xff] %vm260_vm2, %v2682_v37  ;;  %v2680_v34 = vmax.f32 %v2664_v1, %v2648_v40  ;;  %v2755_v25 = vsel %vm260_vm2, %v2648_v40, -inf  ;;  %v2950_v10 = vmax.f32 %v2934_v7, %v7559_v55  ;;  %v3024_v33 = vsel %vm260_vm2, %v7608_v43, -inf }
 0x206   : > { %v2783_v58 = vsel %vm627_vm6, %v2744_v20, %v2782_v22  ;;  %v3052_v5 = vsel %vm627_vm6, %v3013_v61, %v3051_v28  ;;  %v2766_v52 = vrot.slane %v2765_v13, 4  ;;  %v3035_v47 = vrot.slane %v3034_v32, 4 }
 0x207   : > { %2696 = vst.msk [vmem:[#allocation2 + $0x68] sm:$0xff] %vm260_vm2, %v2680_v34  ;;  %v2756_v42 = vmax.f32 %v2754_v12, %v2755_v25  ;;  %v7617_v38 = vsel %vm629_vm7, %v2753_v54, %v2783_v58  ;;  %2966 = vst.msk [vmem:[#allocation2 + $0x70] sm:$0xff] %vm260_vm2, %v2950_v10  ;;  %v3025_v22 = vmax.f32 %v3023_v4, %v3024_v33  ;;  %v3189_v4 = vld [vmem:[#allocation2] sm:$0xff]  ;;  %v8515_v10 = vld [vmem:[#allocation44_spill] sm:$0xff] }
 0x208   : > { %v2767_v39 = vmax.f32 %v2765_v13, %v2766_v52  ;;  %v7623_v28 = vsel %vm629_vm7, %v3022_v31, %v3052_v5  ;;  %v2938_v55 = vmax.f32 %v2922_v45, %v7377_v35  ;;  %v2932_v60 = vld [vmem:[#allocation2 + $0x60] sm:$0xff]  ;;  %v3036_v6 = vmax.f32 %v3034_v32, %v3035_v47  ;;  %v8514_v32 = vld [vmem:[#allocation18_spill] sm:$0xff] }
 0x209   : > { %v2757_v44 = vrot.slane %v2756_v42, 4  ;;  %v7628_v12 = vmul.f32 %v7057_v19, %v7585_v51  ;;  %v3173_v3 = vmul.f32 %v7585_v51, %v7064_v15  ;;  %v2948_v48 = vmax.f32 %v2932_v60, %v7581_v36  ;;  %v7637_v19 = vpop.permute.xlu1 %3439  ;;  %v8513_v13 = vld [vmem:[#allocation17_spill] sm:$0xff] }
 0x20a   : > { %v2768_v24 = vrot.slane %v2767_v39, 2  ;;  %v3026_v40 = vrot.slane %v3025_v22, 4  ;;  %2954 = vst.msk [vmem:[#allocation2 + $0x10] sm:$0xff] %vm260_vm2, %v2938_v55  ;;  %v2939_v54 = vmax.f32 %v2923_v57, %v7393_v16  ;;  %v3037_v35 = vrot.slane %v3036_v6, 2  ;;  %v3190_v57 = vld [vmem:[#allocation2 + $0x8] sm:$0xff] }
 0x20b   : > { %v2758_v31 = vmax.f32 %v2756_v42, %v2757_v44  ;;  %v3247_v37 = vsel %vm260_vm2, %v7628_v12, -inf  ;;  %v3205_v11 = vmax.f32 %v3189_v4, %v3173_v3  ;;  %2964 = vst.msk [vmem:[#allocation2 + $0x60] sm:$0xff] %vm260_vm2, %v2948_v48  ;;  %v3238_v61 = vsel %vm260_vm2, %v3173_v3, -inf  ;;  %v7660_v3 = vpop.f32.mrb[114].mxu0 }
 0x20c   : > { %v2769_v15 = vmax.f32 %v2767_v39, %v2768_v24  ;;  %v2935_v20 = vld [vmem:[#allocation2 + $0x78] sm:$0xff]  ;;  %v3027_v36 = vmax.f32 %v3025_v22, %v3026_v40  ;;  %2955 = vst.msk [vmem:[#allocation2 + $0x18] sm:$0xff] %vm260_vm2, %v2939_v54  ;;  %v3176_v16 = vmul.f32 %v8513_v13, %v7610_v21  ;;  %v3038_v1 = vmax.f32 %v3036_v6, %v3037_v35  ;;  %v7655_v39 = vpop.permute.xlu0 %3435  ;;  %v7657_v22 = vpop.f32.mrb[112].mxu1 }
 0x20d   : > { %v2951_v29 = vmax.f32 %v2935_v20, %v7597_v30  ;;  %v2759_v7 = vrot.slane %v2758_v31, 2  ;;  %3221 = vst.msk [vmem:[#allocation2] sm:$0xff] %vm260_vm2, %v3205_v11  ;;  %v3174_v34 = vmul.f32 %v7610_v21, %v8514_v32  ;;  %v7651_v52 = vmul.f32 %v8515_v10, %v7637_v19  ;;  %v7662_v48 = vpop.f32.mrb[113].mxu1  ;;  %v7665_v35 = vpop.f32.mrb[115].mxu0  ;;  %v8516_v20 = vld [vmem:[#allocation16_spill] sm:$0xff]  ;;  %v8517_v32 = vld [vmem:[#allocation43_spill] sm:$0xff] }
 0x20e   : > { %v2770_v25 = vrot.slane %v2769_v15, 1  ;;  %v2933_v45 = vld [vmem:[#allocation2 + $0x68] sm:$0xff]  ;;  %v3028_v58 = vrot.slane %v3027_v36, 2  ;;  %v3248_v5 = vsel %vm260_vm2, %v3176_v16, -inf  ;;  %v3039_v47 = vrot.slane %v3038_v1, 1 }
 0x20f   : > { %2967 = vst.msk [vmem:[#allocation2 + $0x78] sm:$0xff] %vm260_vm2, %v2951_v29  ;;  %v2760_v30 = vmax.f32 %v2758_v31, %v2759_v7  ;;  %v2949_v42 = vmax.f32 %v2933_v45, %v7608_v43  ;;  %v3249_v33 = vmax.f32 %v3247_v37, %v3248_v5  ;;  %v3206_v6 = vmax.f32 %v3190_v57, %v3174_v34  ;;  %v7667_v31 = vpop.f32.mrb[114].mxu1  ;;  %v2699_v57 = vld [vmem:[#allocation3] sm:$0xff] }
 0x210   : > { %v2771_v55 = vmax.f32 %v2769_v15, %v2770_v25  ;;  %v3029_v60 = vmax.f32 %v3027_v36, %v3028_v58  ;;  %v3239_v44 = vsel %vm260_vm2, %v3174_v34, -inf  ;;  %v3040_v24 = vmax.f32 %v3038_v1, %v3039_v47  ;;  %v7677_v13 = vpop.f32.mrb[115].mxu1  ;;  %v8518_v58 = vld [vmem:[#allocation20_spill] sm:$0xff] }
 0x211   : > { %v2761_v40 = vrot.slane %v2760_v30, 1  ;;  %2965 = vst.msk [vmem:[#allocation2 + $0x68] sm:$0xff] %vm260_vm2, %v2949_v42  ;;  %v3191_v43 = vld [vmem:[#allocation2 + $0x10] sm:$0xff]  ;;  %v3250_v4 = vrot.slane %v3249_v33, 4  ;;  %v3240_v54 = vmax.f32 %v3238_v61, %v3239_v44  ;;  %3222 = vst.msk [vmem:[#allocation2 + $0x8] sm:$0xff] %vm260_vm2, %v3206_v6  ;;  %v3517_v15 = vsel %vm260_vm2, %v7651_v52, -inf }
 0x212   : > { %v3030_v37 = vrot.slane %v3029_v60, 1  ;;  %v3207_v11 = vmax.f32 %v3191_v43, %v7628_v12  ;;  %v7675_v36 = vmul.f32 %v8516_v20, %v7655_v39  ;;  %v3442_v34 = vmul.f32 %v7655_v39, %v8517_v32  ;;  %v7695_v43 = vpop.f32.mrb[116].mxu1 }
 0x213   : > { %v2762_v29 = vmax.f32 %v2760_v30, %v2761_v40  ;;  %v3192_v61 = vld [vmem:[#allocation2 + $0x18] sm:$0xff]  ;;  %v3251_v1 = vmax.f32 %v3249_v33, %v3250_v4  ;;  %v3241_v7 = vrot.slane %v3240_v54, 4  ;;  %v3443_v5 = vmul.f32 %v7637_v19, %v8518_v58  ;;  %v7693_v40 = vpop.f32.mrb[116].mxu0 }
 0x214   : > { %v3031_v25 = vmax.f32 %v3029_v60, %v3030_v37  ;;  %3223 = vst.msk [vmem:[#allocation2 + $0x10] sm:$0xff] %vm260_vm2, %v3207_v11  ;;  %v3208_v12 = vmax.f32 %v3192_v61, %v3176_v16  ;;  %v3516_v45 = vsel %vm260_vm2, %v7675_v36, -inf  ;;  %v3458_v10 = vld [vmem:[#allocation2] sm:$0xff]  ;;  %v3507_v44 = vsel %vm260_vm2, %v3442_v34, -inf  ;;  %v7698_v11 = vpop.f32.mrb[117].mxu0 }
 0x215   : > { %v2785_v47 = vsel %vm631_vm8, %v2762_v29, %v7617_v38  ;;  %v3252_v30 = vrot.slane %v3251_v1, 2  ;;  %v3242_v42 = vmax.f32 %v3240_v54, %v3241_v7  ;;  %v3518_v33 = vmax.f32 %v3516_v45, %v3517_v15  ;;  %v7710_v61 = vpop.f32.mrb[118].mxu0 }
 0x216   : > { %v2786_v6 = vsel %vm633_vm9, %v2771_v55, %v2785_v47  ;;  %v3054_v60 = vsel %vm631_vm8, %v3031_v25, %v7623_v28  ;;  %3224 = vst.msk [vmem:[#allocation2 + $0x18] sm:$0xff] %vm260_vm2, %v3208_v12  ;;  %v3474_v16 = vmax.f32 %v3458_v10, %v3442_v34  ;;  %v7700_v55 = vpop.f32.mrb[117].mxu1  ;;  %v3508_v28 = vsel %vm260_vm2, %v3443_v5, -inf  ;;  %v3195_v25 = vld [vmem:[#allocation2 + $0x30] sm:$0xff]  ;;  %v7717_v45 = vpop.f32.mrb[119].mxu0 }
 0x217   : > { %v2788_v4 = vadd.f32 %v2786_v6, %v2699_v57  ;;  %v3055_v38 = vsel %vm633_vm9, %v3040_v24, %v3054_v60  ;;  %v3253_v54 = vmax.f32 %v3251_v1, %v3252_v30  ;;  %v3243_v37 = vrot.slane %v3242_v42, 2  ;;  %v7712_v24 = vpop.f32.mrb[118].mxu1  ;;  %v3193_v60 = vld [vmem:[#allocation2 + $0x20] sm:$0xff] }
 0x218   : > { %v3519_v15 = vrot.slane %v3518_v33, 4  ;;  %3490 = vst.msk [vmem:[#allocation2] sm:$0xff] %vm260_vm2, %v3474_v16  ;;  %v3179_v20 = vmul.f32 %v7103_v50, %v7585_v51  ;;  %v7708_v29 = vmul.f32 %v7105_v0, %v7655_v39  ;;  %v3459_v32 = vld [vmem:[#allocation2 + $0x8] sm:$0xff]  ;;  %v3509_v34 = vmax.f32 %v3507_v44, %v3508_v28  ;;  %v7719_v50 = vpop.f32.mrb[119].mxu1 }
 0x219   : > { %2789 = vst.msk [vmem:[#allocation3] sm:$0xff] %vm260_vm2, %v2788_v4  ;;  %v3254_v1 = vrot.slane %v3253_v54, 1  ;;  %v3244_v7 = vmax.f32 %v3242_v42, %v3243_v37  ;;  %v3177_v12 = vmul.f32 %v7585_v51, %v7121_v2  ;;  %v3475_v0 = vmax.f32 %v3459_v32, %v3443_v5  ;;  %v8519_v5 = vld [vmem:[#allocation19_spill] sm:$0xff]  ;;  %v8520_v37 = vld [vmem:[#allocation21_spill] sm:$0xff]  ;;  %v3196_v32 = vld [vmem:[#allocation2 + $0x38] sm:$0xff] }
 0x21a   : > { %v3520_v58 = vmax.f32 %v3518_v33, %v3519_v15  ;;  %v3211_v10 = vmax.f32 %v3195_v25, %v3179_v20  ;;  %v3265_v47 = vsel %vm260_vm2, %v3179_v20, -inf  ;;  %v3510_v6 = vrot.slane %v3509_v34, 4 }
 0x21b   : > { %v3255_v30 = vmax.f32 %v3253_v54, %v3254_v1  ;;  %v3245_v57 = vrot.slane %v3244_v7, 1  ;;  %v3534_v42 = vsel %vm260_vm2, %v7708_v29, -inf  ;;  %3491 = vst.msk [vmem:[#allocation2 + $0x8] sm:$0xff] %vm260_vm2, %v3475_v0  ;;  %v3209_v2 = vmax.f32 %v3193_v60, %v3177_v12  ;;  %v7748_v0 = vpop.f32.mrb[120].mxu1 }
 0x21c   : > { %v3521_v16 = vrot.slane %v3520_v58, 2  ;;  %3227 = vst.msk [vmem:[#allocation2 + $0x30] sm:$0xff] %vm260_vm2, %v3211_v10  ;;  %v3256_v44 = vsel %vm260_vm2, %v3177_v12, -inf  ;;  %v7729_v33 = vmul.f32 %v7655_v39, %v8519_v5  ;;  %v3511_v54 = vmax.f32 %v3509_v34, %v3510_v6  ;;  %v8521_v12 = vld [vmem:[#allocation45_spill] sm:$0xff]  ;;  %v7746_v34 = vpop.f32.mrb[120].mxu0  ;;  %8523 = vst [vmem:[#allocation41_spill] sm:$0xff] %v7748_v0 }
 0x21d   : > { %v3246_v4 = vmax.f32 %v3244_v7, %v3245_v57  ;;  %v3180_v28 = vmul.f32 %v8520_v37, %v7610_v21  ;;  %v7735_v15 = vmul.f32 %v7130_v27, %v7637_v19  ;;  %3225 = vst.msk [vmem:[#allocation2 + $0x20] sm:$0xff] %vm260_vm2, %v3209_v2  ;;  %v3178_v25 = vmul.f32 %v7610_v21, %v7138_v46  ;;  %v3194_v6 = vld [vmem:[#allocation2 + $0x28] sm:$0xff]  ;;  %v7754_v60 = vpop.f32.mrb[121].mxu0 }
 0x21e   : > { %v3522_v20 = vmax.f32 %v3520_v58, %v3521_v16  ;;  %v3525_v1 = vsel %vm260_vm2, %v7729_v33, -inf  ;;  %v7744_v7 = vmul.f32 %v7637_v19, %v8521_v12  ;;  %8522 = vst [vmem:[#allocation40_spill] sm:$0xff] %v7746_v34  ;;  %v3512_v58 = vrot.slane %v3511_v54, 2  ;;  %8524 = vst [vmem:[#allocation42_spill] sm:$0xff] %v7754_v60  ;;  %v7756_v16 = vpop.f32.mrb[121].mxu1  ;;  %v7760_v0 = vpop.f32.mrb[122].mxu0 }
 0x21f   : > { %v7751_v27 = vsel %vm621_vm3, %v3255_v30, %v3246_v4  ;;  %v3212_v10 = vmax.f32 %v3196_v32, %v3180_v28  ;;  %v3266_v57 = vsel %vm260_vm2, %v3180_v28, -inf  ;;  %8525 = vst [vmem:[#allocation17_spill] sm:$0xff] %v7756_v16  ;;  %v3535_v37 = vsel %vm260_vm2, %v7735_v15, -inf  ;;  %8526 = vst [vmem:[#allocation18_spill] sm:$0xff] %v7760_v0  ;;  %v7762_v30 = vpop.f32.mrb[122].mxu1  ;;  %v7766_v34 = vpop.f32.mrb[123].mxu0 }
 0x220   : > { %v2968_v46 = vld [vmem:[#allocation3] sm:$0xff]  ;;  %v3523_v2 = vrot.slane %v3522_v20, 1  ;;  %v3267_v5 = vmax.f32 %v3265_v47, %v3266_v57  ;;  %v3210_v12 = vmax.f32 %v3194_v6, %v3178_v25  ;;  %v3513_v32 = vmax.f32 %v3511_v54, %v3512_v58  ;;  %8527 = vst [vmem:[#allocation44_spill] sm:$0xff] %v7766_v34  ;;  %v7768_v16 = vpop.f32.mrb[123].mxu1 }
 0x221   : > { %v3057_v4 = vadd.f32 %v3055_v38, %v2968_v46  ;;  %3228 = vst.msk [vmem:[#allocation2 + $0x38] sm:$0xff] %vm260_vm2, %v3212_v10  ;;  %v3536_v28 = vmax.f32 %v3534_v42, %v3535_v37  ;;  %v3257_v60 = vsel %vm260_vm2, %v3178_v25, -inf  ;;  %8528 = vst [vmem:[#allocation16_spill] sm:$0xff] %v7768_v16  ;;  %v3526_v0 = vsel %vm260_vm2, %v7744_v7, -inf  ;;  %v8529_v37 = vld [vmem:[#allocation46_spill] sm:$0xff] }
 0x222   : > { %v3524_v47 = vmax.f32 %v3522_v20, %v3523_v2  ;;  %v3268_v57 = vrot.slane %v3267_v5, 4  ;;  %3226 = vst.msk [vmem:[#allocation2 + $0x28] sm:$0xff] %vm260_vm2, %v3210_v12  ;;  %v3258_v6 = vmax.f32 %v3256_v44, %v3257_v60  ;;  %v3514_v38 = vrot.slane %v3513_v32, 1  ;;  %v3199_v2 = vld [vmem:[#allocation2 + $0x50] sm:$0xff] }
 0x223   : > { %3058 = vst.msk [vmem:[#allocation3] sm:$0xff] %vm260_vm2, %v3057_v4  ;;  %v3464_v54 = vld [vmem:[#allocation2 + $0x30] sm:$0xff]  ;;  %v3537_v58 = vrot.slane %v3536_v28, 4  ;;  %v3527_v42 = vmax.f32 %v3525_v1, %v3526_v0  ;;  %v3183_v25 = vmul.f32 %v7163_v8, %v7585_v51  ;;  %v7779_v44 = vmul.f32 %v8529_v37, %v7655_v39 }
 0x224   : > { %v3480_v10 = vmax.f32 %v3464_v54, %v7708_v29  ;;  %v3269_v46 = vmax.f32 %v3267_v5, %v3268_v57  ;;  %v3259_v20 = vrot.slane %v3258_v6, 4  ;;  %v3515_v60 = vmax.f32 %v3513_v32, %v3514_v38  ;;  %v3462_v12 = vld [vmem:[#allocation2 + $0x20] sm:$0xff]  ;;  %v7784_v5 = vpop.f32.mrb[124].mxu0  ;;  %v7786_v57 = vpop.f32.mrb[124].mxu1 }
 0x225   : > { %v3538_v16 = vmax.f32 %v3536_v28, %v3537_v58  ;;  %v3528_v4 = vrot.slane %v3527_v42, 4  ;;  %v3215_v34 = vmax.f32 %v3199_v2, %v3183_v25  ;;  %v3478_v1 = vmax.f32 %v3462_v12, %v7729_v33  ;;  %8530 = vst [vmem:[#allocation43_spill] sm:$0xff] %v7786_v57  ;;  %v7792_v38 = vpop.f32.mrb[125].mxu0  ;;  %v7794_v33 = vpop.f32.mrb[125].mxu1 }
 0x226   : > { %3496 = vst.msk [vmem:[#allocation2 + $0x30] sm:$0xff] %vm260_vm2, %v3480_v10  ;;  %v3270_v0 = vrot.slane %v3269_v46, 2  ;;  %v3260_v8 = vmax.f32 %v3258_v6, %v3259_v20  ;;  %v3283_v29 = vsel %vm260_vm2, %v3183_v25, -inf  ;;  %v3587_v54 = vsel %vm621_vm3, %v3524_v47, %v3515_v60  ;;  %8531 = vst [vmem:[#allocation20_spill] sm:$0xff] %v7792_v38 }
 0x227   : > { %v3539_v37 = vrot.slane %v3538_v16, 2  ;;  %v3529_v32 = vmax.f32 %v3527_v42, %v3528_v4  ;;  %3231 = vst.msk [vmem:[#allocation2 + $0x50] sm:$0xff] %vm260_vm2, %v3215_v34  ;;  %v3552_v28 = vsel %vm260_vm2, %v7779_v44, -inf  ;;  %8532 = vst [vmem:[#allocation19_spill] sm:$0xff] %v7794_v33  ;;  %v3181_v10 = vmul.f32 %v7585_v51, %v7170_v41  ;;  %v7803_v34 = vpop.f32.mrb[126].mxu0  ;;  %v7805_v42 = vpop.f32.mrb[126].mxu1 }
 0x228   : > { %3494 = vst.msk [vmem:[#allocation2 + $0x20] sm:$0xff] %vm260_vm2, %v3478_v1  ;;  %v3271_v6 = vmax.f32 %v3269_v46, %v3270_v0  ;;  %v3465_v58 = vld [vmem:[#allocation2 + $0x38] sm:$0xff]  ;;  %v3261_v25 = vrot.slane %v3260_v8, 2  ;;  %v7801_v47 = vmul.f32 %v7655_v39, %v7172_v26  ;;  %8533 = vst [vmem:[#allocation21_spill] sm:$0xff] %v7803_v34  ;;  %v3197_v4 = vld [vmem:[#allocation2 + $0x40] sm:$0xff] }
 0x229   : > { %8534 = vst [vmem:[#allocation45_spill] sm:$0xff] %v7805_v42  ;;  %v3481_v20 = vmax.f32 %v3465_v58, %v7735_v15  ;;  %v3540_v2 = vmax.f32 %v3538_v16, %v3539_v37  ;;  %v3463_v60 = vld [vmem:[#allocation2 + $0x28] sm:$0xff]  ;;  %v3530_v12 = vrot.slane %v3529_v32, 2  ;;  %v8535_v46 = vld [vmem:[#allocation47_spill] sm:$0xff]  ;;  %v3213_v38 = vmax.f32 %v3197_v4, %v3181_v10  ;;  %v3200_v16 = vld [vmem:[#allocation2 + $0x58] sm:$0xff]  ;;  %v7815_v37 = vpop.f32.mrb[127].mxu0 }
 0x22a   : > { %v3184_v1 = vmul.f32 %v8535_v46, %v7610_v21  ;;  %v3272_v0 = vrot.slane %v3271_v6, 1  ;;  %v3262_v33 = vmax.f32 %v3260_v8, %v3261_v25  ;;  %v3479_v41 = vmax.f32 %v3463_v60, %v7744_v7  ;;  %v7817_v58 = vpop.f32.mrb[127].mxu1 }
 0x22b   : > { %3497 = vst.msk [vmem:[#allocation2 + $0x38] sm:$0xff] %vm260_vm2, %v3481_v20  ;;  %v3541_v26 = vrot.slane %v3540_v2, 1  ;;  %v3531_v34 = vmax.f32 %v3529_v32, %v3530_v12  ;;  %v3274_v42 = vsel %vm260_vm2, %v3181_v10, -inf  ;;  %v3543_v15 = vsel %vm260_vm2, %v7801_v47, -inf  ;;  %8536 = vst [vmem:[#allocation46_spill] sm:$0xff] %v7817_v58  ;;  %v8537_v20 = vld [vmem:[#allocation48_spill] sm:$0xff] }
 0x22c   : > { %v3273_v46 = vmax.f32 %v3271_v6, %v3272_v0  ;;  %v3263_v57 = vrot.slane %v3262_v33, 1  ;;  %3495 = vst.msk [vmem:[#allocation2 + $0x28] sm:$0xff] %vm260_vm2, %v3479_v41  ;;  %3229 = vst.msk [vmem:[#allocation2 + $0x40] sm:$0xff] %vm260_vm2, %v3213_v38  ;;  %v3216_v7 = vmax.f32 %v3200_v16, %v3184_v1  ;;  %v3284_v8 = vsel %vm260_vm2, %v3184_v1, -inf  ;;  %v8538_v58 = vld [vmem:[#allocation49_spill] sm:$0xff]  ;;  %v8539_v0 = vld [vmem:[#allocation50_spill] sm:$0xff] }
 0x22d   : > { %v3542_v32 = vmax.f32 %v3540_v2, %v3541_v26  ;;  %v3532_v25 = vrot.slane %v3531_v34, 1  ;;  %v3285_v10 = vmax.f32 %v3283_v29, %v3284_v8  ;;  %v3453_v60 = vmul.f32 %v8537_v20, %v7637_v19 }
 0x22e   : > { %v3264_v12 = vmax.f32 %v3262_v33, %v3263_v57  ;;  %v3468_v4 = vld [vmem:[#allocation2 + $0x50] sm:$0xff]  ;;  %3232 = vst.msk [vmem:[#allocation2 + $0x58] sm:$0xff] %vm260_vm2, %v3216_v7  ;;  %v3182_v6 = vmul.f32 %v7610_v21, %v8538_v58  ;;  %v7829_v41 = vmul.f32 %v7637_v19, %v8539_v0  ;;  %v3187_v38 = vmul.f32 %v7215_v23, %v7585_v51  ;;  %v3198_v57 = vld [vmem:[#allocation2 + $0x48] sm:$0xff] }
 0x22f   : > { %v3533_v2 = vmax.f32 %v3531_v34, %v3532_v25  ;;  %v3484_v29 = vmax.f32 %v3468_v4, %v7779_v44  ;;  %v3286_v1 = vrot.slane %v3285_v10, 4  ;;  %v3553_v26 = vsel %vm260_vm2, %v3453_v60, -inf  ;;  %v3203_v44 = vld [vmem:[#allocation2 + $0x70] sm:$0xff] }
 0x230   : > { %v3319_v33 = vsel %vm623_vm4, %v3264_v12, %v7751_v27  ;;  %v3554_v16 = vmax.f32 %v3552_v28, %v3553_v26  ;;  %v3214_v7 = vmax.f32 %v3198_v57, %v3182_v6  ;;  %v3275_v58 = vsel %vm260_vm2, %v3182_v6, -inf }
 0x231   : > { %v3588_v8 = vsel %vm623_vm4, %v3533_v2, %v3587_v54  ;;  %3500 = vst.msk [vmem:[#allocation2 + $0x50] sm:$0xff] %vm260_vm2, %v3484_v29  ;;  %v3287_v20 = vmax.f32 %v3285_v10, %v3286_v1  ;;  %v3276_v23 = vmax.f32 %v3274_v42, %v3275_v58  ;;  %v7841_v34 = vsel %vm625_vm5, %v3273_v46, %v3319_v33  ;;  %v3201_v33 = vld [vmem:[#allocation2 + $0x60] sm:$0xff] }
 0x232   : > { %v3555_v25 = vrot.slane %v3554_v16, 4  ;;  %3230 = vst.msk [vmem:[#allocation2 + $0x48] sm:$0xff] %vm260_vm2, %v3214_v7  ;;  %v3544_v27 = vsel %vm260_vm2, %v7829_v41, -inf  ;;  %v7847_v28 = vsel %vm625_vm5, %v3542_v32, %v3588_v8  ;;  %v3219_v12 = vmax.f32 %v3203_v44, %v3187_v38 }
 0x233   : > { %v3466_v4 = vld [vmem:[#allocation2 + $0x40] sm:$0xff]  ;;  %v3288_v54 = vrot.slane %v3287_v20, 2  ;;  %v3277_v6 = vrot.slane %v3276_v23, 4  ;;  %v3545_v0 = vmax.f32 %v3543_v15, %v3544_v27  ;;  %v3301_v42 = vsel %vm260_vm2, %v3187_v38, -inf }
 0x234   : > { %v3482_v46 = vmax.f32 %v3466_v4, %v7801_v47  ;;  %v3556_v10 = vmax.f32 %v3554_v16, %v3555_v25  ;;  %3235 = vst.msk [vmem:[#allocation2 + $0x70] sm:$0xff] %vm260_vm2, %v3219_v12  ;;  %v3456_v2 = vmul.f32 %v7217_v53, %v7655_v39  ;;  %v3185_v29 = vmul.f32 %v7585_v51, %v7219_v9  ;;  %v3204_v4 = vld [vmem:[#allocation2 + $0x78] sm:$0xff] }
 0x235   : > { %v3289_v32 = vmax.f32 %v3287_v20, %v3288_v54  ;;  %v3469_v1 = vld [vmem:[#allocation2 + $0x58] sm:$0xff]  ;;  %v3278_v26 = vmax.f32 %v3276_v23, %v3277_v6  ;;  %v3546_v57 = vrot.slane %v3545_v0, 4  ;;  %v7858_v15 = vmul.f32 %v7655_v39, %v7221_v49  ;;  %v8540_v39 = vld [vmem:[#allocation51_spill] sm:$0xff]  ;;  %v8542_v54 = vld [vmem:[#allocation53_spill] sm:$0xff] }
 0x236   : > { %3498 = vst.msk [vmem:[#allocation2 + $0x40] sm:$0xff] %vm260_vm2, %v3482_v46  ;;  %v3485_v47 = vmax.f32 %v3469_v1, %v3453_v60  ;;  %v3557_v38 = vrot.slane %v3556_v10, 2  ;;  %v3570_v16 = vsel %vm260_vm2, %v3456_v2, -inf  ;;  %v3217_v7 = vmax.f32 %v3201_v33, %v3185_v29  ;;  %v8541_v20 = vld [vmem:[#allocation52_spill] sm:$0xff] }
 0x237   : > { %v3290_v53 = vrot.slane %v3289_v32, 1  ;;  %v3279_v58 = vrot.slane %v3278_v26, 2  ;;  %v3547_v8 = vmax.f32 %v3545_v0, %v3546_v57  ;;  %v3292_v9 = vsel %vm260_vm2, %v3185_v29, -inf }
 0x238   : > { %3501 = vst.msk [vmem:[#allocation2 + $0x58] sm:$0xff] %vm260_vm2, %v3485_v47  ;;  %v3558_v51 = vmax.f32 %v3556_v10, %v3557_v38  ;;  %3233 = vst.msk [vmem:[#allocation2 + $0x60] sm:$0xff] %vm260_vm2, %v3217_v7  ;;  %v3561_v49 = vsel %vm260_vm2, %v7858_v15, -inf  ;;  %v3188_v60 = vmul.f32 %v8540_v39, %v7610_v21  ;;  %v7871_v23 = vmul.f32 %v8541_v20, %v7637_v19  ;;  %v3460_v38 = vld [vmem:[#allocation2 + $0x10] sm:$0xff] }
 0x239   : > { %v3291_v44 = vmax.f32 %v3289_v32, %v3290_v53  ;;  %v3280_v25 = vmax.f32 %v3278_v26, %v3279_v58  ;;  %v3467_v27 = vld [vmem:[#allocation2 + $0x48] sm:$0xff]  ;;  %v3548_v12 = vrot.slane %v3547_v8, 2  ;;  %v3186_v6 = vmul.f32 %v7610_v21, %v8542_v54  ;;  %v7881_v58 = vpop.permute.xlu1 %3704 }
 0x23a   : > { %v3559_v0 = vrot.slane %v3558_v51, 1  ;;  %v3483_v46 = vmax.f32 %v3467_v27, %v7829_v41  ;;  %v3220_v10 = vmax.f32 %v3204_v4, %v3188_v60  ;;  %v3302_v29 = vsel %vm260_vm2, %v3188_v60, -inf  ;;  %v3202_v26 = vld [vmem:[#allocation2 + $0x68] sm:$0xff] }
 0x23b   : > { %v3281_v1 = vrot.slane %v3280_v25, 1  ;;  %v3549_v57 = vmax.f32 %v3547_v8, %v3548_v12  ;;  %v3472_v33 = vld [vmem:[#allocation2 + $0x70] sm:$0xff]  ;;  %v3303_v47 = vmax.f32 %v3301_v42, %v3302_v29  ;;  %v3571_v32 = vsel %vm260_vm2, %v7871_v23, -inf }
 0x23c   : > { %v3560_v7 = vmax.f32 %v3558_v51, %v3559_v0  ;;  %3499 = vst.msk [vmem:[#allocation2 + $0x48] sm:$0xff] %vm260_vm2, %v3483_v46  ;;  %v3488_v53 = vmax.f32 %v3472_v33, %v3456_v2  ;;  %3236 = vst.msk [vmem:[#allocation2 + $0x78] sm:$0xff] %vm260_vm2, %v3220_v10  ;;  %v3572_v21 = vmax.f32 %v3570_v16, %v3571_v32  ;;  %v3293_v42 = vsel %vm260_vm2, %v3186_v6, -inf  ;;  %v8543_v32 = vld [vmem:[#allocation22_spill] sm:$0xff] }
 0x23d   : > { %v3218_v41 = vmax.f32 %v3202_v26, %v3186_v6  ;;  %v3282_v39 = vmax.f32 %v3280_v25, %v3281_v1  ;;  %v3550_v60 = vrot.slane %v3549_v57, 1  ;;  %v3304_v8 = vrot.slane %v3303_v47, 4 }
 0x23e   : > { %3504 = vst.msk [vmem:[#allocation2 + $0x70] sm:$0xff] %vm260_vm2, %v3488_v53  ;;  %v3573_v20 = vrot.slane %v3572_v21, 4  ;;  %v3294_v51 = vmax.f32 %v3292_v9, %v3293_v42  ;;  %v3455_v2 = vmul.f32 %v7637_v19, %v7248_v17  ;;  %v3476_v27 = vmax.f32 %v3460_v38, %v7675_v36  ;;  %v7898_v17 = vpop.permute.xlu0 %3708  ;;  %v3461_v19 = vld [vmem:[#allocation2 + $0x18] sm:$0xff] }
 0x23f   : > { %3234 = vst.msk [vmem:[#allocation2 + $0x68] sm:$0xff] %vm260_vm2, %v3218_v41  ;;  %v3321_v16 = vsel %vm627_vm6, %v3282_v39, %v7841_v34  ;;  %v3551_v12 = vmax.f32 %v3549_v57, %v3550_v60  ;;  %v3470_v25 = vld [vmem:[#allocation2 + $0x60] sm:$0xff]  ;;  %v3305_v4 = vmax.f32 %v3303_v47, %v3304_v8  ;;  %v3713_v54 = vmul.f32 %v7339_v14, %v7881_v58  ;;  %v7908_v57 = vpop.permute.xlu1 %3973  ;;  %v8544_v38 = vld [vmem:[#allocation24_spill] sm:$0xff] }
 0x240   : > { %v3486_v6 = vmax.f32 %v3470_v25, %v7858_v15  ;;  %v3574_v0 = vmax.f32 %v3572_v21, %v3573_v20  ;;  %v3295_v46 = vrot.slane %v3294_v51, 4  ;;  %v7895_v9 = vsel %vm629_vm7, %v3291_v44, %v3321_v16  ;;  %3492 = vst.msk [vmem:[#allocation2 + $0x10] sm:$0xff] %vm260_vm2, %v3476_v27  ;;  %v3727_v60 = vld [vmem:[#allocation2] sm:$0xff] }
 0x241   : > { %v3590_v36 = vsel %vm627_vm6, %v3551_v12, %v7847_v28  ;;  %v3306_v34 = vrot.slane %v3305_v4, 2  ;;  %v3562_v10 = vsel %vm260_vm2, %v3455_v2, -inf  ;;  %v3785_v14 = vsel %vm260_vm2, %v3713_v54, -inf }
 0x242   : > { %3502 = vst.msk [vmem:[#allocation2 + $0x60] sm:$0xff] %vm260_vm2, %v3486_v6  ;;  %v3575_v15 = vrot.slane %v3574_v0, 2  ;;  %v3296_v29 = vmax.f32 %v3294_v51, %v3295_v46  ;;  %v3563_v1 = vmax.f32 %v3561_v49, %v3562_v10  ;;  %v7906_v44 = vsel %vm629_vm7, %v3560_v7, %v3590_v36  ;;  %v8545_v6 = vld [vmem:[#allocation23_spill] sm:$0xff]  ;;  %v8546_v46 = vld [vmem:[#allocation26_spill] sm:$0xff] }
 0x243   : > { %v3307_v33 = vmax.f32 %v3305_v4, %v3306_v34  ;;  %v3473_v47 = vld [vmem:[#allocation2 + $0x78] sm:$0xff]  ;;  %v3711_v28 = vmul.f32 %v7881_v58, %v8543_v32  ;;  %v3477_v26 = vmax.f32 %v3461_v19, %v7651_v52  ;;  %v3714_v53 = vmul.f32 %v8544_v38, %v7898_v17  ;;  %v8547_v38 = vld [vmem:[#allocation25_spill] sm:$0xff] }
 0x244   : > { %v3489_v21 = vmax.f32 %v3473_v47, %v7871_v23  ;;  %v3576_v41 = vmax.f32 %v3574_v0, %v3575_v15  ;;  %v3297_v39 = vrot.slane %v3296_v29, 2  ;;  %v3564_v49 = vrot.slane %v3563_v1, 4 }
 0x245   : > { %v3308_v7 = vrot.slane %v3307_v33, 1  ;;  %v3743_v42 = vmax.f32 %v3727_v60, %v3711_v28  ;;  %v3776_v20 = vsel %vm260_vm2, %v3711_v28, -inf  ;;  %3493 = vst.msk [vmem:[#allocation2 + $0x18] sm:$0xff] %vm260_vm2, %v3477_v26  ;;  %v3786_v51 = vsel %vm260_vm2, %v3714_v53, -inf }
 0x246   : > { %v3471_v8 = vld [vmem:[#allocation2 + $0x68] sm:$0xff]  ;;  %3505 = vst.msk [vmem:[#allocation2 + $0x78] sm:$0xff] %vm260_vm2, %v3489_v21  ;;  %v3577_v52 = vrot.slane %v3576_v41, 1  ;;  %v3298_v27 = vmax.f32 %v3296_v29, %v3297_v39  ;;  %v3565_v12 = vmax.f32 %v3563_v1, %v3564_v49  ;;  %v3787_v4 = vmax.f32 %v3785_v14, %v3786_v51  ;;  %v7928_v29 = vpop.permute.xlu1 %3977  ;;  %v8549_v49 = vld [vmem:[#allocation28_spill] sm:$0xff] }
 0x247   : > { %v3487_v16 = vmax.f32 %v3471_v8, %v3455_v2  ;;  %v3309_v23 = vmax.f32 %v3307_v33, %v3308_v7  ;;  %v3729_v25 = vld [vmem:[#allocation2 + $0x10] sm:$0xff]  ;;  %3759 = vst.msk [vmem:[#allocation2] sm:$0xff] %vm260_vm2, %v3743_v42  ;;  %v7923_v0 = vmul.f32 %v8545_v6, %v7908_v57  ;;  %v3712_v19 = vmul.f32 %v7898_v17, %v8546_v46  ;;  %v3728_v2 = vld [vmem:[#allocation2 + $0x8] sm:$0xff]  ;;  %v8550_v7 = vld [vmem:[#allocation29_spill] sm:$0xff] }
 0x248   : > { %v3578_v36 = vmax.f32 %v3576_v41, %v3577_v52  ;;  %v3299_v34 = vrot.slane %v3298_v27, 1  ;;  %v3566_v10 = vrot.slane %v3565_v12, 2  ;;  %v3745_v15 = vmax.f32 %v3729_v25, %v3713_v54  ;;  %v8548_v54 = vld [vmem:[#allocation27_spill] sm:$0xff] }
 0x249   : > { %3503 = vst.msk [vmem:[#allocation2 + $0x68] sm:$0xff] %vm260_vm2, %v3487_v16  ;;  %v3788_v1 = vrot.slane %v3787_v4, 4  ;;  %v4054_v14 = vsel %vm260_vm2, %v7923_v0, -inf  ;;  %v3744_v33 = vmax.f32 %v3728_v2, %v3712_v19  ;;  %v3777_v47 = vsel %vm260_vm2, %v3712_v19, -inf  ;;  %v3237_v16 = vld [vmem:[#allocation3] sm:$0xff]  ;;  %v3733_v2 = vld [vmem:[#allocation2 + $0x30] sm:$0xff] }
 0x24a   : > { %v3300_v32 = vmax.f32 %v3298_v27, %v3299_v34  ;;  %v3567_v28 = vmax.f32 %v3565_v12, %v3566_v10  ;;  %3761 = vst.msk [vmem:[#allocation2 + $0x10] sm:$0xff] %vm260_vm2, %v3745_v15  ;;  %v3778_v26 = vmax.f32 %v3776_v20, %v3777_v47  ;;  %v3980_v21 = vmul.f32 %v7908_v57, %v8547_v38 }
 0x24b   : > { %v3789_v41 = vmax.f32 %v3787_v4, %v3788_v1  ;;  %3760 = vst.msk [vmem:[#allocation2 + $0x8] sm:$0xff] %vm260_vm2, %v3744_v33  ;;  %v7939_v39 = vmul.f32 %v8548_v54, %v7928_v29  ;;  %v3981_v60 = vmul.f32 %v7928_v29, %v8549_v49  ;;  %v3717_v8 = vmul.f32 %v8550_v7, %v7881_v58 }
 0x24c   : > { %v3323_v42 = vsel %vm631_vm8, %v3300_v32, %v7895_v9  ;;  %v3568_v20 = vrot.slane %v3567_v28, 1  ;;  %v3730_v51 = vld [vmem:[#allocation2 + $0x18] sm:$0xff]  ;;  %v3779_v52 = vrot.slane %v3778_v26, 4  ;;  %v4045_v27 = vsel %vm260_vm2, %v3980_v21, -inf }
 0x24d   : > { %v3324_v12 = vsel %vm633_vm9, %v3309_v23, %v3323_v42  ;;  %v3746_v25 = vmax.f32 %v3730_v51, %v3714_v53  ;;  %v3790_v4 = vrot.slane %v3789_v41, 2  ;;  %v4055_v6 = vsel %vm260_vm2, %v7939_v39, -inf }
 0x24e   : > { %v3326_v46 = vadd.f32 %v3324_v12, %v3237_v16  ;;  %v3569_v19 = vmax.f32 %v3567_v28, %v3568_v20  ;;  %v3780_v34 = vmax.f32 %v3778_v26, %v3779_v52  ;;  %v3996_v10 = vld [vmem:[#allocation2] sm:$0xff]  ;;  %v4056_v15 = vmax.f32 %v4054_v14, %v4055_v6  ;;  %v8551_v52 = vld [vmem:[#allocation30_spill] sm:$0xff]  ;;  %v8553_v6 = vld [vmem:[#allocation31_spill] sm:$0xff] }
 0x24f   : > { %3762 = vst.msk [vmem:[#allocation2 + $0x18] sm:$0xff] %vm260_vm2, %v3746_v25  ;;  %v3791_v9 = vmax.f32 %v3789_v41, %v3790_v4  ;;  %v4012_v1 = vmax.f32 %v3996_v10, %v3980_v21  ;;  %v4046_v33 = vsel %vm260_vm2, %v3981_v60, -inf  ;;  %v3749_v47 = vmax.f32 %v3733_v2, %v3717_v8  ;;  %v3731_v25 = vld [vmem:[#allocation2 + $0x20] sm:$0xff] }
 0x250   : > { %3327 = vst.msk [vmem:[#allocation3] sm:$0xff] %vm260_vm2, %v3326_v46  ;;  %v3592_v53 = vsel %vm631_vm8, %v3569_v19, %v7906_v44  ;;  %v3781_v23 = vrot.slane %v3780_v34, 2  ;;  %v4047_v32 = vmax.f32 %v4045_v27, %v4046_v33  ;;  %v4057_v38 = vrot.slane %v4056_v15, 4  ;;  %v8554_v19 = vld [vmem:[#allocation33_spill] sm:$0xff] }
 0x251   : > { %v3593_v28 = vsel %vm633_vm9, %v3578_v36, %v3592_v53  ;;  %v3792_v26 = vrot.slane %v3791_v9, 1  ;;  %v3998_v14 = vld [vmem:[#allocation2 + $0x10] sm:$0xff]  ;;  %4028 = vst.msk [vmem:[#allocation2] sm:$0xff] %vm260_vm2, %v4012_v1  ;;  %3765 = vst.msk [vmem:[#allocation2 + $0x30] sm:$0xff] %vm260_vm2, %v3749_v47  ;;  %v3803_v21 = vsel %vm260_vm2, %v3717_v8, -inf  ;;  %v3986_v41 = vmul.f32 %v7409_v56, %v7908_v57  ;;  %v3734_v1 = vld [vmem:[#allocation2 + $0x38] sm:$0xff] }
 0x252   : > { %v4014_v54 = vmax.f32 %v3998_v14, %v7923_v0  ;;  %v3782_v49 = vmax.f32 %v3780_v34, %v3781_v23  ;;  %v3997_v44 = vld [vmem:[#allocation2 + $0x8] sm:$0xff]  ;;  %v4048_v7 = vrot.slane %v4047_v32, 4  ;;  %v4058_v42 = vmax.f32 %v4056_v15, %v4057_v38  ;;  %v8552_v56 = vld [vmem:[#allocation7_spill] sm:$0xff] }
 0x253   : > { %v3793_v20 = vmax.f32 %v3791_v9, %v3792_v26  ;;  %v4013_v51 = vmax.f32 %v3997_v44, %v3981_v60  ;;  %v4072_v36 = vsel %vm260_vm2, %v3986_v41, -inf  ;;  %v3715_v27 = vmul.f32 %v7881_v58, %v8551_v52 }
 0x254   : > { %4030 = vst.msk [vmem:[#allocation2 + $0x10] sm:$0xff] %vm260_vm2, %v4014_v54  ;;  %v3783_v16 = vrot.slane %v3782_v49, 1  ;;  %v4049_v8 = vmax.f32 %v4047_v32, %v4048_v7  ;;  %v4059_v12 = vrot.slane %v4058_v42, 2  ;;  %v7969_v0 = vmul.f32 %v7908_v57, %v8552_v56  ;;  %v8555_v32 = vld [vmem:[#allocation8_spill] sm:$0xff]  ;;  %v3732_v7 = vld [vmem:[#allocation2 + $0x28] sm:$0xff] }
 0x255   : > { %4029 = vst.msk [vmem:[#allocation2 + $0x8] sm:$0xff] %vm260_vm2, %v4013_v51  ;;  %v3747_v4 = vmax.f32 %v3731_v25, %v3715_v27  ;;  %v3794_v60 = vsel %vm260_vm2, %v3715_v27, -inf  ;;  %v3718_v46 = vmul.f32 %v8553_v6, %v7898_v17  ;;  %v7977_v34 = vmul.f32 %v8554_v19, %v7928_v29 }
 0x256   : > { %v3784_v10 = vmax.f32 %v3782_v49, %v3783_v16  ;;  %v4050_v15 = vrot.slane %v4049_v8, 2  ;;  %v4060_v2 = vmax.f32 %v4058_v42, %v4059_v12  ;;  %v4063_v9 = vsel %vm260_vm2, %v7969_v0, -inf }
 0x257   : > { %v3506_v33 = vld [vmem:[#allocation3] sm:$0xff]  ;;  %3763 = vst.msk [vmem:[#allocation2 + $0x20] sm:$0xff] %vm260_vm2, %v3747_v4  ;;  %v3750_v47 = vmax.f32 %v3734_v1, %v3718_v46  ;;  %v3804_v53 = vsel %vm260_vm2, %v3718_v46, -inf  ;;  %v4073_v23 = vsel %vm260_vm2, %v7977_v34, -inf  ;;  %v3716_v38 = vmul.f32 %v7898_v17, %v8555_v32  ;;  %v8558_v46 = vld [vmem:[#allocation35_spill] sm:$0xff] }
 0x258   : > { %v3595_v26 = vadd.f32 %v3593_v28, %v3506_v33  ;;  %v7988_v14 = vsel %vm621_vm3, %v3793_v20, %v3784_v10  ;;  %v4051_v54 = vmax.f32 %v4049_v8, %v4050_v15  ;;  %v4061_v49 = vrot.slane %v4060_v2, 1  ;;  %v4002_v44 = vld [vmem:[#allocation2 + $0x30] sm:$0xff]  ;;  %v8556_v28 = vld [vmem:[#allocation34_spill] sm:$0xff]  ;;  %v8559_v10 = vld [vmem:[#allocation9_spill] sm:$0xff] }
 0x259   : > { %v4018_v42 = vmax.f32 %v4002_v44, %v3986_v41  ;;  %3766 = vst.msk [vmem:[#allocation2 + $0x38] sm:$0xff] %vm260_vm2, %v3750_v47  ;;  %v3805_v51 = vmax.f32 %v3803_v21, %v3804_v53  ;;  %v4074_v52 = vmax.f32 %v4072_v36, %v4073_v23  ;;  %v3748_v27 = vmax.f32 %v3732_v7, %v3716_v38  ;;  %v8557_v21 = vld [vmem:[#allocation32_spill] sm:$0xff]  ;;  %v3737_v53 = vld [vmem:[#allocation2 + $0x50] sm:$0xff] }
 0x25a   : > { %3596 = vst.msk [vmem:[#allocation3] sm:$0xff] %vm260_vm2, %v3595_v26  ;;  %v4052_v16 = vrot.slane %v4051_v54, 1  ;;  %v4062_v12 = vmax.f32 %v4060_v2, %v4061_v49  ;;  %v3795_v25 = vsel %vm260_vm2, %v3716_v38, -inf  ;;  %v3985_v20 = vmul.f32 %v7928_v29, %v8556_v28 }
 0x25b   : > { %4034 = vst.msk [vmem:[#allocation2 + $0x30] sm:$0xff] %vm260_vm2, %v4018_v42  ;;  %v3806_v8 = vrot.slane %v3805_v51, 4  ;;  %v4075_v56 = vrot.slane %v4074_v52, 4  ;;  %3764 = vst.msk [vmem:[#allocation2 + $0x28] sm:$0xff] %vm260_vm2, %v3748_v27  ;;  %v3796_v41 = vmax.f32 %v3794_v60, %v3795_v25  ;;  %v3721_v36 = vmul.f32 %v8557_v21, %v7881_v58  ;;  %v3735_v42 = vld [vmem:[#allocation2 + $0x40] sm:$0xff] }
 0x25c   : > { %v4053_v4 = vmax.f32 %v4051_v54, %v4052_v16  ;;  %v4064_v6 = vsel %vm260_vm2, %v3985_v20, -inf  ;;  %v8002_v19 = vmul.f32 %v8558_v46, %v7908_v57  ;;  %v3719_v15 = vmul.f32 %v7881_v58, %v8559_v10  ;;  %v8560_v16 = vld [vmem:[#allocation10_spill] sm:$0xff] }
 0x25d   : > { %v3807_v2 = vmax.f32 %v3805_v51, %v3806_v8  ;;  %v4076_v1 = vmax.f32 %v4074_v52, %v4075_v56  ;;  %v3797_v33 = vrot.slane %v3796_v41, 4  ;;  %v4065_v47 = vmax.f32 %v4063_v9, %v4064_v6  ;;  %v8562_v6 = vld [vmem:[#allocation11_spill] sm:$0xff] }
 0x25e   : > { %v8007_v60 = vsel %vm621_vm3, %v4062_v12, %v4053_v4  ;;  %v4000_v23 = vld [vmem:[#allocation2 + $0x20] sm:$0xff]  ;;  %v3753_v32 = vmax.f32 %v3737_v53, %v3721_v36  ;;  %v3821_v38 = vsel %vm260_vm2, %v3721_v36, -inf  ;;  %v4090_v26 = vsel %vm260_vm2, %v8002_v19, -inf  ;;  %v8561_v36 = vld [vmem:[#allocation36_spill] sm:$0xff] }
 0x25f   : > { %v4016_v54 = vmax.f32 %v4000_v23, %v7969_v0  ;;  %v3808_v49 = vrot.slane %v3807_v2, 2  ;;  %v4077_v44 = vrot.slane %v4076_v1, 2  ;;  %v3798_v7 = vmax.f32 %v3796_v41, %v3797_v33 }
 0x260   : > { %v4003_v51 = vld [vmem:[#allocation2 + $0x38] sm:$0xff]  ;;  %v4066_v52 = vrot.slane %v4065_v47, 4  ;;  %3769 = vst.msk [vmem:[#allocation2 + $0x50] sm:$0xff] %vm260_vm2, %v3753_v32  ;;  %v3751_v9 = vmax.f32 %v3735_v42, %v3719_v15  ;;  %v3812_v27 = vsel %vm260_vm2, %v3719_v15, -inf  ;;  %v3988_v12 = vmul.f32 %v7908_v57, %v8560_v16 }
 0x261   : > { %4032 = vst.msk [vmem:[#allocation2 + $0x20] sm:$0xff] %vm260_vm2, %v4016_v54  ;;  %v3809_v25 = vmax.f32 %v3807_v2, %v3808_v49  ;;  %v4019_v28 = vmax.f32 %v4003_v51, %v7977_v34  ;;  %v4078_v0 = vmax.f32 %v4076_v1, %v4077_v44  ;;  %v3799_v8 = vrot.slane %v3798_v7, 2  ;;  %v3738_v1 = vld [vmem:[#allocation2 + $0x58] sm:$0xff] }
 0x262   : > { %v4001_v56 = vld [vmem:[#allocation2 + $0x28] sm:$0xff]  ;;  %v4067_v41 = vmax.f32 %v4065_v47, %v4066_v52  ;;  %3767 = vst.msk [vmem:[#allocation2 + $0x40] sm:$0xff] %vm260_vm2, %v3751_v9  ;;  %v4081_v21 = vsel %vm260_vm2, %v3988_v12, -inf  ;;  %v3722_v4 = vmul.f32 %v8561_v36, %v7898_v17  ;;  %v8025_v46 = vmul.f32 %v8562_v6, %v7928_v29  ;;  %v8564_v52 = vld [vmem:[#allocation37_spill] sm:$0xff] }
 0x263   : > { %v3810_v10 = vrot.slane %v3809_v25, 1  ;;  %4035 = vst.msk [vmem:[#allocation2 + $0x38] sm:$0xff] %vm260_vm2, %v4019_v28  ;;  %v4079_v15 = vrot.slane %v4078_v0, 1  ;;  %v3800_v34 = vmax.f32 %v3798_v7, %v3799_v8  ;;  %v4017_v2 = vmax.f32 %v4001_v56, %v3985_v20  ;;  %v8563_v7 = vld [vmem:[#allocation12_spill] sm:$0xff] }
 0x264   : > { %v4068_v33 = vrot.slane %v4067_v41, 2  ;;  %v3754_v47 = vmax.f32 %v3738_v1, %v3722_v4  ;;  %v3822_v53 = vsel %vm260_vm2, %v3722_v4, -inf  ;;  %v4091_v23 = vsel %vm260_vm2, %v8025_v46, -inf  ;;  %v3741_v1 = vld [vmem:[#allocation2 + $0x70] sm:$0xff] }
 0x265   : > { %v3811_v32 = vmax.f32 %v3809_v25, %v3810_v10  ;;  %v4080_v54 = vmax.f32 %v4078_v0, %v4079_v15  ;;  %v3801_v49 = vrot.slane %v3800_v34, 1  ;;  %4033 = vst.msk [vmem:[#allocation2 + $0x28] sm:$0xff] %vm260_vm2, %v4017_v2  ;;  %v3823_v44 = vmax.f32 %v3821_v38, %v3822_v53  ;;  %v3736_v25 = vld [vmem:[#allocation2 + $0x48] sm:$0xff] }
 0x266   : > { %v4069_v42 = vmax.f32 %v4067_v41, %v4068_v33  ;;  %3770 = vst.msk [vmem:[#allocation2 + $0x58] sm:$0xff] %vm260_vm2, %v3754_v47  ;;  %v4092_v51 = vmax.f32 %v4090_v26, %v4091_v23  ;;  %v3720_v20 = vmul.f32 %v7898_v17, %v8563_v7  ;;  %v8037_v9 = vmul.f32 %v7928_v29, %v8564_v52  ;;  %v8565_v52 = vld [vmem:[#allocation38_spill] sm:$0xff] }
 0x267   : > { %v3802_v16 = vmax.f32 %v3800_v34, %v3801_v49  ;;  %v4006_v28 = vld [vmem:[#allocation2 + $0x50] sm:$0xff]  ;;  %v3824_v8 = vrot.slane %v3823_v44, 4  ;;  %v3725_v0 = vmul.f32 %v7490_v59, %v7881_v58  ;;  %v8043_v38 = vmul.f32 %v7492_v63, %v7908_v57 }
 0x268   : > { %v4070_v56 = vrot.slane %v4069_v42, 1  ;;  %v4022_v26 = vmax.f32 %v4006_v28, %v8002_v19  ;;  %v4093_v41 = vrot.slane %v4092_v51, 4  ;;  %v3752_v36 = vmax.f32 %v3736_v25, %v3720_v20  ;;  %v3739_v25 = vld [vmem:[#allocation2 + $0x60] sm:$0xff] }
 0x269   : > { %v3857_v4 = vsel %vm623_vm4, %v3802_v16, %v7988_v14  ;;  %v4004_v6 = vld [vmem:[#allocation2 + $0x40] sm:$0xff]  ;;  %v3825_v10 = vmax.f32 %v3823_v44, %v3824_v8  ;;  %v3813_v15 = vsel %vm260_vm2, %v3720_v20, -inf  ;;  %v4082_v34 = vsel %vm260_vm2, %v8037_v9, -inf }
 0x26a   : > { %v4071_v59 = vmax.f32 %v4069_v42, %v4070_v56  ;;  %4038 = vst.msk [vmem:[#allocation2 + $0x50] sm:$0xff] %vm260_vm2, %v4022_v26  ;;  %v4020_v63 = vmax.f32 %v4004_v6, %v3988_v12  ;;  %v4094_v2 = vmax.f32 %v4092_v51, %v4093_v41  ;;  %3768 = vst.msk [vmem:[#allocation2 + $0x48] sm:$0xff] %vm260_vm2, %v3752_v36  ;;  %v3839_v12 = vsel %vm260_vm2, %v3725_v0, -inf  ;;  %v3742_v6 = vld [vmem:[#allocation2 + $0x78] sm:$0xff] }
 0x26b   : > { %v3814_v19 = vmax.f32 %v3812_v27, %v3813_v15  ;;  %v3826_v33 = vrot.slane %v3825_v10, 2  ;;  %v8054_v47 = vsel %vm625_vm5, %v3811_v32, %v3857_v4  ;;  %v4083_v14 = vmax.f32 %v4081_v21, %v4082_v34 }
 0x26c   : > { %v3757_v53 = vmax.f32 %v3741_v1, %v3725_v0  ;;  %v4126_v23 = vsel %vm623_vm4, %v4071_v59, %v8007_v60  ;;  %4036 = vst.msk [vmem:[#allocation2 + $0x40] sm:$0xff] %vm260_vm2, %v4020_v63  ;;  %v4095_v49 = vrot.slane %v4094_v2, 2  ;;  %v4108_v21 = vsel %vm260_vm2, %v8043_v38, -inf  ;;  %v8566_v0 = vld [vmem:[#allocation39_spill] sm:$0xff] }
 0x26d   : > { %v3815_v44 = vrot.slane %v3814_v19, 4  ;;  %v3827_v42 = vmax.f32 %v3825_v10, %v3826_v33  ;;  %v4007_v51 = vld [vmem:[#allocation2 + $0x58] sm:$0xff]  ;;  %v4084_v7 = vrot.slane %v4083_v14, 4  ;;  %v4127_v27 = vsel %vm625_vm5, %v4080_v54, %v4126_v23  ;;  %v8567_v54 = vld [vmem:[#allocation13_spill] sm:$0xff] }
 0x26e   : > { %3773 = vst.msk [vmem:[#allocation2 + $0x70] sm:$0xff] %vm260_vm2, %v3757_v53  ;;  %v4023_v32 = vmax.f32 %v4007_v51, %v8025_v46  ;;  %v4096_v20 = vmax.f32 %v4094_v2, %v4095_v49  ;;  %v3723_v16 = vmul.f32 %v7881_v58, %v8565_v52  ;;  %v8069_v56 = vmul.f32 %v7908_v57, %v8566_v0  ;;  %v8077_v57 = vpop.permute.xlu0 %4242  ;;  %v8568_v53 = vld [vmem:[#allocation14_spill] sm:$0xff]  ;;  %v8569_v49 = vld [vmem:[#allocation15_spill] sm:$0xff] }
 0x26f   : > { %v3816_v60 = vmax.f32 %v3814_v19, %v3815_v44  ;;  %v3828_v28 = vrot.slane %v3827_v42, 1  ;;  %v4085_v8 = vmax.f32 %v4083_v14, %v4084_v7  ;;  %v3726_v26 = vmul.f32 %v8567_v54, %v7898_v17  ;;  %v8570_v7 = vld [vmem:[#allocation54_spill] sm:$0xff] }
 0x270   : > { %4039 = vst.msk [vmem:[#allocation2 + $0x58] sm:$0xff] %vm260_vm2, %v4023_v32  ;;  %v4097_v41 = vrot.slane %v4096_v20, 1  ;;  %v3755_v46 = vmax.f32 %v3739_v25, %v3723_v16  ;;  %v3830_v4 = vsel %vm260_vm2, %v3723_v16, -inf  ;;  %v4099_v34 = vsel %vm260_vm2, %v8069_v56, -inf  ;;  %v3740_v16 = vld [vmem:[#allocation2 + $0x68] sm:$0xff] }
 0x271   : > { %v3817_v36 = vrot.slane %v3816_v60, 2  ;;  %v3829_v10 = vmax.f32 %v3827_v42, %v3828_v28  ;;  %v4005_v58 = vld [vmem:[#allocation2 + $0x48] sm:$0xff]  ;;  %v4086_v15 = vrot.slane %v4085_v8, 2  ;;  %v3758_v59 = vmax.f32 %v3742_v6, %v3726_v26  ;;  %v8098_v28 = vpop.permute.xlu1 %4246 }
 0x272   : > { %v4098_v63 = vmax.f32 %v4096_v20, %v4097_v41  ;;  %v4021_v19 = vmax.f32 %v4005_v58, %v8037_v9  ;;  %3771 = vst.msk [vmem:[#allocation2 + $0x60] sm:$0xff] %vm260_vm2, %v3755_v46  ;;  %v3840_v1 = vsel %vm260_vm2, %v3726_v26, -inf  ;;  %v3995_v23 = vmul.f32 %v8568_v53, %v7928_v29 }
 0x273   : > { %v3818_v2 = vmax.f32 %v3816_v60, %v3817_v36  ;;  %v4087_v33 = vmax.f32 %v4085_v8, %v4086_v15  ;;  %3774 = vst.msk [vmem:[#allocation2 + $0x78] sm:$0xff] %vm260_vm2, %v3758_v59  ;;  %v3841_v14 = vmax.f32 %v3839_v12, %v3840_v1  ;;  %v3724_v44 = vmul.f32 %v7898_v17, %v8569_v49 }
 0x274   : > { %4037 = vst.msk [vmem:[#allocation2 + $0x48] sm:$0xff] %vm260_vm2, %v4021_v19  ;;  %v8090_v9 = vmul.f32 %v7928_v29, %v8570_v7  ;;  %v4251_v32 = vmul.f32 %v7561_v62, %v8077_v57  ;;  %v4249_v12 = vmul.f32 %v8077_v57, %v7567_v18  ;;  %v4109_v17 = vsel %vm260_vm2, %v3995_v23, -inf }
 0x275   : > { %v3819_v42 = vrot.slane %v3818_v2, 1  ;;  %v4010_v51 = vld [vmem:[#allocation2 + $0x70] sm:$0xff]  ;;  %v4088_v20 = vrot.slane %v4087_v33, 1  ;;  %v3842_v52 = vrot.slane %v3841_v14, 4  ;;  %v4110_v25 = vmax.f32 %v4108_v21, %v4109_v17 }
 0x276   : > { %v4026_v60 = vmax.f32 %v4010_v51, %v8043_v38  ;;  %v3756_v0 = vmax.f32 %v3740_v16, %v3724_v44  ;;  %v3831_v29 = vsel %vm260_vm2, %v3724_v44, -inf  ;;  %v4100_v18 = vsel %vm260_vm2, %v8090_v9, -inf  ;;  %v4267_v38 = vld [vmem:[#allocation2 + $0x10] sm:$0xff]  ;;  %v4265_v44 = vld [vmem:[#allocation2] sm:$0xff] }
 0x277   : > { %v3820_v8 = vmax.f32 %v3818_v2, %v3819_v42  ;;  %v4089_v54 = vmax.f32 %v4087_v33, %v4088_v20  ;;  %v3843_v62 = vmax.f32 %v3841_v14, %v3842_v52  ;;  %v3832_v26 = vmax.f32 %v3830_v4, %v3831_v29  ;;  %v8115_v42 = vpop.permute.xlu1 %4511 }
 0x278   : > { %4042 = vst.msk [vmem:[#allocation2 + $0x70] sm:$0xff] %vm260_vm2, %v4026_v60  ;;  %v4111_v36 = vrot.slane %v4110_v25, 4  ;;  %3772 = vst.msk [vmem:[#allocation2 + $0x68] sm:$0xff] %vm260_vm2, %v3756_v0  ;;  %v4101_v46 = vmax.f32 %v4099_v34, %v4100_v18  ;;  %v4283_v21 = vmax.f32 %v4267_v38, %v4251_v32  ;;  %v4281_v51 = vmax.f32 %v4265_v44, %v4249_v12  ;;  %v3775_v44 = vld [vmem:[#allocation3] sm:$0xff] }
 0x279   : > { %v3859_v41 = vsel %vm627_vm6, %v3820_v8, %v8054_v47  ;;  %v4128_v6 = vsel %vm627_vm6, %v4089_v54, %v4127_v27  ;;  %v4008_v58 = vld [vmem:[#allocation2 + $0x60] sm:$0xff]  ;;  %v3844_v15 = vrot.slane %v3843_v62, 2  ;;  %v3833_v59 = vrot.slane %v3832_v26, 4  ;;  %v3999_v47 = vld [vmem:[#allocation2 + $0x18] sm:$0xff] }
 0x27a   : > { %v3860_v2 = vsel %vm629_vm7, %v3829_v10, %v3859_v41  ;;  %v4024_v4 = vmax.f32 %v4008_v58, %v8069_v56  ;;  %v4011_v19 = vld [vmem:[#allocation2 + $0x78] sm:$0xff]  ;;  %v4112_v1 = vmax.f32 %v4110_v25, %v4111_v36  ;;  %v4102_v33 = vrot.slane %v4101_v46, 4  ;;  %4299 = vst.msk [vmem:[#allocation2 + $0x10] sm:$0xff] %vm260_vm2, %v4283_v21  ;;  %4297 = vst.msk [vmem:[#allocation2] sm:$0xff] %vm260_vm2, %v4281_v51 }
 0x27b   : > { %v8111_v14 = vsel %vm629_vm7, %v4098_v63, %v4128_v6  ;;  %v3845_v34 = vmax.f32 %v3843_v62, %v3844_v15  ;;  %v4027_v53 = vmax.f32 %v4011_v19, %v3995_v23  ;;  %v3834_v49 = vmax.f32 %v3832_v26, %v3833_v59  ;;  %v8119_v63 = vpop.permute.xlu0 %4515 }
 0x27c   : > { %v4323_v27 = vsel %vm260_vm2, %v4251_v32, -inf  ;;  %4040 = vst.msk [vmem:[#allocation2 + $0x60] sm:$0xff] %vm260_vm2, %v4024_v4  ;;  %v4113_v56 = vrot.slane %v4112_v1, 2  ;;  %v4103_v10 = vmax.f32 %v4101_v46, %v4102_v33  ;;  %v4314_v7 = vsel %vm260_vm2, %v4249_v12, -inf }
 0x27d   : > { %v3846_v20 = vrot.slane %v3845_v34, 1  ;;  %4043 = vst.msk [vmem:[#allocation2 + $0x78] sm:$0xff] %vm260_vm2, %v4027_v53  ;;  %v3835_v60 = vrot.slane %v3834_v49, 2  ;;  %v4015_v23 = vmax.f32 %v3999_v47, %v7939_v39  ;;  %v4252_v32 = vmul.f32 %v7660_v3, %v8098_v28 }
 0x27e   : > { %v4114_v52 = vmax.f32 %v4112_v1, %v4113_v56  ;;  %v4104_v17 = vrot.slane %v4103_v10, 2  ;;  %v4250_v16 = vmul.f32 %v8098_v28, %v7665_v35  ;;  %v4520_v12 = vmul.f32 %v7657_v22, %v8115_v42  ;;  %v4266_v35 = vld [vmem:[#allocation2 + $0x8] sm:$0xff] }
 0x27f   : > { %v3847_v8 = vmax.f32 %v3845_v34, %v3846_v20  ;;  %v3836_v25 = vmax.f32 %v3834_v49, %v3835_v60  ;;  %v4009_v0 = vld [vmem:[#allocation2 + $0x68] sm:$0xff]  ;;  %4031 = vst.msk [vmem:[#allocation2 + $0x18] sm:$0xff] %vm260_vm2, %v4015_v23  ;;  %v4324_v39 = vsel %vm260_vm2, %v4252_v32, -inf  ;;  %v8134_v3 = vmul.f32 %v7667_v31, %v8119_v63 }
 0x280   : > { %v4115_v29 = vrot.slane %v4114_v52, 1  ;;  %v4025_v54 = vmax.f32 %v4009_v0, %v8090_v9  ;;  %v4105_v62 = vmax.f32 %v4103_v10, %v4104_v17  ;;  %v4325_v26 = vmax.f32 %v4323_v27, %v4324_v39 }
 0x281   : > { %v3837_v18 = vrot.slane %v3836_v25, 1  ;;  %v4282_v38 = vmax.f32 %v4266_v35, %v4250_v16  ;;  %v4315_v22 = vsel %vm260_vm2, %v4250_v16, -inf  ;;  %v4536_v41 = vld [vmem:[#allocation2 + $0x10] sm:$0xff]  ;;  %v4592_v36 = vsel %vm260_vm2, %v4520_v12, -inf  ;;  %v4534_v53 = vld [vmem:[#allocation2] sm:$0xff] }
 0x282   : > { %v4116_v46 = vmax.f32 %v4114_v52, %v4115_v29  ;;  %4041 = vst.msk [vmem:[#allocation2 + $0x68] sm:$0xff] %vm260_vm2, %v4025_v54  ;;  %v4106_v21 = vrot.slane %v4105_v62, 1  ;;  %v4326_v6 = vrot.slane %v4325_v26, 4  ;;  %v4316_v31 = vmax.f32 %v4314_v7, %v4315_v22 }
 0x283   : > { %v3838_v58 = vmax.f32 %v3836_v25, %v3837_v18  ;;  %4298 = vst.msk [vmem:[#allocation2 + $0x8] sm:$0xff] %vm260_vm2, %v4282_v38  ;;  %v4552_v9 = vmax.f32 %v4536_v41, %v4520_v12  ;;  %v4593_v15 = vsel %vm260_vm2, %v8134_v3, -inf  ;;  %v4518_v59 = vmul.f32 %v8115_v42, %v7662_v48  ;;  %v4269_v18 = vld [vmem:[#allocation2 + $0x20] sm:$0xff] }
 0x284   : > { %v4107_v4 = vmax.f32 %v4105_v62, %v4106_v21  ;;  %v4327_v19 = vmax.f32 %v4325_v26, %v4326_v6  ;;  %v4317_v1 = vrot.slane %v4316_v31, 4  ;;  %v4594_v33 = vmax.f32 %v4592_v36, %v4593_v15 }
 0x285   : > { %v3861_v47 = vsel %vm631_vm8, %v3838_v58, %v3860_v2  ;;  %4568 = vst.msk [vmem:[#allocation2 + $0x10] sm:$0xff] %vm260_vm2, %v4552_v9  ;;  %v4519_v34 = vmul.f32 %v8119_v63, %v7677_v13  ;;  %v4583_v49 = vsel %vm260_vm2, %v4518_v59, -inf  ;;  %v4255_v27 = vmul.f32 %v7693_v40, %v8077_v57  ;;  %v4271_v40 = vld [vmem:[#allocation2 + $0x30] sm:$0xff] }
 0x286   : > { %v3862_v48 = vsel %vm633_vm9, %v3847_v8, %v3861_v47  ;;  %v4130_v56 = vsel %vm631_vm8, %v4107_v4, %v8111_v14  ;;  %v4268_v10 = vld [vmem:[#allocation2 + $0x18] sm:$0xff]  ;;  %v4328_v51 = vrot.slane %v4327_v19, 2  ;;  %v4318_v2 = vmax.f32 %v4316_v31, %v4317_v1 }
 0x287   : > { %v3864_v7 = vadd.f32 %v3862_v48, %v3775_v44  ;;  %v4131_v20 = vsel %vm633_vm9, %v4116_v46, %v4130_v56  ;;  %v4284_v60 = vmax.f32 %v4268_v10, %v4252_v32  ;;  %v4595_v13 = vrot.slane %v4594_v33, 4  ;;  %v4272_v4 = vld [vmem:[#allocation2 + $0x38] sm:$0xff]  ;;  %v4270_v48 = vld [vmem:[#allocation2 + $0x28] sm:$0xff] }
 0x288   : > { %v4329_v23 = vmax.f32 %v4327_v19, %v4328_v51  ;;  %v4319_v52 = vrot.slane %v4318_v2, 2  ;;  %v4550_v17 = vmax.f32 %v4534_v53, %v4518_v59  ;;  %v4584_v16 = vsel %vm260_vm2, %v4519_v34, -inf  ;;  %v8571_v1 = vld [vmem:[#allocation40_spill] sm:$0xff] }
 0x289   : > { %3865 = vst.msk [vmem:[#allocation3] sm:$0xff] %vm260_vm2, %v3864_v7  ;;  %4300 = vst.msk [vmem:[#allocation2 + $0x18] sm:$0xff] %vm260_vm2, %v4284_v60  ;;  %v4596_v12 = vmax.f32 %v4594_v33, %v4595_v13  ;;  %v4585_v14 = vmax.f32 %v4583_v49, %v4584_v16  ;;  %v4287_v8 = vmax.f32 %v4271_v40, %v4255_v27  ;;  %v4341_v25 = vsel %vm260_vm2, %v4255_v27, -inf }
 0x28a   : > { %v4330_v0 = vrot.slane %v4329_v23, 1  ;;  %v4320_v39 = vmax.f32 %v4318_v2, %v4319_v52  ;;  %v4535_v29 = vld [vmem:[#allocation2 + $0x8] sm:$0xff]  ;;  %4566 = vst.msk [vmem:[#allocation2] sm:$0xff] %vm260_vm2, %v4550_v17  ;;  %v4524_v32 = vmul.f32 %v7695_v43, %v8115_v42  ;;  %v4253_v54 = vmul.f32 %v8077_v57, %v7698_v11 }
 0x28b   : > { %v4551_v62 = vmax.f32 %v4535_v29, %v4519_v34  ;;  %v4586_v26 = vrot.slane %v4585_v14, 4  ;;  %v4597_v35 = vrot.slane %v4596_v12, 2  ;;  %4303 = vst.msk [vmem:[#allocation2 + $0x30] sm:$0xff] %vm260_vm2, %v4287_v8  ;;  %v8168_v38 = vmul.f32 %v8115_v42, %v7700_v55 }
 0x28c   : > { %v4331_v22 = vmax.f32 %v4329_v23, %v4330_v0  ;;  %v4321_v41 = vrot.slane %v4320_v39, 1  ;;  %v4610_v36 = vsel %vm260_vm2, %v4524_v32, -inf  ;;  %v4285_v46 = vmax.f32 %v4269_v18, %v4253_v54  ;;  %v4275_v23 = vld [vmem:[#allocation2 + $0x50] sm:$0xff]  ;;  %v8572_v0 = vld [vmem:[#allocation41_spill] sm:$0xff] }
 0x28d   : > { %4567 = vst.msk [vmem:[#allocation2 + $0x8] sm:$0xff] %vm260_vm2, %v4551_v62  ;;  %v4587_v43 = vmax.f32 %v4585_v14, %v4586_v26  ;;  %v4598_v21 = vmax.f32 %v4596_v12, %v4597_v35  ;;  %v4332_v11 = vsel %vm260_vm2, %v4253_v54, -inf  ;;  %v4601_v6 = vsel %vm260_vm2, %v8168_v38, -inf }
 0x28e   : > { %v4322_v31 = vmax.f32 %v4320_v39, %v4321_v41  ;;  %4301 = vst.msk [vmem:[#allocation2 + $0x20] sm:$0xff] %vm260_vm2, %v4285_v46  ;;  %v4256_v55 = vmul.f32 %v7710_v61, %v8098_v28  ;;  %v8180_v58 = vmul.f32 %v7712_v24, %v8119_v63  ;;  %v4254_v9 = vmul.f32 %v8098_v28, %v7717_v45 }
 0x28f   : > { %v4588_v15 = vrot.slane %v4587_v43, 2  ;;  %v4599_v59 = vrot.slane %v4598_v21, 1  ;;  %v8186_v19 = vmul.f32 %v8119_v63, %v7719_v50  ;;  %v4259_v33 = vmul.f32 %v8571_v1, %v8077_v57 }
 0x290   : > { %v4044_v47 = vld [vmem:[#allocation3] sm:$0xff]  ;;  %v8191_v61 = vsel %vm621_vm3, %v4331_v22, %v4322_v31  ;;  %v4537_v34 = vld [vmem:[#allocation2 + $0x18] sm:$0xff]  ;;  %v4288_v24 = vmax.f32 %v4272_v4, %v4256_v55  ;;  %v4342_v53 = vsel %vm260_vm2, %v4256_v55, -inf  ;;  %v4611_v45 = vsel %vm260_vm2, %v8180_v58, -inf  ;;  %v8573_v22 = vld [vmem:[#allocation42_spill] sm:$0xff] }
 0x291   : > { %v4133_v49 = vadd.f32 %v4131_v20, %v4044_v47  ;;  %v4553_v27 = vmax.f32 %v4537_v34, %v8134_v3  ;;  %v4589_v44 = vmax.f32 %v4587_v43, %v4588_v15  ;;  %v4600_v50 = vmax.f32 %v4598_v21, %v4599_v59  ;;  %v4273_v21 = vld [vmem:[#allocation2 + $0x40] sm:$0xff]  ;;  %v8575_v15 = vld [vmem:[#allocation18_spill] sm:$0xff]  ;;  %v4276_v34 = vld [vmem:[#allocation2 + $0x58] sm:$0xff] }
 0x292   : > { %v4540_v56 = vld [vmem:[#allocation2 + $0x30] sm:$0xff]  ;;  %4304 = vst.msk [vmem:[#allocation2 + $0x38] sm:$0xff] %vm260_vm2, %v4288_v24  ;;  %v4343_v10 = vmax.f32 %v4341_v25, %v4342_v53  ;;  %v4612_v51 = vmax.f32 %v4610_v36, %v4611_v45  ;;  %v4286_v2 = vmax.f32 %v4270_v48, %v4254_v9  ;;  %v4333_v7 = vsel %vm260_vm2, %v4254_v9, -inf }
 0x293   : > { %4134 = vst.msk [vmem:[#allocation3] sm:$0xff] %vm260_vm2, %v4133_v49  ;;  %4569 = vst.msk [vmem:[#allocation2 + $0x18] sm:$0xff] %vm260_vm2, %v4553_v27  ;;  %v4590_v60 = vrot.slane %v4589_v44, 1  ;;  %v4556_v13 = vmax.f32 %v4540_v56, %v4524_v32  ;;  %v4334_v20 = vmax.f32 %v4332_v11, %v4333_v7  ;;  %v4602_v3 = vsel %vm260_vm2, %v8186_v19, -inf  ;;  %v8576_v7 = vld [vmem:[#allocation44_spill] sm:$0xff] }
 0x294   : > { %v4344_v52 = vrot.slane %v4343_v10, 4  ;;  %v4613_v17 = vrot.slane %v4612_v51, 4  ;;  %4302 = vst.msk [vmem:[#allocation2 + $0x28] sm:$0xff] %vm260_vm2, %v4286_v2  ;;  %v4603_v16 = vmax.f32 %v4601_v6, %v4602_v3  ;;  %v4291_v40 = vmax.f32 %v4275_v23, %v4259_v33 }
 0x295   : > { %v4591_v12 = vmax.f32 %v4589_v44, %v4590_v60  ;;  %4572 = vst.msk [vmem:[#allocation2 + $0x30] sm:$0xff] %vm260_vm2, %v4556_v13  ;;  %v4538_v14 = vld [vmem:[#allocation2 + $0x20] sm:$0xff]  ;;  %v4335_v8 = vrot.slane %v4334_v20, 4  ;;  %v4359_v25 = vsel %vm260_vm2, %v4259_v33, -inf  ;;  %v4528_v39 = vmul.f32 %v8572_v0, %v8115_v42 }
 0x296   : > { %v4554_v29 = vmax.f32 %v4538_v14, %v8168_v38  ;;  %v4345_v32 = vmax.f32 %v4343_v10, %v4344_v52  ;;  %v4614_v54 = vmax.f32 %v4612_v51, %v4613_v17  ;;  %v4604_v62 = vrot.slane %v4603_v16, 4  ;;  %4307 = vst.msk [vmem:[#allocation2 + $0x50] sm:$0xff] %vm260_vm2, %v4291_v40  ;;  %v8574_v38 = vld [vmem:[#allocation17_spill] sm:$0xff]  ;;  %v4274_v52 = vld [vmem:[#allocation2 + $0x48] sm:$0xff] }
 0x297   : > { %v4663_v26 = vsel %vm621_vm3, %v4600_v50, %v4591_v12  ;;  %v4336_v35 = vmax.f32 %v4334_v20, %v4335_v8  ;;  %v4628_v18 = vsel %vm260_vm2, %v4528_v39, -inf  ;;  %v4257_v41 = vmul.f32 %v8077_v57, %v8573_v22  ;;  %v8577_v8 = vld [vmem:[#allocation16_spill] sm:$0xff] }
 0x298   : > { %4570 = vst.msk [vmem:[#allocation2 + $0x20] sm:$0xff] %vm260_vm2, %v4554_v29  ;;  %v4346_v36 = vrot.slane %v4345_v32, 2  ;;  %v4615_v46 = vrot.slane %v4614_v54, 2  ;;  %v4605_v43 = vmax.f32 %v4603_v16, %v4604_v62  ;;  %v8217_v11 = vmul.f32 %v8115_v42, %v8574_v38 }
 0x299   : > { %v4541_v6 = vld [vmem:[#allocation2 + $0x38] sm:$0xff]  ;;  %v4337_v31 = vrot.slane %v4336_v35, 2  ;;  %v4289_v55 = vmax.f32 %v4273_v21, %v4257_v41  ;;  %v4350_v9 = vsel %vm260_vm2, %v4257_v41, -inf  ;;  %v4260_v59 = vmul.f32 %v8575_v15, %v8098_v28 }
 0x29a   : > { %v4347_v4 = vmax.f32 %v4345_v32, %v4346_v36  ;;  %v4557_v1 = vmax.f32 %v4541_v6, %v8180_v58  ;;  %v4616_v33 = vmax.f32 %v4614_v54, %v4615_v46  ;;  %v4606_v47 = vrot.slane %v4605_v43, 2 }
 0x29b   : > { %v4338_v24 = vmax.f32 %v4336_v35, %v4337_v31  ;;  %v4539_v53 = vld [vmem:[#allocation2 + $0x28] sm:$0xff]  ;;  %4305 = vst.msk [vmem:[#allocation2 + $0x40] sm:$0xff] %vm260_vm2, %v4289_v55  ;;  %v4619_v45 = vsel %vm260_vm2, %v8217_v11, -inf  ;;  %v4292_v49 = vmax.f32 %v4276_v34, %v4260_v59  ;;  %v4360_v27 = vsel %vm260_vm2, %v4260_v59, -inf }
 0x29c   : > { %v4348_v44 = vrot.slane %v4347_v4, 1  ;;  %4573 = vst.msk [vmem:[#allocation2 + $0x38] sm:$0xff] %vm260_vm2, %v4557_v1  ;;  %v4617_v50 = vrot.slane %v4616_v33, 1  ;;  %v4555_v48 = vmax.f32 %v4539_v53, %v8186_v19  ;;  %v4607_v58 = vmax.f32 %v4605_v43, %v4606_v47  ;;  %v4279_v43 = vld [vmem:[#allocation2 + $0x70] sm:$0xff]  ;;  %v8579_v1 = vld [vmem:[#allocation20_spill] sm:$0xff] }
 0x29d   : > { %v4339_v56 = vrot.slane %v4338_v24, 1  ;;  %v4544_v10 = vld [vmem:[#allocation2 + $0x50] sm:$0xff]  ;;  %4308 = vst.msk [vmem:[#allocation2 + $0x58] sm:$0xff] %vm260_vm2, %v4292_v49  ;;  %v4361_v51 = vmax.f32 %v4359_v25, %v4360_v27  ;;  %v4529_v2 = vmul.f32 %v7762_v30, %v8119_v63  ;;  %v4258_v60 = vmul.f32 %v8098_v28, %v8576_v7  ;;  %v4277_v49 = vld [vmem:[#allocation2 + $0x60] sm:$0xff]  ;;  %v4280_v7 = vld [vmem:[#allocation2 + $0x78] sm:$0xff] }
 0x29e   : > { %v4349_v13 = vmax.f32 %v4347_v4, %v4348_v44  ;;  %v4618_v20 = vmax.f32 %v4616_v33, %v4617_v50  ;;  %4571 = vst.msk [vmem:[#allocation2 + $0x28] sm:$0xff] %vm260_vm2, %v4555_v48  ;;  %v4608_v3 = vrot.slane %v4607_v58, 1  ;;  %v4560_v23 = vmax.f32 %v4544_v10, %v4528_v39  ;;  %v8580_v47 = vld [vmem:[#allocation19_spill] sm:$0xff]  ;;  %v8581_v27 = vld [vmem:[#allocation21_spill] sm:$0xff] }
 0x29f   : > { %v4340_v19 = vmax.f32 %v4338_v24, %v4339_v56  ;;  %v4362_v17 = vrot.slane %v4361_v51, 4  ;;  %v4629_v16 = vsel %vm260_vm2, %v4529_v2, -inf  ;;  %v4290_v40 = vmax.f32 %v4274_v52, %v4258_v60 }
 0x2a0   : > { %v4609_v12 = vmax.f32 %v4607_v58, %v4608_v3  ;;  %4576 = vst.msk [vmem:[#allocation2 + $0x50] sm:$0xff] %vm260_vm2, %v4560_v23  ;;  %v4630_v14 = vmax.f32 %v4628_v18, %v4629_v16  ;;  %v4351_v30 = vsel %vm260_vm2, %v4258_v60, -inf  ;;  %v4527_v25 = vmul.f32 %v8119_v63, %v8577_v8  ;;  %v4675_v60 = vld [vmem:[#allocation2] sm:$0xff] }
 0x2a1   : > { %v4395_v0 = vsel %vm623_vm4, %v4340_v19, %v8191_v61  ;;  %v4363_v29 = vmax.f32 %v4361_v51, %v4362_v17  ;;  %4306 = vst.msk [vmem:[#allocation2 + $0x48] sm:$0xff] %vm260_vm2, %v4290_v40  ;;  %v4352_v39 = vmax.f32 %v4350_v9, %v4351_v30  ;;  %v4263_v32 = vmul.f32 %v7784_v5, %v8077_v57  ;;  %v8582_v16 = vld [vmem:[#allocation45_spill] sm:$0xff]  ;;  %v8583_v30 = vld [vmem:[#allocation46_spill] sm:$0xff] }
 0x2a2   : > { %v4664_v54 = vsel %vm623_vm4, %v4609_v12, %v4663_v26  ;;  %v4542_v62 = vld [vmem:[#allocation2 + $0x40] sm:$0xff]  ;;  %v4631_v35 = vrot.slane %v4630_v14, 4  ;;  %v8247_v18 = vsel %vm625_vm5, %v4349_v13, %v4395_v0  ;;  %v4620_v22 = vsel %vm260_vm2, %v4527_v25, -inf }
 0x2a3   : > { %v4558_v41 = vmax.f32 %v4542_v62, %v8217_v11  ;;  %v4364_v36 = vrot.slane %v4363_v29, 2  ;;  %v4353_v61 = vrot.slane %v4352_v39, 4  ;;  %v4621_v46 = vmax.f32 %v4619_v45, %v4620_v22  ;;  %v8578_v11 = vld [vmem:[#allocation43_spill] sm:$0xff]  ;;  %v4278_v62 = vld [vmem:[#allocation2 + $0x68] sm:$0xff] }
 0x2a4   : > { %v4545_v21 = vld [vmem:[#allocation2 + $0x58] sm:$0xff]  ;;  %v4632_v38 = vmax.f32 %v4630_v14, %v4631_v35  ;;  %v8252_v6 = vsel %vm625_vm5, %v4618_v20, %v4664_v54  ;;  %v4295_v5 = vmax.f32 %v4279_v43, %v4263_v32  ;;  %v4377_v26 = vsel %vm260_vm2, %v4263_v32, -inf  ;;  %v4676_v35 = vld [vmem:[#allocation2 + $0x8] sm:$0xff] }
 0x2a5   : > { %4574 = vst.msk [vmem:[#allocation2 + $0x40] sm:$0xff] %vm260_vm2, %v4558_v41  ;;  %v4365_v31 = vmax.f32 %v4363_v29, %v4364_v36  ;;  %v4561_v55 = vmax.f32 %v4545_v21, %v4529_v2  ;;  %v4354_v9 = vmax.f32 %v4352_v39, %v4353_v61  ;;  %v4622_v15 = vrot.slane %v4621_v46, 4 }
 0x2a6   : > { %v4633_v59 = vrot.slane %v4632_v38, 2  ;;  %4311 = vst.msk [vmem:[#allocation2 + $0x70] sm:$0xff] %vm260_vm2, %v4295_v5  ;;  %v4532_v4 = vmul.f32 %v8578_v11, %v8115_v42  ;;  %v4261_v33 = vmul.f32 %v8077_v57, %v8579_v1  ;;  %v8263_v34 = vmul.f32 %v8115_v42, %v8580_v47  ;;  %v4677_v5 = vld [vmem:[#allocation2 + $0x10] sm:$0xff] }
 0x2a7   : > { %v4366_v24 = vrot.slane %v4365_v31, 1  ;;  %4577 = vst.msk [vmem:[#allocation2 + $0x58] sm:$0xff] %vm260_vm2, %v4561_v55  ;;  %v4355_v53 = vrot.slane %v4354_v9, 2  ;;  %v4623_v45 = vmax.f32 %v4621_v46, %v4622_v15  ;;  %v4264_v44 = vmul.f32 %v8581_v27, %v8098_v28 }
 0x2a8   : > { %v4634_v50 = vmax.f32 %v4632_v38, %v4633_v59  ;;  %v4543_v48 = vld [vmem:[#allocation2 + $0x48] sm:$0xff]  ;;  %v4646_v58 = vsel %vm260_vm2, %v4532_v4, -inf  ;;  %v4293_v56 = vmax.f32 %v4277_v49, %v4261_v33  ;;  %v4368_v57 = vsel %vm260_vm2, %v4261_v33, -inf  ;;  %v4678_v59 = vld [vmem:[#allocation2 + $0x18] sm:$0xff] }
 0x2a9   : > { %v4367_v10 = vmax.f32 %v4365_v31, %v4366_v24  ;;  %v4356_v51 = vmax.f32 %v4354_v9, %v4355_v53  ;;  %v4559_v42 = vmax.f32 %v4543_v48, %v4527_v25  ;;  %v4624_v2 = vrot.slane %v4623_v45, 2  ;;  %v4680_v49 = vld [vmem:[#allocation2 + $0x28] sm:$0xff] }
 0x2aa   : > { %v4635_v13 = vrot.slane %v4634_v50, 1  ;;  %4309 = vst.msk [vmem:[#allocation2 + $0x60] sm:$0xff] %vm260_vm2, %v4293_v56  ;;  %v4637_v20 = vsel %vm260_vm2, %v8263_v34, -inf  ;;  %v4296_v3 = vmax.f32 %v4280_v7, %v4264_v44  ;;  %v4378_v23 = vsel %vm260_vm2, %v4264_v44, -inf }
 0x2ab   : > { %v4357_v52 = vrot.slane %v4356_v51, 1  ;;  %4575 = vst.msk [vmem:[#allocation2 + $0x48] sm:$0xff] %vm260_vm2, %v4559_v42  ;;  %v4625_v19 = vmax.f32 %v4623_v45, %v4624_v2  ;;  %v4379_v17 = vmax.f32 %v4377_v26, %v4378_v23  ;;  %v4533_v40 = vmul.f32 %v8582_v16, %v8119_v63 }
 0x2ac   : > { %v4636_v12 = vmax.f32 %v4634_v50, %v4635_v13  ;;  %4312 = vst.msk [vmem:[#allocation2 + $0x78] sm:$0xff] %vm260_vm2, %v4296_v3  ;;  %v4262_v14 = vmul.f32 %v8098_v28, %v7815_v37  ;;  %v8282_v8 = vmul.f32 %v8119_v63, %v8583_v30  ;;  %v4691_v25 = vsel %vm260_vm2, %v4675_v60, 0.0  ;;  %v4679_v50 = vld [vmem:[#allocation2 + $0x20] sm:$0xff]  ;;  %v4682_v3 = vld [vmem:[#allocation2 + $0x38] sm:$0xff] }
 0x2ad   : > { %v4358_v0 = vmax.f32 %v4356_v51, %v4357_v52  ;;  %v4626_v29 = vrot.slane %v4625_v19, 1  ;;  %v4548_v39 = vld [vmem:[#allocation2 + $0x70] sm:$0xff]  ;;  %v4380_v32 = vrot.slane %v4379_v17, 4  ;;  %v4647_v54 = vsel %vm260_vm2, %v4533_v40, -inf }
 0x2ae   : > { %v4564_v22 = vmax.f32 %v4548_v39, %v4532_v4  ;;  %v4648_v41 = vmax.f32 %v4646_v58, %v4647_v54  ;;  %v4294_v36 = vmax.f32 %v4278_v62, %v4262_v14  ;;  %v4369_v61 = vsel %vm260_vm2, %v4262_v14, -inf }
 0x2af   : > { %v4397_v37 = vsel %vm627_vm6, %v4358_v0, %v8247_v18  ;;  %v4627_v28 = vmax.f32 %v4625_v19, %v4626_v29  ;;  %v4381_v63 = vmax.f32 %v4379_v17, %v4380_v32  ;;  %v4370_v46 = vmax.f32 %v4368_v57, %v4369_v61 }
 0x2b0   : > { %4580 = vst.msk [vmem:[#allocation2 + $0x70] sm:$0xff] %vm260_vm2, %v4564_v22  ;;  %v4649_v43 = vrot.slane %v4648_v41, 4  ;;  %4310 = vst.msk [vmem:[#allocation2 + $0x68] sm:$0xff] %vm260_vm2, %v4294_v36  ;;  %v8292_v21 = vsel %vm629_vm7, %v4367_v10, %v4397_v37  ;;  %v4638_v38 = vsel %vm260_vm2, %v8282_v8, -inf  ;;  %v4692_v26 = vsel %vm260_vm2, %v4676_v35, 0.0 }
 0x2b1   : > { %v4666_v18 = vsel %vm627_vm6, %v4627_v28, %v8252_v6  ;;  %v4546_v31 = vld [vmem:[#allocation2 + $0x60] sm:$0xff]  ;;  %v4382_v55 = vrot.slane %v4381_v63, 2  ;;  %v4371_v9 = vrot.slane %v4370_v46, 4  ;;  %v4639_v15 = vmax.f32 %v4637_v20, %v4638_v38  ;;  %v4681_v20 = vld [vmem:[#allocation2 + $0x30] sm:$0xff] }
 0x2b2   : > { %v4562_v11 = vmax.f32 %v4546_v31, %v8263_v34  ;;  %v4650_v4 = vmax.f32 %v4648_v41, %v4649_v43  ;;  %v8301_v1 = vsel %vm629_vm7, %v4636_v12, %v4666_v18  ;;  %v4693_v33 = vadd.f32 %v4692_v26, %v4691_v25  ;;  %v4683_v25 = vld [vmem:[#allocation2 + $0x40] sm:$0xff]  ;;  %v4684_v0 = vld [vmem:[#allocation2 + $0x48] sm:$0xff]  ;;  %v4685_v31 = vld [vmem:[#allocation2 + $0x50] sm:$0xff] }
 0x2b3   : > { %v4383_v47 = vmax.f32 %v4381_v63, %v4382_v55  ;;  %v4549_v24 = vld [vmem:[#allocation2 + $0x78] sm:$0xff]  ;;  %v4372_v53 = vmax.f32 %v4370_v46, %v4371_v9  ;;  %v4640_v45 = vrot.slane %v4639_v15, 4  ;;  %v4700_v27 = vsel %vm260_vm2, %v4677_v5, 0.0  ;;  %v4313_v63 = vld [vmem:[#allocation3] sm:$0xff] }
 0x2b4   : > { %4578 = vst.msk [vmem:[#allocation2 + $0x60] sm:$0xff] %vm260_vm2, %v4562_v11  ;;  %v4565_v6 = vmax.f32 %v4549_v24, %v4533_v40  ;;  %v4651_v44 = vrot.slane %v4650_v4, 2  ;;  %v4694_v48 = vrot.slane %v4693_v33, 4  ;;  %v4701_v34 = vsel %vm260_vm2, %v4678_v59, 0.0  ;;  %v4686_v55 = vld [vmem:[#allocation2 + $0x58] sm:$0xff] }
 0x2b5   : > { %v4384_v58 = vrot.slane %v4383_v47, 1  ;;  %v4373_v56 = vrot.slane %v4372_v53, 2  ;;  %v4641_v57 = vmax.f32 %v4639_v15, %v4640_v45  ;;  %v4702_v10 = vadd.f32 %v4701_v34, %v4700_v27 }
 0x2b6   : > { %4581 = vst.msk [vmem:[#allocation2 + $0x78] sm:$0xff] %vm260_vm2, %v4565_v6  ;;  %v4652_v51 = vmax.f32 %v4650_v4, %v4651_v44  ;;  %v4695_v42 = vadd.f32 %v4694_v48, %v4693_v33  ;;  %v4710_v2 = vsel %vm260_vm2, %v4680_v49, 0.0  ;;  %v4709_v52 = vsel %vm260_vm2, %v4679_v50, 0.0 }
 0x2b7   : > { %v4374_v7 = vmax.f32 %v4372_v53, %v4373_v56  ;;  %v4547_v60 = vld [vmem:[#allocation2 + $0x68] sm:$0xff]  ;;  %v4642_v13 = vrot.slane %v4641_v57, 2  ;;  %v4703_v23 = vrot.slane %v4702_v10, 4  ;;  %v4385_v19 = vmax.f32 %v4383_v47, %v4384_v58 }
 0x2b8   : > { %v4563_v17 = vmax.f32 %v4547_v60, %v8282_v8  ;;  %v4696_v16 = vrot.slane %v4695_v42, 2  ;;  %v4711_v40 = vadd.f32 %v4710_v2, %v4709_v52  ;;  %v4653_v12 = vrot.slane %v4652_v51, 1 }
 0x2b9   : > { %v4375_v14 = vrot.slane %v4374_v7, 1  ;;  %v4643_v30 = vmax.f32 %v4641_v57, %v4642_v13  ;;  %v4704_v29 = vadd.f32 %v4703_v23, %v4702_v10  ;;  %v4718_v54 = vsel %vm260_vm2, %v4681_v20, 0.0 }
 0x2ba   : > { %4579 = vst.msk [vmem:[#allocation2 + $0x68] sm:$0xff] %vm260_vm2, %v4563_v17  ;;  %v4697_v39 = vadd.f32 %v4696_v16, %v4695_v42  ;;  %v4712_v32 = vrot.slane %v4711_v40, 4  ;;  %v4719_v62 = vsel %vm260_vm2, %v4682_v3, 0.0  ;;  %v4727_v37 = vsel %vm260_vm2, %v4683_v25, 0.0 }
 0x2bb   : > { %v4376_v35 = vmax.f32 %v4374_v7, %v4375_v14  ;;  %v4644_v22 = vrot.slane %v4643_v30, 1  ;;  %v4705_v41 = vrot.slane %v4704_v29, 2  ;;  %v4720_v8 = vadd.f32 %v4719_v62, %v4718_v54  ;;  %v4687_v9 = vld [vmem:[#allocation2 + $0x60] sm:$0xff] }
 0x2bc   : > { %v4698_v36 = vrot.slane %v4697_v39, 1  ;;  %v4713_v61 = vadd.f32 %v4712_v32, %v4711_v40  ;;  %v4728_v28 = vsel %vm260_vm2, %v4684_v0, 0.0  ;;  %v4654_v26 = vmax.f32 %v4652_v51, %v4653_v12 }
 0x2bd   : > { %v4399_v46 = vsel %vm631_vm8, %v4376_v35, %v8292_v21  ;;  %v4645_v43 = vmax.f32 %v4643_v30, %v4644_v22  ;;  %v4706_v38 = vadd.f32 %v4705_v41, %v4704_v29  ;;  %v4721_v5 = vrot.slane %v4720_v8, 4  ;;  %v4689_v21 = vld [vmem:[#allocation2 + $0x70] sm:$0xff]  ;;  %v4690_v53 = vld [vmem:[#allocation2 + $0x78] sm:$0xff] }
 0x2be   : > { %v4400_v18 = vsel %vm633_vm9, %v4385_v19, %v4399_v46  ;;  %v4714_v15 = vrot.slane %v4713_v61, 2  ;;  %v4729_v59 = vadd.f32 %v4728_v28, %v4727_v37  ;;  %v4699_v33 = vadd.f32 %v4698_v36, %v4697_v39 }
 0x2bf   : > { %v4402_v11 = vadd.f32 %v4400_v18, %v4313_v63  ;;  %v4668_v4 = vsel %vm631_vm8, %v4645_v43, %v8301_v1  ;;  %v4722_v47 = vadd.f32 %v4721_v5, %v4720_v8  ;;  %v4707_v45 = vrot.slane %v4706_v38, 1  ;;  %v4673_v18 = vld [vmem:[#allocation4] sm:$0xff] }
 0x2c0   : > { %v4669_v24 = vsel %vm633_vm9, %v4654_v26, %v4668_v4  ;;  %v4715_v49 = vadd.f32 %v4714_v15, %v4713_v61  ;;  %v4730_v27 = vrot.slane %v4729_v59, 4  ;;  %v4736_v50 = vsel %vm260_vm2, %v4685_v31, 0.0 }
 0x2c1   : > { %4403 = vst.msk [vmem:[#allocation3] sm:$0xff] %vm260_vm2, %v4402_v11  ;;  %v4688_v6 = vld [vmem:[#allocation2 + $0x68] sm:$0xff]  ;;  %v4723_v44 = vrot.slane %v4722_v47, 2  ;;  %v4737_v48 = vsel %vm260_vm2, %v4686_v55, 0.0  ;;  %v4745_v34 = vsel %vm260_vm2, %v4687_v9, 0.0  ;;  %v4754_v42 = vsel %vm260_vm2, %v4689_v21, 0.0 }
 0x2c2   : > { %v4716_v1 = vrot.slane %v4715_v49, 1  ;;  %v4731_v58 = vadd.f32 %v4730_v27, %v4729_v59  ;;  %v4738_v56 = vadd.f32 %v4737_v48, %v4736_v50  ;;  %v4746_v57 = vsel %vm260_vm2, %v4688_v6, 0.0 }
 0x2c3   : > { %v4724_v10 = vadd.f32 %v4723_v44, %v4722_v47  ;;  %v4747_v51 = vadd.f32 %v4746_v57, %v4745_v34  ;;  %v4755_v2 = vsel %vm260_vm2, %v4690_v53, 0.0  ;;  %v4708_v7 = vadd.f32 %v4707_v45, %v4706_v38 }
 0x2c4   : > { %v4732_v60 = vrot.slane %v4731_v58, 2  ;;  %v4739_v13 = vrot.slane %v4738_v56, 4  ;;  %v4756_v20 = vadd.f32 %v4755_v2, %v4754_v42  ;;  %v4717_v3 = vadd.f32 %v4716_v1, %v4715_v49 }
 0x2c5   : > { %v4748_v23 = vrot.slane %v4747_v51, 4  ;;  %v4725_v52 = vrot.slane %v4724_v10, 1  ;;  %v4771_v0 = vsel %vm621_vm3, %v4708_v7, %v4699_v33 }
 0x2c6   : > { %v4733_v19 = vadd.f32 %v4732_v60, %v4731_v58  ;;  %v4740_v17 = vadd.f32 %v4739_v13, %v4738_v56  ;;  %v4757_v16 = vrot.slane %v4756_v20, 4  ;;  %v4772_v32 = vsel %vm623_vm4, %v4717_v3, %v4771_v0 }
 0x2c7   : > { %v4749_v40 = vadd.f32 %v4748_v23, %v4747_v51  ;;  %v4726_v54 = vadd.f32 %v4725_v52, %v4724_v10 }
 0x2c8   : > { %v4582_v12 = vld [vmem:[#allocation3] sm:$0xff]  ;;  %v4734_v14 = vrot.slane %v4733_v19, 1  ;;  %v4741_v30 = vrot.slane %v4740_v17, 2  ;;  %v4758_v25 = vadd.f32 %v4757_v16, %v4756_v20 }
 0x2c9   : > { %v4671_v29 = vadd.f32 %v4669_v24, %v4582_v12  ;;  %v4750_v39 = vrot.slane %v4749_v40, 2  ;;  %v4773_v61 = vsel %vm625_vm5, %v4726_v54, %v4772_v32 }
 0x2ca   : > { %v4735_v62 = vadd.f32 %v4734_v14, %v4733_v19  ;;  %v4742_v35 = vadd.f32 %v4741_v30, %v4740_v17  ;;  %v4759_v22 = vrot.slane %v4758_v25, 2 }
 0x2cb   : > { %4672 = vst.msk [vmem:[#allocation3] sm:$0xff] %vm260_vm2, %v4671_v29  ;;  %v4751_v41 = vadd.f32 %v4750_v39, %v4749_v40 }
 0x2cc   : > { %v4743_v8 = vrot.slane %v4742_v35, 1  ;;  %v4760_v36 = vadd.f32 %v4759_v22, %v4758_v25  ;;  %v4774_v28 = vsel %vm627_vm6, %v4735_v62, %v4773_v61 }
 0x2cd   : > { %v4752_v37 = vrot.slane %v4751_v41, 1 }
 0x2ce   : > { %v4744_v63 = vadd.f32 %v4743_v8, %v4742_v35  ;;  %v4761_v46 = vrot.slane %v4760_v36, 1 }
 0x2cf   : > { %v4753_v43 = vadd.f32 %v4752_v37, %v4751_v41 }
 0x2d0   : > { %v4762_v38 = vadd.f32 %v4761_v46, %v4760_v36  ;;  %v4775_v5 = vsel %vm629_vm7, %v4744_v63, %v4774_v28 }
 0x2d1   : > { %v4776_v26 = vsel %vm631_vm8, %v4753_v43, %v4775_v5 }
 0x2d2   : > { %v4674_v31 = vld [vmem:[#allocation3] sm:$0xff]  ;;  %v4777_v55 = vsel %vm633_vm9, %v4762_v38, %v4776_v26 }
 0x2d3   : > { %v4779_v9 = vadd.f32 %v4777_v55, %v4674_v31 }
 0x2d5   : > { %v4780_v15 = vadd.f32 %v4779_v9, %v4673_v18 }
 0x2d7   : > { %4781 = vst.msk [vmem:[#allocation4] sm:$0xff] %vm260_vm2, %v4780_v15 }
 0x2d8   : > { %5632 = shalt.err (!%p5629_p13)
}
 0x2d9   : > { %s5633_s9 = scalar_lea.hbm %s8377_s3, 128 }
 0x2da   : > { %p5634_p0 = scmp.ne.s32.totalorder %s8377_s3, %s5633_s9  ;;  %p5639_p3 = scmp.lt.u32.totalorder %s5633_s9, %s8377_s3 }
 0x2dc   : > { %p5635_p1 = pnand %p5634_p0, %p8338_p6 }
 0x2de   : > { %p5636_p2 = pneg %p5635_p1 }
 0x2e0   : > { %p5641_p4 = pnand %p5639_p3, %p5636_p2 }
 0x2e2   : > { %5644 = shalt.err (!%p5641_p4)
}
 0x2e3   : > { %5518 = dma.vmem_to_hbm [thread:$0]  (%p8338_p6), %s4793_s4, 128, %s8377_s3, [#allocation5]  }
 0x2e4   : > { %5658 = dma.done.wait (%p8338_p6), [#allocation5], 128  }
 0x2e5   : > { %5660 = vsyncadd (%p8338_p6), [#allocation5], 4294967168 }
 0x2e6 PF: > { %s14_s14 = sadd.s32 1, %s5671_s14   ;;  %s8585_s12 = smov %s5667_s13 }
 0x2e7   : > { %p11_p5 = scmp.ge.s32.totalorder %s14_s14, 4   ;;  %s8586_s13 = smov %s8588_s16 }
 0x2e9   :  { %13 = sbr.rel (!%p11_p5) target bundleno = 2 (0x2), region = 85 }
 0x2f0   :  { %4805 = vsyncpa [#allocation5], 1 }
 0x2f1   :  { %4807 = vsyncpa [#allocation5 + $0x1], 1 }

</bundles_post_ra>
